<compile_context>
chip_gen: v6e
topology: v6e:2x2x1
jax: 0.10.0
libtpu: 0.0.40
codegen_flags: <defaults>
</compile_context>

<pallas_src>
import jax
import jax.numpy as jnp
from jax.experimental import pallas as pl
from jax.experimental.pallas import tpu as pltpu


def _round_up(x, m):
    return ((x + m - 1) // m) * m


def _pad2d(x, rows, cols, dtype=jnp.float32):
    out = jnp.zeros((rows, cols), dtype)
    return out.at[: x.shape[0], : x.shape[1]].set(x.astype(dtype))


def egcl_kernel(rowc_ref, colc_ref, radial_ref, mask_ref, rowl_ref,
                gs_ref, gt_ref, w1r_ref, w2_ref, b2_ref,
                h_ref, w3h_ref, w3a_ref, b3_ref, w4_ref, b4_ref,
                hout_ref, agg_ref):
    t = pl.program_id(0)
    TE = rowc_ref.shape[0]          # edges per tile
    NP = gs_ref.shape[0]            # (padded) number of nodes

    @pl.when(t == 0)
    def _init():
        agg_ref[...] = jnp.zeros_like(agg_ref)

    # ---- gather one-hots, lane-dense over nodes: [TE, NP]
    lane_n = jax.lax.broadcasted_iota(jnp.int32, (TE, NP), 1)
    oh_r = (lane_n == rowc_ref[...]).astype(jnp.bfloat16)
    oh_c = (lane_n == colc_ref[...]).astype(jnp.bfloat16)

    # ---- edge MLP with W1 folded into the gather:
    # pre1 = (h@w1s + b1)[row] + (h@w1t)[col] + radial * w1r
    pre1 = (jnp.dot(oh_r, gs_ref[...], preferred_element_type=jnp.float32)
            + jnp.dot(oh_c, gt_ref[...], preferred_element_type=jnp.float32)
            + radial_ref[...] * w1r_ref[...])
    m1 = jax.nn.silu(pre1)
    pre2 = jnp.dot(m1.astype(jnp.bfloat16), w2_ref[...],
                   preferred_element_type=jnp.float32) + b2_ref[...]
    # edge_mask folded directly into edge_feat (TE*HP VPU ops, module semantics)
    edge_feat = jax.nn.silu(pre2) * mask_ref[...]                 # [TE, HP] f32

    # ---- segment sum: [NP, TE] one-hot built from sublane iota vs lane-dense
    # row ids (no transpose), accumulated in the resident f32 scratch.
    sub_n = jax.lax.broadcasted_iota(jnp.int32, (NP, TE), 0)
    oh_nt = (sub_n == rowl_ref[...]).astype(jnp.bfloat16)
    agg_ref[...] += jnp.dot(oh_nt, edge_feat.astype(jnp.bfloat16),
                            preferred_element_type=jnp.float32)   # [NP, HP]

    # ---- node MLP epilogue on the last edge tile (constant out index_map ->
    # single writeback at grid end).
    @pl.when(t == pl.num_programs(0) - 1)
    def _epilogue():
        agg_b = agg_ref[...].astype(jnp.bfloat16)
        pre3 = (jnp.dot(h_ref[...], w3h_ref[...],
                        preferred_element_type=jnp.float32)
                + jnp.dot(agg_b, w3a_ref[...],
                          preferred_element_type=jnp.float32)
                + b3_ref[...])
        n1 = jax.nn.silu(pre3).astype(jnp.bfloat16)
        hout_ref[...] = (jnp.dot(n1, w4_ref[...],
                                 preferred_element_type=jnp.float32)
                         + b4_ref[...])


def egcl_pallas(h, coord, row, col, edge_mask, params, *, edge_tile=256):
    N, F = h.shape
    E = int(row.shape[0])
    H = params["w2"].shape[0]

    LANE, SUB = 128, 8
    FP = _round_up(F, LANE)
    HP = _round_up(H, LANE)
    NP = _round_up(N, SUB)
    # Per-generation note: TE=128/256 is native on v5e; on v6e TE>=512 better
    # fills the 256-wide MXU and amortizes per-step overhead; on v7x keep the
    # TE*N one-hot transients within the ~48 MiB VMEM budget.
    TE = _round_up(max(min(edge_tile, E), 1), LANE)
    EP = _round_up(E, TE)
    T = EP // TE

    f32, bf = jnp.float32, jnp.bfloat16

    # --- edge padding: padded edges point at node 0 and carry a zero mask,
    # so they contribute exactly zero to agg.
    pad_e = EP - E
    row_p = jnp.concatenate([row.astype(jnp.int32), jnp.zeros((pad_e,), jnp.int32)])
    col_p = jnp.concatenate([col.astype(jnp.int32), jnp.zeros((pad_e,), jnp.int32)])
    mask_p = jnp.concatenate([edge_mask.reshape(-1).astype(f32),
                              jnp.zeros((pad_e,), f32)])

    # --- radial in f32, precomputed once (cheap E*3 gather/reduce in XLA)
    coord_f = coord.astype(f32)
    cdiff = coord_f[row_p] - coord_f[col_p]
    radial = jnp.sum(cdiff * cdiff, axis=-1, keepdims=True)        # (EP, 1) f32

    row_sub = row_p.reshape(EP, 1)       # sublane-oriented ids (gather one-hots)
    col_sub = col_p.reshape(EP, 1)
    mask_sub = mask_p.reshape(EP, 1)
    row_lane = row_p.reshape(1, EP)      # lane-dense ids (scatter one-hot)

    # --- fold W1 into the gather: one-time O(N*F*H) instead of per-edge
    h32 = h.astype(f32)
    gs = _pad2d(h32 @ params["w1s"] + params["b1"], NP, HP, bf)    # (h@w1s + b1)
    gt = _pad2d(h32 @ params["w1t"], NP, HP, bf)                   # (h@w1t)

    # --- resident operands, bf16 on the MXU path, f32 on the VPU path
    h_b = _pad2d(h, NP, FP, bf)
    w1r = _pad2d(params["w1r"], 1, HP)
    w2 = _pad2d(params["w2"], HP, HP, bf)
    b2 = _pad2d(params["b2"], 1, HP)
    w3h = _pad2d(params["w3h"], FP, HP, bf)
    w3a = _pad2d(params["w3a"], HP, HP, bf)
    b3 = _pad2d(params["b3"], 1, HP)
    w4 = _pad2d(params["w4"], HP, FP, bf)
    b4 = _pad2d(params["b4"], 1, FP)

    def build(resident_mode):
        def res(shape):
            if resident_mode is None:
                return pl.BlockSpec(shape, lambda t: (0, 0))
            return pl.BlockSpec(shape, lambda t: (0, 0),
                                pipeline_mode=resident_mode)

        grid_spec = pltpu.PrefetchScalarGridSpec(
            num_scalar_prefetch=0,
            grid=(T,),
            in_specs=[
                pl.BlockSpec((TE, 1), lambda t: (t, 0)),   # row ids (sublane)
                pl.BlockSpec((TE, 1), lambda t: (t, 0)),   # col ids (sublane)
                pl.BlockSpec((TE, 1), lambda t: (t, 0)),   # radial f32
                pl.BlockSpec((TE, 1), lambda t: (t, 0)),   # edge mask f32
                pl.BlockSpec((1, TE), lambda t: (0, t)),   # row ids (lane-dense)
                res((NP, HP)), res((NP, HP)), res((1, HP)),    # gs, gt, w1r
                res((HP, HP)), res((1, HP)),                   # w2, b2
                res((NP, FP)), res((FP, HP)), res((HP, HP)), res((1, HP)),
                res((HP, FP)), res((1, FP)),                   # w4, b4
            ],
            out_specs=pl.BlockSpec((NP, FP), lambda t: (0, 0)),
            scratch_shapes=[pltpu.VMEM((NP, HP), jnp.float32)],   # agg accumulator
        )
        return pl.pallas_call(
            egcl_kernel,
            out_shape=jax.ShapeDtypeStruct((NP, FP), jnp.float32),
            grid_spec=grid_spec,
            compiler_params=pltpu.CompilerParams(
                dimension_semantics=("arbitrary",),
                # 32 MiB is safe on all generations (v5e scoped default is 16
                # MiB); raise toward ~100 MiB on v6e for big TE, keep <=48 MiB
                # on v7x (64 MiB physical).
                vmem_limit_bytes=32 * 1024 * 1024,
            ),
        )

    args = (row_sub, col_sub, radial, mask_sub, row_lane,
            gs, gt, w1r, w2, b2, h_b, w3h, w3a, b3, w4, b4)

    try:
        # Single-buffer the constant-index operands (they never change, so
        # double-buffering only doubles their VMEM footprint).
        out = jax.block_until_ready(build(pl.Buffered(1))(*args))
    except Exception:
        # Fallback for Pallas versions where Buffered(1) resident blocks are
        # not supported by the TPU lowering.
        out = jax.block_until_ready(build(None)(*args))

    return out[:N, :F]


def egcl_reference(h, coord, row, col, edge_mask, params):
    """Pure-JAX f32 reference with the exact PyTorch E_GCL forward semantics."""
    src, tgt = h[row], h[col]
    cd = coord[row] - coord[col]
    radial = jnp.sum(cd ** 2, axis=1, keepdims=True)
    m = jax.nn.silu(src @ params["w1s"] + tgt @ params["w1t"]
                    + radial * params["w1r"] + params["b1"])
    m = jax.nn.silu(m @ params["w2"] + params["b2"])
    m = m * edge_mask.reshape(-1, 1)
    agg = jnp.zeros((h.shape[0], m.shape[1]), jnp.float32).at[row].add(m)
    n1 = jax.nn.silu(h @ params["w3h"] + agg @ params["w3a"] + params["b3"])
    return n1 @ params["w4"] + params["b4"]


def egcl_reference_kernel_path(h, coord, row, col, edge_mask, params):
    """Reference emulating the kernel's compute path (W1 folded + bf16 casts)."""
    f32, bf = jnp.float32, jnp.bfloat16
    h32 = h.astype(f32)
    gs = (h32 @ params["w1s"] + params["b1"]).astype(bf).astype(f32)
    gt = (h32 @ params["w1t"]).astype(bf).astype(f32)
    cd = h32.dtype.type(0) + coord.astype(f32)[row] - coord.astype(f32)[col]
    radial = jnp.sum(cd * cd, axis=1, keepdims=True)
    pre1 = gs[row] + gt[col] + radial * params["w1r"]
    m1 = jax.nn.silu(pre1)
    pre2 = jnp.dot(m1.astype(bf), params["w2"].astype(bf),
                   preferred_element_type=f32) + params["b2"]
    ef = jax.nn.silu(pre2) * edge_mask.reshape(-1, 1)
    ef = ef.astype(bf).astype(f32)
    agg = jnp.zeros((h.shape[0], ef.shape[1]), f32).at[row].add(ef)
    pre3 = (jnp.dot(h.astype(bf), params["w3h"].astype(bf), preferred_element_type=f32)
            + jnp.dot(agg.astype(bf), params["w3a"].astype(bf), preferred_element_type=f32)
            + params["b3"])
    n1 = jax.nn.silu(pre3)
    return jnp.dot(n1.astype(bf), params["w4"].astype(bf),
                   preferred_element_type=f32) + params["b4"]


def make_params(key, F, H):
    ks = jax.random.split(key, 8)
    s = 0.1
    return {
        # edge_mlp Linear(2F+1, H): split by input segment [src | tgt | radial]
        "w1s": s * jax.random.normal(ks[0], (F, H), jnp.float32),
        "w1t": s * jax.random.normal(ks[1], (F, H), jnp.float32),
        "w1r": s * jax.random.normal(ks[2], (1, H), jnp.float32),
        "b1":  s * jax.random.normal(ks[3], (1, H), jnp.float32),
        # edge_mlp Linear(H, H)
        "w2":  s * jax.random.normal(ks[4], (H, H), jnp.float32),
        "b2":  s * jax.random.normal(ks[5], (1, H), jnp.float32),
        # node_mlp Linear(F+H, H): split by input segment [h | agg]
        "w3h": s * jax.random.normal(ks[6], (F, H), jnp.float32),
        "w3a": s * jax.random.normal(ks[7], (H, H), jnp.float32),
        "b3":  jnp.zeros((1, H), jnp.float32),
        # node_mlp Linear(H, F)
        "w4":  s * jax.random.normal(jax.random.fold_in(key, 99), (H, F), jnp.float32),
        "b4":  jnp.zeros((1, F), jnp.float32),
    }


if __name__ == "__main__":
    key = jax.random.PRNGKey(0)
    N, F, H, D = 16, 32, 32, 3        # nodes, input_nf, hidden_nf, coord dim
    # fully-connected graph without self-loops: E = N*(N-1) = 240 edges
    rows, cols = [], []
    for i in range(N):
        for j in range(N):
            if i != j:
                rows.append(i)
                cols.append(j)
    row = jnp.asarray(rows, jnp.int32)
    col = jnp.asarray(cols, jnp.int32)
    E = int(row.shape[0])

    k1, k2, k3, k4 = jax.random.split(key, 4)
    h = jax.random.normal(k1, (N, F), jnp.float32)
    coord = jax.random.normal(k2, (N, D), jnp.float32)
    edge_mask = jax.random.bernoulli(k3, 0.8, (E, 1)).astype(jnp.float32)
    params = make_params(k4, F, H)

    # edge_tile=128 -> 2 edge tiles: exercises the accumulator + epilogue path.
    out = jax.block_until_ready(
        egcl_pallas(h, coord, row, col, edge_mask, params, edge_tile=128))

    ref_path = egcl_reference_kernel_path(h, coord, row, col, edge_mask, params)
    ref_f32 = egcl_reference(h, coord, row, col, edge_mask, params)

    err_path = float(jnp.max(jnp.abs(out - ref_path)))
    err_f32 = float(jnp.max(jnp.abs(out - ref_f32)))

    assert out.shape == (N, F)
    assert err_path < 1e-2, f"mismatch vs kernel-path reference, max err {err_path}"
    assert err_f32 < 0.25, f"mismatch vs f32 reference, max err {err_f32}"
    print("KERNEL_OK")
</pallas_src>

<mosaic_0001>
module attributes {stable_mosaic.version = 11 : i64} {
  func.func @egcl_kernel(%arg0: i32, %arg1: memref<128x1xi32, #tpu.memory_space<vmem>>, %arg2: memref<128x1xi32, #tpu.memory_space<vmem>>, %arg3: memref<128x1xf32, #tpu.memory_space<vmem>>, %arg4: memref<128x1xf32, #tpu.memory_space<vmem>>, %arg5: memref<1x128xi32, #tpu.memory_space<vmem>>, %arg6: memref<16x128xbf16, #tpu.memory_space<vmem>>, %arg7: memref<16x128xbf16, #tpu.memory_space<vmem>>, %arg8: memref<1x128xf32, #tpu.memory_space<vmem>>, %arg9: memref<128x128xbf16, #tpu.memory_space<vmem>>, %arg10: memref<1x128xf32, #tpu.memory_space<vmem>>, %arg11: memref<16x128xbf16, #tpu.memory_space<vmem>>, %arg12: memref<128x128xbf16, #tpu.memory_space<vmem>>, %arg13: memref<128x128xbf16, #tpu.memory_space<vmem>>, %arg14: memref<1x128xf32, #tpu.memory_space<vmem>>, %arg15: memref<128x128xbf16, #tpu.memory_space<vmem>>, %arg16: memref<1x128xf32, #tpu.memory_space<vmem>>, %arg17: memref<16x128xf32, #tpu.memory_space<vmem>>, %arg18: memref<16x128xf32, #tpu.memory_space<vmem>>) attributes {dimension_semantics = [#tpu.dimension_semantics<arbitrary>], iteration_bounds = array<i64: 2>, scalar_prefetch = 0 : i64, scratch_operands = 1 : i64, tpu.core_type = #tpu.core_type<tc>, window_params = [{transform_indices = @transform_0, window_bounds = array<i64: 128, 1>}, {transform_indices = @transform_1, window_bounds = array<i64: 128, 1>}, {transform_indices = @transform_2, window_bounds = array<i64: 128, 1>}, {transform_indices = @transform_3, window_bounds = array<i64: 128, 1>}, {transform_indices = @transform_4, window_bounds = array<i64: 1, 128>}, {pipeline_mode = #tpu.pipeline_mode<synchronous>, transform_indices = @transform_5, window_bounds = array<i64: 16, 128>}, {pipeline_mode = #tpu.pipeline_mode<synchronous>, transform_indices = @transform_6, window_bounds = array<i64: 16, 128>}, {pipeline_mode = #tpu.pipeline_mode<synchronous>, transform_indices = @transform_7, window_bounds = array<i64: 1, 128>}, {pipeline_mode = #tpu.pipeline_mode<synchronous>, transform_indices = @transform_8, window_bounds = array<i64: 128, 128>}, {pipeline_mode = #tpu.pipeline_mode<synchronous>, transform_indices = @transform_9, window_bounds = array<i64: 1, 128>}, {pipeline_mode = #tpu.pipeline_mode<synchronous>, transform_indices = @transform_10, window_bounds = array<i64: 16, 128>}, {pipeline_mode = #tpu.pipeline_mode<synchronous>, transform_indices = @transform_11, window_bounds = array<i64: 128, 128>}, {pipeline_mode = #tpu.pipeline_mode<synchronous>, transform_indices = @transform_12, window_bounds = array<i64: 128, 128>}, {pipeline_mode = #tpu.pipeline_mode<synchronous>, transform_indices = @transform_13, window_bounds = array<i64: 1, 128>}, {pipeline_mode = #tpu.pipeline_mode<synchronous>, transform_indices = @transform_14, window_bounds = array<i64: 128, 128>}, {pipeline_mode = #tpu.pipeline_mode<synchronous>, transform_indices = @transform_15, window_bounds = array<i64: 1, 128>}, {pipeline_mode = #tpu.pipeline_mode<synchronous>, transform_indices = @transform_16, window_bounds = array<i64: 16, 128>}]} {
    %c0_i32 = arith.constant 0 : i32
    %0 = arith.cmpi eq, %arg0, %c0_i32 : i32
    %1 = arith.extui %0 : i1 to i32
    %c0_i32_0 = arith.constant 0 : i32
    %2 = arith.cmpi ne, %1, %c0_i32_0 : i32
    scf.if %2 {
      %cst_30 = arith.constant 0.000000e+00 : f32
      %63 = vector.broadcast %cst_30 : f32 to vector<16x128xf32>
      %c0_31 = arith.constant 0 : index
      %c0_32 = arith.constant 0 : index
      %64 = vector.load %arg18[%c0_31, %c0_32] : memref<16x128xf32, #tpu.memory_space<vmem>>, vector<16x128xf32>
      tpu.vector_store %arg18[%c0_31, %c0_32], %63 {strides = array<i32>} : memref<16x128xf32, #tpu.memory_space<vmem>>, vector<16x128xf32>,
    } else {
    }
    %3 = tpu.iota {dimensions = array<i32: 1>} : vector<128x16xi32>
    %c0 = arith.constant 0 : index
    %c0_1 = arith.constant 0 : index
    %4 = vector.load %arg1[%c0, %c0_1] : memref<128x1xi32, #tpu.memory_space<vmem>>, vector<128x1xi32>
    %5 = vector.broadcast %4 : vector<128x1xi32> to vector<128x16xi32>
    %6 = arith.cmpi eq, %3, %5 : vector<128x16xi32>
    %7 = arith.extui %6 : vector<128x16xi1> to vector<128x16xi32>
    %8 = arith.sitofp %7 : vector<128x16xi32> to vector<128x16xf32>
    %9 = arith.truncf %8 : vector<128x16xf32> to vector<128x16xbf16>
    %c0_2 = arith.constant 0 : index
    %c0_3 = arith.constant 0 : index
    %10 = vector.load %arg2[%c0_2, %c0_3] : memref<128x1xi32, #tpu.memory_space<vmem>>, vector<128x1xi32>
    %11 = vector.broadcast %10 : vector<128x1xi32> to vector<128x16xi32>
    %12 = arith.cmpi eq, %3, %11 : vector<128x16xi32>
    %13 = arith.extui %12 : vector<128x16xi1> to vector<128x16xi32>
    %14 = arith.sitofp %13 : vector<128x16xi32> to vector<128x16xf32>
    %15 = arith.truncf %14 : vector<128x16xf32> to vector<128x16xbf16>
    %c0_4 = arith.constant 0 : index
    %c0_5 = arith.constant 0 : index
    %16 = vector.load %arg6[%c0_4, %c0_5] : memref<16x128xbf16, #tpu.memory_space<vmem>>, vector<16x128xbf16>
    %cst = arith.constant dense<0.000000e+00> : vector<128x128xf32>
    %17 = tpu.matmul %9, %16, %cst {dimension_numbers = #tpu.dot_dimension_numbers<[1], [0], [0], [1], [0, 0, 1, 1], [], []>} : vector<128x16xbf16>, vector<16x128xbf16>, vector<128x128xf32> -> vector<128x128xf32>
    %c0_6 = arith.constant 0 : index
    %c0_7 = arith.constant 0 : index
    %18 = vector.load %arg7[%c0_6, %c0_7] : memref<16x128xbf16, #tpu.memory_space<vmem>>, vector<16x128xbf16>
    %cst_8 = arith.constant dense<0.000000e+00> : vector<128x128xf32>
    %19 = tpu.matmul %15, %18, %cst_8 {dimension_numbers = #tpu.dot_dimension_numbers<[1], [0], [0], [1], [0, 0, 1, 1], [], []>} : vector<128x16xbf16>, vector<16x128xbf16>, vector<128x128xf32> -> vector<128x128xf32>
    %20 = arith.addf %17, %19 : vector<128x128xf32>
    %c0_9 = arith.constant 0 : index
    %c0_10 = arith.constant 0 : index
    %21 = vector.load %arg3[%c0_9, %c0_10] : memref<128x1xf32, #tpu.memory_space<vmem>>, vector<128x1xf32>
    %c0_11 = arith.constant 0 : index
    %c0_12 = arith.constant 0 : index
    %22 = vector.load %arg8[%c0_11, %c0_12] : memref<1x128xf32, #tpu.memory_space<vmem>>, vector<1x128xf32>
    %23 = vector.broadcast %21 : vector<128x1xf32> to vector<128x128xf32>
    %24 = vector.broadcast %22 : vector<1x128xf32> to vector<128x128xf32>
    %25 = arith.mulf %23, %24 : vector<128x128xf32>
    %26 = arith.addf %20, %25 : vector<128x128xf32>
    %27 = arith.negf %26 : vector<128x128xf32>
    %28 = math.exp %27 : vector<128x128xf32>
    %cst_13 = arith.constant 1.000000e+00 : f32
    %29 = vector.broadcast %cst_13 : f32 to vector<128x128xf32>
    %30 = arith.addf %29, %28 : vector<128x128xf32>
    %31 = arith.divf %29, %30 : vector<128x128xf32>
    %32 = arith.mulf %26, %31 : vector<128x128xf32>
    %33 = arith.truncf %32 : vector<128x128xf32> to vector<128x128xbf16>
    %c0_14 = arith.constant 0 : index
    %c0_15 = arith.constant 0 : index
    %34 = vector.load %arg9[%c0_14, %c0_15] : memref<128x128xbf16, #tpu.memory_space<vmem>>, vector<128x128xbf16>
    %cst_16 = arith.constant dense<0.000000e+00> : vector<128x128xf32>
    %35 = tpu.matmul %33, %34, %cst_16 {dimension_numbers = #tpu.dot_dimension_numbers<[1], [0], [0], [1], [0, 0, 1, 1], [], []>} : vector<128x128xbf16>, vector<128x128xbf16>, vector<128x128xf32> -> vector<128x128xf32>
    %c0_17 = arith.constant 0 : index
    %c0_18 = arith.constant 0 : index
    %36 = vector.load %arg10[%c0_17, %c0_18] : memref<1x128xf32, #tpu.memory_space<vmem>>, vector<1x128xf32>
    %37 = vector.broadcast %36 : vector<1x128xf32> to vector<128x128xf32>
    %38 = arith.addf %35, %37 : vector<128x128xf32>
    %39 = arith.negf %38 : vector<128x128xf32>
    %40 = math.exp %39 : vector<128x128xf32>
    %cst_19 = arith.constant 1.000000e+00 : f32
    %41 = vector.broadcast %cst_19 : f32 to vector<128x128xf32>
    %42 = arith.addf %41, %40 : vector<128x128xf32>
    %43 = arith.divf %41, %42 : vector<128x128xf32>
    %44 = arith.mulf %38, %43 : vector<128x128xf32>
    %c0_20 = arith.constant 0 : index
    %c0_21 = arith.constant 0 : index
    %45 = vector.load %arg4[%c0_20, %c0_21] : memref<128x1xf32, #tpu.memory_space<vmem>>, vector<128x1xf32>
    %46 = vector.broadcast %45 : vector<128x1xf32> to vector<128x128xf32>
    %47 = arith.mulf %44, %46 : vector<128x128xf32>
    %48 = tpu.iota {dimensions = array<i32: 0>} : vector<16x128xi32>
    %c0_22 = arith.constant 0 : index
    %c0_23 = arith.constant 0 : index
    %49 = vector.load %arg5[%c0_22, %c0_23] : memref<1x128xi32, #tpu.memory_space<vmem>>, vector<1x128xi32>
    %50 = vector.broadcast %49 : vector<1x128xi32> to vector<16x128xi32>
    %51 = arith.cmpi eq, %48, %50 : vector<16x128xi32>
    %52 = arith.extui %51 : vector<16x128xi1> to vector<16x128xi32>
    %53 = arith.sitofp %52 : vector<16x128xi32> to vector<16x128xf32>
    %54 = arith.truncf %53 : vector<16x128xf32> to vector<16x128xbf16>
    %c0_24 = arith.constant 0 : index
    %c0_25 = arith.constant 0 : index
    %55 = vector.load %arg18[%c0_24, %c0_25] : memref<16x128xf32, #tpu.memory_space<vmem>>, vector<16x128xf32>
    %56 = arith.truncf %47 : vector<128x128xf32> to vector<128x128xbf16>
    %cst_26 = arith.constant dense<0.000000e+00> : vector<16x128xf32>
    %57 = tpu.matmul %54, %56, %cst_26 {dimension_numbers = #tpu.dot_dimension_numbers<[1], [0], [0], [1], [0, 0, 1, 1], [], []>} : vector<16x128xbf16>, vector<128x128xbf16>, vector<16x128xf32> -> vector<16x128xf32>
    %58 = arith.addf %55, %57 : vector<16x128xf32>
    %c0_27 = arith.constant 0 : index
    %c0_28 = arith.constant 0 : index
    %59 = vector.load %arg18[%c0_27, %c0_28] : memref<16x128xf32, #tpu.memory_space<vmem>>, vector<16x128xf32>
    tpu.vector_store %arg18[%c0_27, %c0_28], %58 {strides = array<i32>} : memref<16x128xf32, #tpu.memory_space<vmem>>, vector<16x128xf32>,
    %c1_i32 = arith.constant 1 : i32
    %60 = arith.cmpi eq, %arg0, %c1_i32 : i32
    %61 = arith.extui %60 : i1 to i32
    %c0_i32_29 = arith.constant 0 : i32
    %62 = arith.cmpi ne, %61, %c0_i32_29 : i32
    scf.if %62 {
      %c0_30 = arith.constant 0 : index
      %c0_31 = arith.constant 0 : index
      %63 = vector.load %arg18[%c0_30, %c0_31] : memref<16x128xf32, #tpu.memory_space<vmem>>, vector<16x128xf32>
      %64 = arith.truncf %63 : vector<16x128xf32> to vector<16x128xbf16>
      %c0_32 = arith.constant 0 : index
      %c0_33 = arith.constant 0 : index
      %65 = vector.load %arg11[%c0_32, %c0_33] : memref<16x128xbf16, #tpu.memory_space<vmem>>, vector<16x128xbf16>
      %c0_34 = arith.constant 0 : index
      %c0_35 = arith.constant 0 : index
      %66 = vector.load %arg12[%c0_34, %c0_35] : memref<128x128xbf16, #tpu.memory_space<vmem>>, vector<128x128xbf16>
      %cst_36 = arith.constant dense<0.000000e+00> : vector<16x128xf32>
      %67 = tpu.matmul %65, %66, %cst_36 {dimension_numbers = #tpu.dot_dimension_numbers<[1], [0], [0], [1], [0, 0, 1, 1], [], []>} : vector<16x128xbf16>, vector<128x128xbf16>, vector<16x128xf32> -> vector<16x128xf32>
      %c0_37 = arith.constant 0 : index
      %c0_38 = arith.constant 0 : index
      %68 = vector.load %arg13[%c0_37, %c0_38] : memref<128x128xbf16, #tpu.memory_space<vmem>>, vector<128x128xbf16>
      %cst_39 = arith.constant dense<0.000000e+00> : vector<16x128xf32>
      %69 = tpu.matmul %64, %68, %cst_39 {dimension_numbers = #tpu.dot_dimension_numbers<[1], [0], [0], [1], [0, 0, 1, 1], [], []>} : vector<16x128xbf16>, vector<128x128xbf16>, vector<16x128xf32> -> vector<16x128xf32>
      %70 = arith.addf %67, %69 : vector<16x128xf32>
      %c0_40 = arith.constant 0 : index
      %c0_41 = arith.constant 0 : index
      %71 = vector.load %arg14[%c0_40, %c0_41] : memref<1x128xf32, #tpu.memory_space<vmem>>, vector<1x128xf32>
      %72 = vector.broadcast %71 : vector<1x128xf32> to vector<16x128xf32>
      %73 = arith.addf %70, %72 : vector<16x128xf32>
      %74 = arith.negf %73 : vector<16x128xf32>
      %75 = math.exp %74 : vector<16x128xf32>
      %cst_42 = arith.constant 1.000000e+00 : f32
      %76 = vector.broadcast %cst_42 : f32 to vector<16x128xf32>
      %77 = arith.addf %76, %75 : vector<16x128xf32>
      %78 = arith.divf %76, %77 : vector<16x128xf32>
      %79 = arith.mulf %73, %78 : vector<16x128xf32>
      %80 = arith.truncf %79 : vector<16x128xf32> to vector<16x128xbf16>
      %c0_43 = arith.constant 0 : index
      %c0_44 = arith.constant 0 : index
      %81 = vector.load %arg15[%c0_43, %c0_44] : memref<128x128xbf16, #tpu.memory_space<vmem>>, vector<128x128xbf16>
      %cst_45 = arith.constant dense<0.000000e+00> : vector<16x128xf32>
      %82 = tpu.matmul %80, %81, %cst_45 {dimension_numbers = #tpu.dot_dimension_numbers<[1], [0], [0], [1], [0, 0, 1, 1], [], []>} : vector<16x128xbf16>, vector<128x128xbf16>, vector<16x128xf32> -> vector<16x128xf32>
      %c0_46 = arith.constant 0 : index
      %c0_47 = arith.constant 0 : index
      %83 = vector.load %arg16[%c0_46, %c0_47] : memref<1x128xf32, #tpu.memory_space<vmem>>, vector<1x128xf32>
      %84 = vector.broadcast %83 : vector<1x128xf32> to vector<16x128xf32>
      %85 = arith.addf %82, %84 : vector<16x128xf32>
      %c0_48 = arith.constant 0 : index
      %c0_49 = arith.constant 0 : index
      %86 = vector.load %arg17[%c0_48, %c0_49] : memref<16x128xf32, #tpu.memory_space<vmem>>, vector<16x128xf32>
      tpu.vector_store %arg17[%c0_48, %c0_49], %85 {strides = array<i32>} : memref<16x128xf32, #tpu.memory_space<vmem>>, vector<16x128xf32>,
    } else {
    }
    return
  }
  func.func @transform_0(%arg0: i32) -> (i32, i32) {
    %c0_i32 = arith.constant 0 : i32
    %c0_i32_0 = arith.constant 0 : i32
    return %arg0, %c0_i32 : i32, i32
  }
  func.func @transform_1(%arg0: i32) -> (i32, i32) {
    %c0_i32 = arith.constant 0 : i32
    %c0_i32_0 = arith.constant 0 : i32
    return %arg0, %c0_i32 : i32, i32
  }
  func.func @transform_2(%arg0: i32) -> (i32, i32) {
    %c0_i32 = arith.constant 0 : i32
    %c0_i32_0 = arith.constant 0 : i32
    return %arg0, %c0_i32 : i32, i32
  }
  func.func @transform_3(%arg0: i32) -> (i32, i32) {
    %c0_i32 = arith.constant 0 : i32
    %c0_i32_0 = arith.constant 0 : i32
    return %arg0, %c0_i32 : i32, i32
  }
  func.func @transform_4(%arg0: i32) -> (i32, i32) {
    %c0_i32 = arith.constant 0 : i32
    %c0_i32_0 = arith.constant 0 : i32
    return %c0_i32, %arg0 : i32, i32
  }
  func.func @transform_5(%arg0: i32) -> (i32, i32) {
    %c0_i32 = arith.constant 0 : i32
    %c0_i32_0 = arith.constant 0 : i32
    %c0_i32_1 = arith.constant 0 : i32
    return %c0_i32, %c0_i32_0 : i32, i32
  }
  func.func @transform_6(%arg0: i32) -> (i32, i32) {
    %c0_i32 = arith.constant 0 : i32
    %c0_i32_0 = arith.constant 0 : i32
    %c0_i32_1 = arith.constant 0 : i32
    return %c0_i32, %c0_i32_0 : i32, i32
  }
  func.func @transform_7(%arg0: i32) -> (i32, i32) {
    %c0_i32 = arith.constant 0 : i32
    %c0_i32_0 = arith.constant 0 : i32
    %c0_i32_1 = arith.constant 0 : i32
    return %c0_i32, %c0_i32_0 : i32, i32
  }
  func.func @transform_8(%arg0: i32) -> (i32, i32) {
    %c0_i32 = arith.constant 0 : i32
    %c0_i32_0 = arith.constant 0 : i32
    %c0_i32_1 = arith.constant 0 : i32
    return %c0_i32, %c0_i32_0 : i32, i32
  }
  func.func @transform_9(%arg0: i32) -> (i32, i32) {
    %c0_i32 = arith.constant 0 : i32
    %c0_i32_0 = arith.constant 0 : i32
    %c0_i32_1 = arith.constant 0 : i32
    return %c0_i32, %c0_i32_0 : i32, i32
  }
  func.func @transform_10(%arg0: i32) -> (i32, i32) {
    %c0_i32 = arith.constant 0 : i32
    %c0_i32_0 = arith.constant 0 : i32
    %c0_i32_1 = arith.constant 0 : i32
    return %c0_i32, %c0_i32_0 : i32, i32
  }
  func.func @transform_11(%arg0: i32) -> (i32, i32) {
    %c0_i32 = arith.constant 0 : i32
    %c0_i32_0 = arith.constant 0 : i32
    %c0_i32_1 = arith.constant 0 : i32
    return %c0_i32, %c0_i32_0 : i32, i32
  }
  func.func @transform_12(%arg0: i32) -> (i32, i32) {
    %c0_i32 = arith.constant 0 : i32
    %c0_i32_0 = arith.constant 0 : i32
    %c0_i32_1 = arith.constant 0 : i32
    return %c0_i32, %c0_i32_0 : i32, i32
  }
  func.func @transform_13(%arg0: i32) -> (i32, i32) {
    %c0_i32 = arith.constant 0 : i32
    %c0_i32_0 = arith.constant 0 : i32
    %c0_i32_1 = arith.constant 0 : i32
    return %c0_i32, %c0_i32_0 : i32, i32
  }
  func.func @transform_14(%arg0: i32) -> (i32, i32) {
    %c0_i32 = arith.constant 0 : i32
    %c0_i32_0 = arith.constant 0 : i32
    %c0_i32_1 = arith.constant 0 : i32
    return %c0_i32, %c0_i32_0 : i32, i32
  }
  func.func @transform_15(%arg0: i32) -> (i32, i32) {
    %c0_i32 = arith.constant 0 : i32
    %c0_i32_0 = arith.constant 0 : i32
    %c0_i32_1 = arith.constant 0 : i32
    return %c0_i32, %c0_i32_0 : i32, i32
  }
  func.func @transform_16(%arg0: i32) -> (i32, i32) {
    %c0_i32 = arith.constant 0 : i32
    %c0_i32_0 = arith.constant 0 : i32
    %c0_i32_1 = arith.constant 0 : i32
    return %c0_i32, %c0_i32_0 : i32, i32
  }
}

module attributes {stable_mosaic.version = 11 : i64} {
  func.func @egcl_kernel(%arg0: i32, %arg1: memref<128x1xi32, #tpu.memory_space<vmem>>, %arg2: memref<128x1xi32, #tpu.memory_space<vmem>>, %arg3: memref<128x1xf32, #tpu.memory_space<vmem>>, %arg4: memref<128x1xf32, #tpu.memory_space<vmem>>, %arg5: memref<1x128xi32, #tpu.memory_space<vmem>>, %arg6: memref<16x128xbf16, #tpu.memory_space<vmem>>, %arg7: memref<16x128xbf16, #tpu.memory_space<vmem>>, %arg8: memref<1x128xf32, #tpu.memory_space<vmem>>, %arg9: memref<128x128xbf16, #tpu.memory_space<vmem>>, %arg10: memref<1x128xf32, #tpu.memory_space<vmem>>, %arg11: memref<16x128xbf16, #tpu.memory_space<vmem>>, %arg12: memref<128x128xbf16, #tpu.memory_space<vmem>>, %arg13: memref<128x128xbf16, #tpu.memory_space<vmem>>, %arg14: memref<1x128xf32, #tpu.memory_space<vmem>>, %arg15: memref<128x128xbf16, #tpu.memory_space<vmem>>, %arg16: memref<1x128xf32, #tpu.memory_space<vmem>>, %arg17: memref<16x128xf32, #tpu.memory_space<vmem>>, %arg18: memref<16x128xf32, #tpu.memory_space<vmem>>) attributes {dimension_semantics = [#tpu.dimension_semantics<arbitrary>], iteration_bounds = array<i64: 2>, scalar_prefetch = 0 : i64, scratch_operands = 1 : i64, tpu.core_type = #tpu.core_type<tc>, window_params = [{transform_indices = @transform_0, window_bounds = array<i64: 128, 1>}, {transform_indices = @transform_1, window_bounds = array<i64: 128, 1>}, {transform_indices = @transform_2, window_bounds = array<i64: 128, 1>}, {transform_indices = @transform_3, window_bounds = array<i64: 128, 1>}, {transform_indices = @transform_4, window_bounds = array<i64: 1, 128>}, {pipeline_mode = #tpu.pipeline_mode<synchronous>, transform_indices = @transform_5, window_bounds = array<i64: 16, 128>}, {pipeline_mode = #tpu.pipeline_mode<synchronous>, transform_indices = @transform_6, window_bounds = array<i64: 16, 128>}, {pipeline_mode = #tpu.pipeline_mode<synchronous>, transform_indices = @transform_7, window_bounds = array<i64: 1, 128>}, {pipeline_mode = #tpu.pipeline_mode<synchronous>, transform_indices = @transform_8, window_bounds = array<i64: 128, 128>}, {pipeline_mode = #tpu.pipeline_mode<synchronous>, transform_indices = @transform_9, window_bounds = array<i64: 1, 128>}, {pipeline_mode = #tpu.pipeline_mode<synchronous>, transform_indices = @transform_10, window_bounds = array<i64: 16, 128>}, {pipeline_mode = #tpu.pipeline_mode<synchronous>, transform_indices = @transform_11, window_bounds = array<i64: 128, 128>}, {pipeline_mode = #tpu.pipeline_mode<synchronous>, transform_indices = @transform_12, window_bounds = array<i64: 128, 128>}, {pipeline_mode = #tpu.pipeline_mode<synchronous>, transform_indices = @transform_13, window_bounds = array<i64: 1, 128>}, {pipeline_mode = #tpu.pipeline_mode<synchronous>, transform_indices = @transform_14, window_bounds = array<i64: 128, 128>}, {pipeline_mode = #tpu.pipeline_mode<synchronous>, transform_indices = @transform_15, window_bounds = array<i64: 1, 128>}, {pipeline_mode = #tpu.pipeline_mode<synchronous>, transform_indices = @transform_16, window_bounds = array<i64: 16, 128>}]} {
    %c0_i32 = arith.constant 0 : i32
    %0 = arith.cmpi eq, %arg0, %c0_i32 : i32
    %1 = arith.extui %0 : i1 to i32
    %c0_i32_0 = arith.constant 0 : i32
    %2 = arith.cmpi ne, %1, %c0_i32_0 : i32
    scf.if %2 {
      %cst_30 = arith.constant 0.000000e+00 : f32
      %63 = vector.broadcast %cst_30 : f32 to vector<16x128xf32>
      %c0_31 = arith.constant 0 : index
      %c0_32 = arith.constant 0 : index
      %64 = vector.load %arg18[%c0_31, %c0_32] : memref<16x128xf32, #tpu.memory_space<vmem>>, vector<16x128xf32>
      tpu.vector_store %arg18[%c0_31, %c0_32], %63 {strides = array<i32>} : memref<16x128xf32, #tpu.memory_space<vmem>>, vector<16x128xf32>,
    } else {
    }
    %3 = tpu.iota {dimensions = array<i32: 1>} : vector<128x16xi32>
    %c0 = arith.constant 0 : index
    %c0_1 = arith.constant 0 : index
    %4 = vector.load %arg1[%c0, %c0_1] : memref<128x1xi32, #tpu.memory_space<vmem>>, vector<128x1xi32>
    %5 = vector.broadcast %4 : vector<128x1xi32> to vector<128x16xi32>
    %6 = arith.cmpi eq, %3, %5 : vector<128x16xi32>
    %7 = arith.extui %6 : vector<128x16xi1> to vector<128x16xi32>
    %8 = arith.sitofp %7 : vector<128x16xi32> to vector<128x16xf32>
    %9 = arith.truncf %8 : vector<128x16xf32> to vector<128x16xbf16>
    %c0_2 = arith.constant 0 : index
    %c0_3 = arith.constant 0 : index
    %10 = vector.load %arg2[%c0_2, %c0_3] : memref<128x1xi32, #tpu.memory_space<vmem>>, vector<128x1xi32>
    %11 = vector.broadcast %10 : vector<128x1xi32> to vector<128x16xi32>
    %12 = arith.cmpi eq, %3, %11 : vector<128x16xi32>
    %13 = arith.extui %12 : vector<128x16xi1> to vector<128x16xi32>
    %14 = arith.sitofp %13 : vector<128x16xi32> to vector<128x16xf32>
    %15 = arith.truncf %14 : vector<128x16xf32> to vector<128x16xbf16>
    %c0_4 = arith.constant 0 : index
    %c0_5 = arith.constant 0 : index
    %16 = vector.load %arg6[%c0_4, %c0_5] : memref<16x128xbf16, #tpu.memory_space<vmem>>, vector<16x128xbf16>
    %cst = arith.constant dense<0.000000e+00> : vector<128x128xf32>
    %17 = tpu.matmul %9, %16, %cst {dimension_numbers = #tpu.dot_dimension_numbers<[1], [0], [0], [1], [0, 0, 1, 1], [], []>} : vector<128x16xbf16>, vector<16x128xbf16>, vector<128x128xf32> -> vector<128x128xf32>
    %c0_6 = arith.constant 0 : index
    %c0_7 = arith.constant 0 : index
    %18 = vector.load %arg7[%c0_6, %c0_7] : memref<16x128xbf16, #tpu.memory_space<vmem>>, vector<16x128xbf16>
    %cst_8 = arith.constant dense<0.000000e+00> : vector<128x128xf32>
    %19 = tpu.matmul %15, %18, %cst_8 {dimension_numbers = #tpu.dot_dimension_numbers<[1], [0], [0], [1], [0, 0, 1, 1], [], []>} : vector<128x16xbf16>, vector<16x128xbf16>, vector<128x128xf32> -> vector<128x128xf32>
    %20 = arith.addf %17, %19 : vector<128x128xf32>
    %c0_9 = arith.constant 0 : index
    %c0_10 = arith.constant 0 : index
    %21 = vector.load %arg3[%c0_9, %c0_10] : memref<128x1xf32, #tpu.memory_space<vmem>>, vector<128x1xf32>
    %c0_11 = arith.constant 0 : index
    %c0_12 = arith.constant 0 : index
    %22 = vector.load %arg8[%c0_11, %c0_12] : memref<1x128xf32, #tpu.memory_space<vmem>>, vector<1x128xf32>
    %23 = vector.broadcast %21 : vector<128x1xf32> to vector<128x128xf32>
    %24 = vector.broadcast %22 : vector<1x128xf32> to vector<128x128xf32>
    %25 = arith.mulf %23, %24 : vector<128x128xf32>
    %26 = arith.addf %20, %25 : vector<128x128xf32>
    %27 = arith.negf %26 : vector<128x128xf32>
    %28 = math.exp %27 : vector<128x128xf32>
    %cst_13 = arith.constant 1.000000e+00 : f32
    %29 = vector.broadcast %cst_13 : f32 to vector<128x128xf32>
    %30 = arith.addf %29, %28 : vector<128x128xf32>
    %31 = arith.divf %29, %30 : vector<128x128xf32>
    %32 = arith.mulf %26, %31 : vector<128x128xf32>
    %33 = arith.truncf %32 : vector<128x128xf32> to vector<128x128xbf16>
    %c0_14 = arith.constant 0 : index
    %c0_15 = arith.constant 0 : index
    %34 = vector.load %arg9[%c0_14, %c0_15] : memref<128x128xbf16, #tpu.memory_space<vmem>>, vector<128x128xbf16>
    %cst_16 = arith.constant dense<0.000000e+00> : vector<128x128xf32>
    %35 = tpu.matmul %33, %34, %cst_16 {dimension_numbers = #tpu.dot_dimension_numbers<[1], [0], [0], [1], [0, 0, 1, 1], [], []>} : vector<128x128xbf16>, vector<128x128xbf16>, vector<128x128xf32> -> vector<128x128xf32>
    %c0_17 = arith.constant 0 : index
    %c0_18 = arith.constant 0 : index
    %36 = vector.load %arg10[%c0_17, %c0_18] : memref<1x128xf32, #tpu.memory_space<vmem>>, vector<1x128xf32>
    %37 = vector.broadcast %36 : vector<1x128xf32> to vector<128x128xf32>
    %38 = arith.addf %35, %37 : vector<128x128xf32>
    %39 = arith.negf %38 : vector<128x128xf32>
    %40 = math.exp %39 : vector<128x128xf32>
    %cst_19 = arith.constant 1.000000e+00 : f32
    %41 = vector.broadcast %cst_19 : f32 to vector<128x128xf32>
    %42 = arith.addf %41, %40 : vector<128x128xf32>
    %43 = arith.divf %41, %42 : vector<128x128xf32>
    %44 = arith.mulf %38, %43 : vector<128x128xf32>
    %c0_20 = arith.constant 0 : index
    %c0_21 = arith.constant 0 : index
    %45 = vector.load %arg4[%c0_20, %c0_21] : memref<128x1xf32, #tpu.memory_space<vmem>>, vector<128x1xf32>
    %46 = vector.broadcast %45 : vector<128x1xf32> to vector<128x128xf32>
    %47 = arith.mulf %44, %46 : vector<128x128xf32>
    %48 = tpu.iota {dimensions = array<i32: 0>} : vector<16x128xi32>
    %c0_22 = arith.constant 0 : index
    %c0_23 = arith.constant 0 : index
    %49 = vector.load %arg5[%c0_22, %c0_23] : memref<1x128xi32, #tpu.memory_space<vmem>>, vector<1x128xi32>
    %50 = vector.broadcast %49 : vector<1x128xi32> to vector<16x128xi32>
    %51 = arith.cmpi eq, %48, %50 : vector<16x128xi32>
    %52 = arith.extui %51 : vector<16x128xi1> to vector<16x128xi32>
    %53 = arith.sitofp %52 : vector<16x128xi32> to vector<16x128xf32>
    %54 = arith.truncf %53 : vector<16x128xf32> to vector<16x128xbf16>
    %c0_24 = arith.constant 0 : index
    %c0_25 = arith.constant 0 : index
    %55 = vector.load %arg18[%c0_24, %c0_25] : memref<16x128xf32, #tpu.memory_space<vmem>>, vector<16x128xf32>
    %56 = arith.truncf %47 : vector<128x128xf32> to vector<128x128xbf16>
    %cst_26 = arith.constant dense<0.000000e+00> : vector<16x128xf32>
    %57 = tpu.matmul %54, %56, %cst_26 {dimension_numbers = #tpu.dot_dimension_numbers<[1], [0], [0], [1], [0, 0, 1, 1], [], []>} : vector<16x128xbf16>, vector<128x128xbf16>, vector<16x128xf32> -> vector<16x128xf32>
    %58 = arith.addf %55, %57 : vector<16x128xf32>
    %c0_27 = arith.constant 0 : index
    %c0_28 = arith.constant 0 : index
    %59 = vector.load %arg18[%c0_27, %c0_28] : memref<16x128xf32, #tpu.memory_space<vmem>>, vector<16x128xf32>
    tpu.vector_store %arg18[%c0_27, %c0_28], %58 {strides = array<i32>} : memref<16x128xf32, #tpu.memory_space<vmem>>, vector<16x128xf32>,
    %c1_i32 = arith.constant 1 : i32
    %60 = arith.cmpi eq, %arg0, %c1_i32 : i32
    %61 = arith.extui %60 : i1 to i32
    %c0_i32_29 = arith.constant 0 : i32
    %62 = arith.cmpi ne, %61, %c0_i32_29 : i32
    scf.if %62 {
      %c0_30 = arith.constant 0 : index
      %c0_31 = arith.constant 0 : index
      %63 = vector.load %arg18[%c0_30, %c0_31] : memref<16x128xf32, #tpu.memory_space<vmem>>, vector<16x128xf32>
      %64 = arith.truncf %63 : vector<16x128xf32> to vector<16x128xbf16>
      %c0_32 = arith.constant 0 : index
      %c0_33 = arith.constant 0 : index
      %65 = vector.load %arg11[%c0_32, %c0_33] : memref<16x128xbf16, #tpu.memory_space<vmem>>, vector<16x128xbf16>
      %c0_34 = arith.constant 0 : index
      %c0_35 = arith.constant 0 : index
      %66 = vector.load %arg12[%c0_34, %c0_35] : memref<128x128xbf16, #tpu.memory_space<vmem>>, vector<128x128xbf16>
      %cst_36 = arith.constant dense<0.000000e+00> : vector<16x128xf32>
      %67 = tpu.matmul %65, %66, %cst_36 {dimension_numbers = #tpu.dot_dimension_numbers<[1], [0], [0], [1], [0, 0, 1, 1], [], []>} : vector<16x128xbf16>, vector<128x128xbf16>, vector<16x128xf32> -> vector<16x128xf32>
      %c0_37 = arith.constant 0 : index
      %c0_38 = arith.constant 0 : index
      %68 = vector.load %arg13[%c0_37, %c0_38] : memref<128x128xbf16, #tpu.memory_space<vmem>>, vector<128x128xbf16>
      %cst_39 = arith.constant dense<0.000000e+00> : vector<16x128xf32>
      %69 = tpu.matmul %64, %68, %cst_39 {dimension_numbers = #tpu.dot_dimension_numbers<[1], [0], [0], [1], [0, 0, 1, 1], [], []>} : vector<16x128xbf16>, vector<128x128xbf16>, vector<16x128xf32> -> vector<16x128xf32>
      %70 = arith.addf %67, %69 : vector<16x128xf32>
      %c0_40 = arith.constant 0 : index
      %c0_41 = arith.constant 0 : index
      %71 = vector.load %arg14[%c0_40, %c0_41] : memref<1x128xf32, #tpu.memory_space<vmem>>, vector<1x128xf32>
      %72 = vector.broadcast %71 : vector<1x128xf32> to vector<16x128xf32>
      %73 = arith.addf %70, %72 : vector<16x128xf32>
      %74 = arith.negf %73 : vector<16x128xf32>
      %75 = math.exp %74 : vector<16x128xf32>
      %cst_42 = arith.constant 1.000000e+00 : f32
      %76 = vector.broadcast %cst_42 : f32 to vector<16x128xf32>
      %77 = arith.addf %76, %75 : vector<16x128xf32>
      %78 = arith.divf %76, %77 : vector<16x128xf32>
      %79 = arith.mulf %73, %78 : vector<16x128xf32>
      %80 = arith.truncf %79 : vector<16x128xf32> to vector<16x128xbf16>
      %c0_43 = arith.constant 0 : index
      %c0_44 = arith.constant 0 : index
      %81 = vector.load %arg15[%c0_43, %c0_44] : memref<128x128xbf16, #tpu.memory_space<vmem>>, vector<128x128xbf16>
      %cst_45 = arith.constant dense<0.000000e+00> : vector<16x128xf32>
      %82 = tpu.matmul %80, %81, %cst_45 {dimension_numbers = #tpu.dot_dimension_numbers<[1], [0], [0], [1], [0, 0, 1, 1], [], []>} : vector<16x128xbf16>, vector<128x128xbf16>, vector<16x128xf32> -> vector<16x128xf32>
      %c0_46 = arith.constant 0 : index
      %c0_47 = arith.constant 0 : index
      %83 = vector.load %arg16[%c0_46, %c0_47] : memref<1x128xf32, #tpu.memory_space<vmem>>, vector<1x128xf32>
      %84 = vector.broadcast %83 : vector<1x128xf32> to vector<16x128xf32>
      %85 = arith.addf %82, %84 : vector<16x128xf32>
      %c0_48 = arith.constant 0 : index
      %c0_49 = arith.constant 0 : index
      %86 = vector.load %arg17[%c0_48, %c0_49] : memref<16x128xf32, #tpu.memory_space<vmem>>, vector<16x128xf32>
      tpu.vector_store %arg17[%c0_48, %c0_49], %85 {strides = array<i32>} : memref<16x128xf32, #tpu.memory_space<vmem>>, vector<16x128xf32>,
    } else {
    }
    return
  }
  func.func @transform_0(%arg0: i32) -> (i32, i32) {
    %c0_i32 = arith.constant 0 : i32
    %c0_i32_0 = arith.constant 0 : i32
    return %arg0, %c0_i32 : i32, i32
  }
  func.func @transform_1(%arg0: i32) -> (i32, i32) {
    %c0_i32 = arith.constant 0 : i32
    %c0_i32_0 = arith.constant 0 : i32
    return %arg0, %c0_i32 : i32, i32
  }
  func.func @transform_2(%arg0: i32) -> (i32, i32) {
    %c0_i32 = arith.constant 0 : i32
    %c0_i32_0 = arith.constant 0 : i32
    return %arg0, %c0_i32 : i32, i32
  }
  func.func @transform_3(%arg0: i32) -> (i32, i32) {
    %c0_i32 = arith.constant 0 : i32
    %c0_i32_0 = arith.constant 0 : i32
    return %arg0, %c0_i32 : i32, i32
  }
  func.func @transform_4(%arg0: i32) -> (i32, i32) {
    %c0_i32 = arith.constant 0 : i32
    %c0_i32_0 = arith.constant 0 : i32
    return %c0_i32, %arg0 : i32, i32
  }
  func.func @transform_5(%arg0: i32) -> (i32, i32) {
    %c0_i32 = arith.constant 0 : i32
    %c0_i32_0 = arith.constant 0 : i32
    %c0_i32_1 = arith.constant 0 : i32
    return %c0_i32, %c0_i32_0 : i32, i32
  }
  func.func @transform_6(%arg0: i32) -> (i32, i32) {
    %c0_i32 = arith.constant 0 : i32
    %c0_i32_0 = arith.constant 0 : i32
    %c0_i32_1 = arith.constant 0 : i32
    return %c0_i32, %c0_i32_0 : i32, i32
  }
  func.func @transform_7(%arg0: i32) -> (i32, i32) {
    %c0_i32 = arith.constant 0 : i32
    %c0_i32_0 = arith.constant 0 : i32
    %c0_i32_1 = arith.constant 0 : i32
    return %c0_i32, %c0_i32_0 : i32, i32
  }
  func.func @transform_8(%arg0: i32) -> (i32, i32) {
    %c0_i32 = arith.constant 0 : i32
    %c0_i32_0 = arith.constant 0 : i32
    %c0_i32_1 = arith.constant 0 : i32
    return %c0_i32, %c0_i32_0 : i32, i32
  }
  func.func @transform_9(%arg0: i32) -> (i32, i32) {
    %c0_i32 = arith.constant 0 : i32
    %c0_i32_0 = arith.constant 0 : i32
    %c0_i32_1 = arith.constant 0 : i32
    return %c0_i32, %c0_i32_0 : i32, i32
  }
  func.func @transform_10(%arg0: i32) -> (i32, i32) {
    %c0_i32 = arith.constant 0 : i32
    %c0_i32_0 = arith.constant 0 : i32
    %c0_i32_1 = arith.constant 0 : i32
    return %c0_i32, %c0_i32_0 : i32, i32
  }
  func.func @transform_11(%arg0: i32) -> (i32, i32) {
    %c0_i32 = arith.constant 0 : i32
    %c0_i32_0 = arith.constant 0 : i32
    %c0_i32_1 = arith.constant 0 : i32
    return %c0_i32, %c0_i32_0 : i32, i32
  }
  func.func @transform_12(%arg0: i32) -> (i32, i32) {
    %c0_i32 = arith.constant 0 : i32
    %c0_i32_0 = arith.constant 0 : i32
    %c0_i32_1 = arith.constant 0 : i32
    return %c0_i32, %c0_i32_0 : i32, i32
  }
  func.func @transform_13(%arg0: i32) -> (i32, i32) {
    %c0_i32 = arith.constant 0 : i32
    %c0_i32_0 = arith.constant 0 : i32
    %c0_i32_1 = arith.constant 0 : i32
    return %c0_i32, %c0_i32_0 : i32, i32
  }
  func.func @transform_14(%arg0: i32) -> (i32, i32) {
    %c0_i32 = arith.constant 0 : i32
    %c0_i32_0 = arith.constant 0 : i32
    %c0_i32_1 = arith.constant 0 : i32
    return %c0_i32, %c0_i32_0 : i32, i32
  }
  func.func @transform_15(%arg0: i32) -> (i32, i32) {
    %c0_i32 = arith.constant 0 : i32
    %c0_i32_0 = arith.constant 0 : i32
    %c0_i32_1 = arith.constant 0 : i32
    return %c0_i32, %c0_i32_0 : i32, i32
  }
  func.func @transform_16(%arg0: i32) -> (i32, i32) {
    %c0_i32 = arith.constant 0 : i32
    %c0_i32_0 = arith.constant 0 : i32
    %c0_i32_1 = arith.constant 0 : i32
    return %c0_i32, %c0_i32_0 : i32, i32
  }
}

</mosaic_0001>

<bundles_post_ra>
// kernel: tpu_custom_call.1
= control target key start
LH: loop header
LB: loop body
LE: loop exit
PB: predicated region body
PF: predicated region fallthrough
CT: control target
= control target key end

     0   :  { %s3464_s0 = inlined_call_operand.vmem [shape: s32[256,1], index: 0, kind: input, shape index: {}]   ;;  %s3465_s1 = inlined_call_operand.vmem [shape: s32[256,1], index: 1, kind: input, shape index: {}]   ;;  %s3466_s2 = inlined_call_operand.vmem [shape: f32[256,1], index: 2, kind: input, shape index: {}]   ;;  %s3467_s3 = inlined_call_operand.vmem [shape: f32[256,1], index: 3, kind: input, shape index: {}]   ;;  %s3468_s4 = inlined_call_operand.vmem [shape: s32[1,256], index: 4, kind: input, shape index: {}]   ;;  %s3469_s5 = inlined_call_operand.vmem [shape: bf16[16,128], index: 5, kind: input, shape index: {}]   ;;  %s3470_s6 = inlined_call_operand.vmem [shape: bf16[16,128], index: 6, kind: input, shape index: {}]   ;;  %s3471_s7 = inlined_call_operand.vmem [shape: f32[1,128], index: 7, kind: input, shape index: {}]   ;;  %s3472_s8 = inlined_call_operand.vmem [shape: bf16[128,128], index: 8, kind: input, shape index: {}]   ;;  %s3473_s9 = inlined_call_operand.vmem [shape: f32[1,128], index: 9, kind: input, shape index: {}]   ;;  %s3474_s10 = inlined_call_operand.vmem [shape: bf16[16,128], index: 10, kind: input, shape index: {}]   ;;  %s3475_s11 = inlined_call_operand.vmem [shape: bf16[128,128], index: 11, kind: input, shape index: {}]   ;;  %s3476_s12 = inlined_call_operand.vmem [shape: bf16[128,128], index: 12, kind: input, shape index: {}]   ;;  %s3477_s13 = inlined_call_operand.vmem [shape: f32[1,128], index: 13, kind: input, shape index: {}]   ;;  %s3478_s14 = inlined_call_operand.vmem [shape: bf16[128,128], index: 14, kind: input, shape index: {}]   ;;  %s3479_s15 = inlined_call_operand.vmem [shape: f32[1,128], index: 15, kind: input, shape index: {}]   ;;  %s3480_s16 = inlined_call_operand.hbm [shape: f32[16,128], index: 16, kind: output, shape index: {}]  }
   0x1   :  { %3483 = sst [smem:[#allocation7_spill]] %s3464_s0 }
   0x2   :  { %3484 = sst [smem:[#allocation8_spill]] %s3477_s13 }
   0x3   :  { %3485 = sst [smem:[#allocation9_spill]] %s3478_s14 }
   0x4   :  { %3486 = sst [smem:[#allocation10_spill]] %s3479_s15 }
   0x5   :  { %3487 = sst [smem:[#allocation11_spill]] %s3480_s16 }
   0x6   :  { %21 = vsyncpa [#allocation4], 0  ;;  %s2961_s21 = smov 0  }
   0x7 LB: > { %3488 = sst [smem:[#allocation6_spill]] %s2864_s21  ;;  %s2967_s22 = sadd.s32 4294967295, %s2864_s21   ;;  %s2864_s21 = sphi %s2961_s21, %s27_s21  }
   0x8   : > { %p2274_p0 = scmp.ge.s32.totalorder %s2864_s21, 1  ;;  %p500_p1 = scmp.lt.s32.totalorder %s2864_s21, 3 }
   0xa   : > { %p501_p2 = pnand %p2274_p0, %p500_p1 }
   0xb   : > { %s2275_s23 = sshll.u32 (!%p501_p2), %s2967_s22, 4  ;;  %p587_p3 = scmp.lt.s32.totalorder (!%p501_p2), %s2967_s22, 1 }
   0xc   : > { %504 = sbr.rel (%p501_p2) target bundleno = 1418 (0x58a), region = 84  ;;  %p564_p4 = scmp.lt.s32.totalorder (!%p501_p2), %s2275_s23, 31 }
   0xd   : > { %s3489_s0 = sld [smem:[#allocation7_spill]] (!%p501_p2)  ;;  %p2283_p5 = scmp.ne.s32.totalorder (!%p501_p2), %s2967_s22, 0 }
  0x11   : > { %s2974_s24 = scalar_select %p587_p3, %s2967_s22, 1 }
  0x12   : > { %s3496_s23 = smov (!%p564_p4, %s2275_s23), 31  ;;  %594 = sbr.rel (%p2283_p5) target bundleno = 25 (0x19), region = 88 }
  0x13   : > { %s589_s27 = scalar_lea.vmem %s3468_s4, %s2974_s24  ;;  %s2276_s28 = sshll.u32 %s3496_s23, 3 }
  0x14   : > { %s2983_s17 = scalar_lea.vmem %s3489_s0, %s2276_s28  ;;  %s2988_s20 = scalar_lea.vmem %s3465_s1, %s2276_s28 }
  0x15   : > { %s2993_s15 = scalar_lea.vmem %s3466_s2, %s2276_s28  ;;  %s2998_s25 = scalar_lea.vmem %s3467_s3, %s2276_s28 }
  0x17   : > { %v2866_v0 = vmov 0.0  }
  0x18   : > { %595 = vst [vmem:[#allocation2] sm:$0xff] %v2866_v0  ;;  %596 = vst [vmem:[#allocation2 + $0x8] sm:$0xff] %v2866_v0 }
  0x19 PF: > { %v719_v1 = vld [vmem:[%s2988_s20] sm:$0xff]  ;;  %v2867_v3 = vmov 0   ;;  %v720_v4 = vld [vmem:[%s2988_s20 + $0x8] sm:$0xff]  ;;  %v602_v6 = vld [vmem:[%s2983_s17 + $0x18] sm:$0xff]  ;;  %v2868_v20 = vmov 0.0   ;;  %vm849_vm4 = vcmask 130048  }
  0x1a   : > { %v599_v2 = vld [vmem:[%s2983_s17] sm:$0xff]  ;;  %2658 = vset.pattern.permute.xlu1 %v2867_v3  ;;  %2657 = vset.pattern.permute.xlu0 %v2867_v3  ;;  %v600_v5 = vld [vmem:[%s2983_s17 + $0x8] sm:$0xff]  ;;  %v601_v7 = vld [vmem:[%s2983_s17 + $0x10] sm:$0xff]  ;;  %v597_v3 = vlaneseq  ;;  %p2381_p6 = scmp.ne.s32.totalorder %s2967_s22, 1 }
  0x1b   : > { %736 = vperm.xlu1 %2658, %v719_v1   ;;  %616 = vperm.xlu0 %2657, %v599_v2   ;;  %v722_v8 = vld [vmem:[%s2988_s20 + $0x18] sm:$0xff]  ;;  %v721_v9 = vld [vmem:[%s2988_s20 + $0x10] sm:$0xff]  ;;  %v604_v10 = vld [vmem:[%s2983_s17 + $0x28] sm:$0xff]  ;;  %s3490_s24 = sld [smem:[#allocation9_spill]] (!%p2381_p6) }
  0x1c   : > { %v603_v11 = vld [vmem:[%s2983_s17 + $0x20] sm:$0xff]  ;;  %v724_v12 = vld [vmem:[%s2988_s20 + $0x28] sm:$0xff]  ;;  %v606_v14 = vld [vmem:[%s2983_s17 + $0x38] sm:$0xff]  ;;  %s3491_s30 = sld [smem:[#allocation8_spill]] (!%p2381_p6) }
  0x1d   : > { %v723_v13 = vld [vmem:[%s2988_s20 + $0x20] sm:$0xff]  ;;  %v605_v15 = vld [vmem:[%s2983_s17 + $0x30] sm:$0xff]  ;;  %v726_v18 = vld [vmem:[%s2988_s20 + $0x38] sm:$0xff] }
  0x1e   : > { %v2659_v16 = vld [vmem:[%s3469_s5] sm:$0xff]   ;;  %v725_v19 = vld [vmem:[%s2988_s20 + $0x30] sm:$0xff]  ;;  %v608_v21 = vld [vmem:[%s2983_s17 + $0x48] sm:$0xff] }
  0x1f   : > { %739 = vperm.xlu1 %2658, %v720_v4   ;;  %619 = vperm.xlu0 %2657, %v600_v5   ;;  %v2660_v17 = vld [vmem:[%s3470_s6] sm:$0xff]   ;;  %v728_v23 = vld [vmem:[%s2988_s20 + $0x48] sm:$0xff]  ;;  %v610_v25 = vld [vmem:[%s2983_s17 + $0x58] sm:$0xff] }
  0x20   : > { %2503 = vmatprep.subr.bf16.mxu1 %v2659_v16  ;;  %2485 = vmatprep.subr.bf16.mxu0 %v2660_v17  ;;  %v607_v22 = vld [vmem:[%s2983_s17 + $0x40] sm:$0xff]  ;;  %v609_v26 = vld [vmem:[%s2983_s17 + $0x50] sm:$0xff]  ;;  %v730_v27 = vld [vmem:[%s2988_s20 + $0x58] sm:$0xff] }
  0x21   : > { %2504 = vmatpush3.bf16.msra.mxu1 %v2659_v16  ;;  %2486 = vmatpush3.bf16.msra.mxu0 %v2660_v17  ;;  %v727_v24 = vld [vmem:[%s2988_s20 + $0x40] sm:$0xff]  ;;  %v729_v28 = vld [vmem:[%s2988_s20 + $0x50] sm:$0xff]  ;;  %v612_v29 = vld [vmem:[%s2983_s17 + $0x68] sm:$0xff] }
  0x22   : > { %2553 = vmatprep.subr.bf16.mxu1 %v2868_v20  ;;  %v611_v30 = vld [vmem:[%s2983_s17 + $0x60] sm:$0xff]  ;;  %v732_v31 = vld [vmem:[%s2988_s20 + $0x68] sm:$0xff]  ;;  %v614_v33 = vld [vmem:[%s2983_s17 + $0x78] sm:$0xff] }
  0x23   : > { %625 = vperm.xlu1 %2658, %v602_v6   ;;  %622 = vperm.xlu0 %2657, %v601_v7   ;;  %v731_v32 = vld [vmem:[%s2988_s20 + $0x60] sm:$0xff]  ;;  %v613_v34 = vld [vmem:[%s2983_s17 + $0x70] sm:$0xff]  ;;  %v734_v35 = vld [vmem:[%s2988_s20 + $0x78] sm:$0xff]  ;;  %v3073_v6 = vand.u32 127, %v597_v3  ;;  %s3492_s17 = sld [smem:[#allocation10_spill]] (!%p2381_p6) }
  0x24   : > { %v733_v36 = vld [vmem:[%s2988_s20 + $0x70] sm:$0xff]  ;;  %v1099_v37 = vld [vmem:[%s2993_s15 + $0x8] sm:$0xff]  ;;  %v1098_v38 = vld [vmem:[%s2993_s15] sm:$0xff] }
  0x25   : > { %v1101_v39 = vld [vmem:[%s2993_s15 + $0x18] sm:$0xff]  ;;  %v1100_v40 = vld [vmem:[%s2993_s15 + $0x10] sm:$0xff]  ;;  %v1103_v41 = vld [vmem:[%s2993_s15 + $0x28] sm:$0xff] }
  0x26   : > { %v1102_v42 = vld [vmem:[%s2993_s15 + $0x20] sm:$0xff]  ;;  %v1105_v43 = vld [vmem:[%s2993_s15 + $0x38] sm:$0xff]  ;;  %v1104_v44 = vld [vmem:[%s2993_s15 + $0x30] sm:$0xff] }
  0x27   : > { %745 = vperm.xlu1 %2658, %v722_v8   ;;  %742 = vperm.xlu0 %2657, %v721_v9   ;;  %v1107_v45 = vld [vmem:[%s2993_s15 + $0x48] sm:$0xff]  ;;  %v1106_v46 = vld [vmem:[%s2993_s15 + $0x40] sm:$0xff]  ;;  %v1109_v47 = vld [vmem:[%s2993_s15 + $0x58] sm:$0xff] }
  0x28   : > { %v1108_v48 = vld [vmem:[%s2993_s15 + $0x50] sm:$0xff]  ;;  %v1111_v49 = vld [vmem:[%s2993_s15 + $0x68] sm:$0xff]  ;;  %v1110_v50 = vld [vmem:[%s2993_s15 + $0x60] sm:$0xff] }
  0x29   : > { %v1113_v51 = vld [vmem:[%s2993_s15 + $0x78] sm:$0xff]  ;;  %v1112_v52 = vld [vmem:[%s2993_s15 + $0x70] sm:$0xff]  ;;  %v1646_v55 = vld [vmem:[%s2998_s25 + $0x68] sm:$0xff] }
  0x2a   : > { %v1648_v53 = vld [vmem:[%s2998_s25 + $0x78] sm:$0xff]  ;;  %v1647_v54 = vld [vmem:[%s2998_s25 + $0x70] sm:$0xff]  ;;  %v1645_v56 = vld [vmem:[%s2998_s25 + $0x60] sm:$0xff] }
  0x2b   : > { %631 = vperm.xlu1 %2658, %v604_v10   ;;  %628 = vperm.xlu0 %2657, %v603_v11   ;;  %v1644_v57 = vld [vmem:[%s2998_s25 + $0x58] sm:$0xff]  ;;  %v1643_v58 = vld [vmem:[%s2998_s25 + $0x50] sm:$0xff]  ;;  %v1642_v59 = vld [vmem:[%s2998_s25 + $0x48] sm:$0xff] }
  0x2c   : > { %v1641_v60 = vld [vmem:[%s2998_s25 + $0x40] sm:$0xff]  ;;  %v1640_v61 = vld [vmem:[%s2998_s25 + $0x38] sm:$0xff]  ;;  %v1639_v62 = vld [vmem:[%s2998_s25 + $0x30] sm:$0xff] }
  0x2d   : > { %v1638_v63 = vld [vmem:[%s2998_s25 + $0x28] sm:$0xff]  ;;  %v1637_v0 = vld [vmem:[%s2998_s25 + $0x20] sm:$0xff]  ;;  %v1636_v1 = vld [vmem:[%s2998_s25 + $0x18] sm:$0xff] }
  0x2e   : > { %v1635_v2 = vld [vmem:[%s2998_s25 + $0x10] sm:$0xff]  ;;  %v1634_v4 = vld [vmem:[%s2998_s25 + $0x8] sm:$0xff]  ;;  %v1633_v5 = vld [vmem:[%s2998_s25] sm:$0xff] }
  0x2f   : > { %751 = vperm.xlu1 %2658, %v724_v12   ;;  %748 = vperm.xlu0 %2657, %v723_v13  }
  0x33   : > { %637 = vperm.xlu1 %2658, %v606_v14   ;;  %634 = vperm.xlu0 %2657, %v605_v15  }
  0x37   : > { %757 = vperm.xlu1 %2658, %v726_v18   ;;  %754 = vperm.xlu0 %2657, %v725_v19  }
  0x3b   : > { %643 = vperm.xlu1 %2658, %v608_v21   ;;  %640 = vperm.xlu0 %2657, %v607_v22  }
  0x3f   : > { %763 = vperm.xlu1 %2658, %v728_v23   ;;  %760 = vperm.xlu0 %2657, %v727_v24  }
  0x43   : > { %649 = vperm.xlu1 %2658, %v610_v25   ;;  %646 = vperm.xlu0 %2657, %v609_v26  }
  0x47   : > { %769 = vperm.xlu1 %2658, %v730_v27   ;;  %766 = vperm.xlu0 %2657, %v729_v28  }
  0x4b   : > { %655 = vperm.xlu1 %2658, %v612_v29   ;;  %652 = vperm.xlu0 %2657, %v611_v30  }
  0x4f   : > { %775 = vperm.xlu1 %2658, %v732_v31   ;;  %772 = vperm.xlu0 %2657, %v731_v32  }
  0x53   : > { %661 = vperm.xlu1 %2658, %v614_v33   ;;  %658 = vperm.xlu0 %2657, %v613_v34  }
  0x57   : > { %781 = vperm.xlu1 %2658, %v734_v35   ;;  %778 = vperm.xlu0 %2657, %v733_v36  }
  0x5b   : > { %1122 = vperm.xlu1 %2658, %v1099_v37   ;;  %1117 = vperm.xlu0 %2657, %v1098_v38  }
  0x5f   : > { %1132 = vperm.xlu1 %2658, %v1101_v39   ;;  %1127 = vperm.xlu0 %2657, %v1100_v40  }
  0x63   : > { %1142 = vperm.xlu1 %2658, %v1103_v41   ;;  %1137 = vperm.xlu0 %2657, %v1102_v42  }
  0x67   : > { %1152 = vperm.xlu1 %2658, %v1105_v43   ;;  %1147 = vperm.xlu0 %2657, %v1104_v44  }
  0x6b   : > { %1162 = vperm.xlu1 %2658, %v1107_v45   ;;  %1157 = vperm.xlu0 %2657, %v1106_v46  }
  0x6f   : > { %1172 = vperm.xlu1 %2658, %v1109_v47   ;;  %1167 = vperm.xlu0 %2657, %v1108_v48  }
  0x73   : > { %1182 = vperm.xlu1 %2658, %v1111_v49   ;;  %1177 = vperm.xlu0 %2657, %v1110_v50  }
  0x77   : > { %1192 = vperm.xlu1 %2658, %v1113_v51   ;;  %1187 = vperm.xlu0 %2657, %v1112_v52  }
  0x7b   : > { %1726 = vperm.xlu1 %2658, %v1648_v53   ;;  %1721 = vperm.xlu0 %2657, %v1647_v54  }
  0x7f   : > { %1716 = vperm.xlu1 %2658, %v1646_v55   ;;  %1711 = vperm.xlu0 %2657, %v1645_v56  }
  0x83   : > { %1706 = vperm.xlu1 %2658, %v1644_v57   ;;  %1701 = vperm.xlu0 %2657, %v1643_v58  }
  0x87   : > { %1696 = vperm.xlu1 %2658, %v1642_v59   ;;  %1691 = vperm.xlu0 %2657, %v1641_v60  }
  0x8b   : > { %1686 = vperm.xlu1 %2658, %v1640_v61   ;;  %1681 = vperm.xlu0 %2657, %v1639_v62  }
  0x8f   : > { %1676 = vperm.xlu1 %2658, %v1638_v63   ;;  %1671 = vperm.xlu0 %2657, %v1637_v0  }
  0x93   : > { %1666 = vperm.xlu1 %2658, %v1636_v1   ;;  %1661 = vperm.xlu0 %2657, %v1635_v2  }
  0x96   : > { %v737_v7 = vpop.permute.xlu1 %736  ;;  %v617_v8 = vpop.permute.xlu0 %616 }
  0x97   : > { %1656 = vperm.xlu1 %2658, %v1634_v4   ;;  %1651 = vperm.xlu0 %2657, %v1633_v5   ;;  %vm783_vm0 = vcmp.eq.s32.totalorder %v3073_v6, %v737_v7  ;;  %vm663_vm1 = vcmp.eq.s32.totalorder %v3073_v6, %v617_v8 }
  0x98   : > { %v2300_v11 = vsel %vm783_vm0, 1.0, %v2868_v20  ;;  %v2284_v12 = vsel %vm663_vm1, 1.0, %v2868_v20 }
  0x9a   : > { %v740_v9 = vpop.permute.xlu1 %739  ;;  %v620_v10 = vpop.permute.xlu0 %619 }
  0x9b   : > { %vm784_vm2 = vcmp.eq.s32.totalorder %v3073_v6, %v740_v9  ;;  %vm664_vm3 = vcmp.eq.s32.totalorder %v3073_v6, %v620_v10 }
  0x9c   : > { %v2301_v13 = vsel %vm784_vm2, 1.0, %v2868_v20  ;;  %v2285_v14 = vsel %vm664_vm3, 1.0, %v2868_v20 }
  0x9d   : > { %v831_v15 = vpack.c.bf16 %v2301_v13, %v2300_v11  ;;  %v711_v16 = vpack.c.bf16 %v2285_v14, %v2284_v12 }
  0x9e   : > { %v626_v17 = vpop.permute.xlu1 %625  ;;  %v623_v18 = vpop.permute.xlu0 %622 }
  0x9f   : > { %vm666_vm5 = vcmp.eq.s32.totalorder %v3073_v6, %v626_v17  ;;  %vm665_vm6 = vcmp.eq.s32.totalorder %v3073_v6, %v623_v18  ;;  %2487 = vmatprep.mubr.msk.bf16.mxu0 %vm849_vm4, %v831_v15  ;;  %2505 = vmatprep.mubr.msk.bf16.mxu1 %vm849_vm4, %v711_v16 }
  0xa0   : > { %v2287_v19 = vsel %vm666_vm5, 1.0, %v2868_v20  ;;  %v2286_v21 = vsel %vm665_vm6, 1.0, %v2868_v20 }
  0xa1   : > { %v712_v22 = vpack.c.bf16 %v2287_v19, %v2286_v21 }
  0xa2   : > { %v746_v23 = vpop.permute.xlu1 %745  ;;  %v743_v24 = vpop.permute.xlu0 %742 }
  0xa3   : > { %vm786_vm7 = vcmp.eq.s32.totalorder %v3073_v6, %v746_v23  ;;  %vm785_vm8 = vcmp.eq.s32.totalorder %v3073_v6, %v743_v24  ;;  %2506 = vmatmul.mubr.msk.bf16.vlgmr.msra.gmra.mxu1 %vm849_vm4, %v712_v22 }
  0xa4   : > { %v2303_v25 = vsel %vm786_vm7, 1.0, %v2868_v20  ;;  %v2302_v26 = vsel %vm785_vm8, 1.0, %v2868_v20 }
  0xa5   : > { %v832_v27 = vpack.c.bf16 %v2303_v25, %v2302_v26 }
  0xa6   : > { %v632_v28 = vpop.permute.xlu1 %631  ;;  %v629_v29 = vpop.permute.xlu0 %628 }
  0xa7   : > { %vm668_vm9 = vcmp.eq.s32.totalorder %v3073_v6, %v632_v28  ;;  %vm667_vm10 = vcmp.eq.s32.totalorder %v3073_v6, %v629_v29  ;;  %2488 = vmatmul.mubr.msk.bf16.vlgmr.msra.gmra.mxu0 %vm849_vm4, %v832_v27  ;;  %v2661_v27 = vld [vmem:[%s3472_s8 + $0x38] sm:$0xff]   ;;  %v2662_v28 = vld [vmem:[%s3472_s8 + $0x30] sm:$0xff]   ;;  %v2664_v29 = vld [vmem:[%s3472_s8 + $0x20] sm:$0xff]  }
  0xa8   : > { %v2289_v30 = vsel %vm668_vm9, 1.0, %v2868_v20  ;;  %v2288_v31 = vsel %vm667_vm10, 1.0, %v2868_v20  ;;  %2521 = vmatprep.subr.bf16.mxu0 %v2661_v27 }
  0xa9   : > { %v713_v32 = vpack.c.bf16 %v2289_v30, %v2288_v31  ;;  %2522 = vmatpush3.bf16.msra.mxu0 %v2661_v27  ;;  %v2665_v30 = vld [vmem:[%s3472_s8 + $0x18] sm:$0xff]   ;;  %v2666_v31 = vld [vmem:[%s3472_s8 + $0x10] sm:$0xff]  }
  0xaa   : > { %v752_v33 = vpop.permute.xlu1 %751  ;;  %v749_v34 = vpop.permute.xlu0 %748  ;;  %2523 = vmatprep.subr.bf16.mxu0 %v2662_v28 }
  0xab   : > { %vm788_vm11 = vcmp.eq.s32.totalorder %v3073_v6, %v752_v33  ;;  %vm787_vm12 = vcmp.eq.s32.totalorder %v3073_v6, %v749_v34  ;;  %2509 = vmatprep.mubr.msk.bf16.mxu1 %vm849_vm4, %v713_v32  ;;  %v2667_v32 = vld [vmem:[%s3472_s8 + $0x8] sm:$0xff]   ;;  %v2668_v33 = vld [vmem:[%s3472_s8] sm:$0xff]  }
  0xac   : > { %v2305_v35 = vsel %vm788_vm11, 1.0, %v2868_v20  ;;  %v2304_v36 = vsel %vm787_vm12, 1.0, %v2868_v20 }
  0xad   : > { %v833_v37 = vpack.c.bf16 %v2305_v35, %v2304_v36  ;;  %2524 = vmatpush3.bf16.msra.mxu0 %v2662_v28 }
  0xae   : > { %v638_v38 = vpop.permute.xlu1 %637  ;;  %v635_v39 = vpop.permute.xlu0 %634 }
  0xaf   : > { %vm670_vm13 = vcmp.eq.s32.totalorder %v3073_v6, %v638_v38  ;;  %vm669_vm14 = vcmp.eq.s32.totalorder %v3073_v6, %v635_v39  ;;  %2491 = vmatprep.mubr.msk.bf16.mxu0 %vm849_vm4, %v833_v37  ;;  %v3182_v39 = vld [vmem:[%s3471_s7] ss:$0 sm:$0xff] }
  0xb0   : > { %v2291_v40 = vsel %vm670_vm13, 1.0, %v2868_v20  ;;  %v2290_v41 = vsel %vm669_vm14, 1.0, %v2868_v20 }
  0xb1   : > { %v714_v42 = vpack.c.bf16 %v2291_v40, %v2290_v41 }
  0xb2   : > { %v758_v43 = vpop.permute.xlu1 %757  ;;  %v755_v44 = vpop.permute.xlu0 %754 }
  0xb3   : > { %vm790_vm15 = vcmp.eq.s32.totalorder %v3073_v6, %v758_v43  ;;  %vm789_vm0 = vcmp.eq.s32.totalorder %v3073_v6, %v755_v44  ;;  %2510 = vmatmul.mubr.msk.bf16.gmra.mxu1 %vm849_vm4, %v714_v42 }
  0xb4   : > { %v2307_v45 = vsel %vm790_vm15, 1.0, %v2868_v20  ;;  %v2306_v46 = vsel %vm789_vm0, 1.0, %v2868_v20 }
  0xb5   : > { %v834_v47 = vpack.c.bf16 %v2307_v45, %v2306_v46 }
  0xb6   : > { %v644_v48 = vpop.permute.xlu1 %643  ;;  %v641_v49 = vpop.permute.xlu0 %640 }
  0xb7   : > { %vm672_vm1 = vcmp.eq.s32.totalorder %v3073_v6, %v644_v48  ;;  %vm671_vm2 = vcmp.eq.s32.totalorder %v3073_v6, %v641_v49  ;;  %2492 = vmatmul.mubr.msk.bf16.gmra.mxu0 %vm849_vm4, %v834_v47 }
  0xb8   : > { %v2293_v50 = vsel %vm672_vm1, 1.0, %v2868_v20  ;;  %v2292_v51 = vsel %vm671_vm2, 1.0, %v2868_v20 }
  0xb9   : > { %v715_v52 = vpack.c.bf16 %v2293_v50, %v2292_v51 }
  0xba   : > { %v764_v53 = vpop.permute.xlu1 %763  ;;  %v761_v54 = vpop.permute.xlu0 %760 }
  0xbb   : > { %vm792_vm3 = vcmp.eq.s32.totalorder %v3073_v6, %v764_v53  ;;  %vm791_vm5 = vcmp.eq.s32.totalorder %v3073_v6, %v761_v54  ;;  %2513 = vmatprep.mubr.msk.bf16.mxu1 %vm849_vm4, %v715_v52 }
  0xbc   : > { %v2309_v55 = vsel %vm792_vm3, 1.0, %v2868_v20  ;;  %v2308_v56 = vsel %vm791_vm5, 1.0, %v2868_v20 }
  0xbd   : > { %v835_v57 = vpack.c.bf16 %v2309_v55, %v2308_v56 }
  0xbe   : > { %v650_v58 = vpop.permute.xlu1 %649  ;;  %v647_v59 = vpop.permute.xlu0 %646 }
  0xbf   : > { %vm674_vm6 = vcmp.eq.s32.totalorder %v3073_v6, %v650_v58  ;;  %vm673_vm7 = vcmp.eq.s32.totalorder %v3073_v6, %v647_v59  ;;  %2495 = vmatprep.mubr.msk.bf16.mxu0 %vm849_vm4, %v835_v57 }
  0xc0   : > { %v2295_v60 = vsel %vm674_vm6, 1.0, %v2868_v20  ;;  %v2294_v61 = vsel %vm673_vm7, 1.0, %v2868_v20 }
  0xc1   : > { %v716_v62 = vpack.c.bf16 %v2295_v60, %v2294_v61 }
  0xc2   : > { %v770_v63 = vpop.permute.xlu1 %769  ;;  %v767_v0 = vpop.permute.xlu0 %766 }
  0xc3   : > { %vm794_vm8 = vcmp.eq.s32.totalorder %v3073_v6, %v770_v63  ;;  %vm793_vm9 = vcmp.eq.s32.totalorder %v3073_v6, %v767_v0  ;;  %2514 = vmatmul.mubr.msk.bf16.gmra.mxu1 %vm849_vm4, %v716_v62 }
  0xc4   : > { %v2311_v1 = vsel %vm794_vm8, 1.0, %v2868_v20  ;;  %v2310_v2 = vsel %vm793_vm9, 1.0, %v2868_v20 }
  0xc5   : > { %v836_v4 = vpack.c.bf16 %v2311_v1, %v2310_v2 }
  0xc6   : > { %v656_v5 = vpop.permute.xlu1 %655  ;;  %v653_v7 = vpop.permute.xlu0 %652 }
  0xc7   : > { %vm676_vm10 = vcmp.eq.s32.totalorder %v3073_v6, %v656_v5  ;;  %vm675_vm11 = vcmp.eq.s32.totalorder %v3073_v6, %v653_v7  ;;  %2496 = vmatmul.mubr.msk.bf16.gmra.mxu0 %vm849_vm4, %v836_v4 }
  0xc8   : > { %v2297_v8 = vsel %vm676_vm10, 1.0, %v2868_v20  ;;  %v2296_v9 = vsel %vm675_vm11, 1.0, %v2868_v20 }
  0xc9   : > { %v717_v10 = vpack.c.bf16 %v2297_v8, %v2296_v9 }
  0xca   : > { %v776_v11 = vpop.permute.xlu1 %775  ;;  %v773_v12 = vpop.permute.xlu0 %772 }
  0xcb   : > { %vm796_vm12 = vcmp.eq.s32.totalorder %v3073_v6, %v776_v11  ;;  %vm795_vm13 = vcmp.eq.s32.totalorder %v3073_v6, %v773_v12  ;;  %2517 = vmatprep.mubr.msk.bf16.mxu1 %vm849_vm4, %v717_v10 }
  0xcc   : > { %v2313_v13 = vsel %vm796_vm12, 1.0, %v2868_v20  ;;  %v2312_v14 = vsel %vm795_vm13, 1.0, %v2868_v20 }
  0xcd   : > { %v837_v15 = vpack.c.bf16 %v2313_v13, %v2312_v14 }
  0xce   : > { %v662_v16 = vpop.permute.xlu1 %661  ;;  %v659_v17 = vpop.permute.xlu0 %658 }
  0xcf   : > { %vm678_vm14 = vcmp.eq.s32.totalorder %v3073_v6, %v662_v16  ;;  %vm677_vm15 = vcmp.eq.s32.totalorder %v3073_v6, %v659_v17  ;;  %2499 = vmatprep.mubr.msk.bf16.mxu0 %vm849_vm4, %v837_v15 }
  0xd0   : > { %v2299_v18 = vsel %vm678_vm14, 1.0, %v2868_v20  ;;  %v2298_v19 = vsel %vm677_vm15, 1.0, %v2868_v20 }
  0xd1   : > { %v718_v21 = vpack.c.bf16 %v2299_v18, %v2298_v19 }
  0xd2   : > { %v782_v22 = vpop.permute.xlu1 %781  ;;  %v779_v23 = vpop.permute.xlu0 %778 }
  0xd3   : > { %vm798_vm0 = vcmp.eq.s32.totalorder %v3073_v6, %v782_v22  ;;  %vm797_vm1 = vcmp.eq.s32.totalorder %v3073_v6, %v779_v23  ;;  %2518 = vmatmul.mubr.msk.bf16.gmra.mxu1 %vm849_vm4, %v718_v21  ;;  %v2663_v6 = vld [vmem:[%s3472_s8 + $0x28] sm:$0xff]  }
  0xd4   : > { %v2315_v24 = vsel %vm798_vm0, 1.0, %v2868_v20  ;;  %v2314_v25 = vsel %vm797_vm1, 1.0, %v2868_v20  ;;  %2525 = vmatprep.subr.bf16.mxu0 %v2663_v6 }
  0xd5   : > { %v838_v26 = vpack.c.bf16 %v2315_v24, %v2314_v25  ;;  %2526 = vmatpush3.bf16.msra.mxu0 %v2663_v6 }
  0xd6   : > { %2527 = vmatprep.subr.bf16.mxu0 %v2664_v29  ;;  %v1118_v34 = vpop.permute.xlu0 %1117  ;;  %v1123_v35 = vpop.permute.xlu1 %1122 }
  0xd7   : > { %2500 = vmatmul.mubr.msk.bf16.gmra.mxu0 %vm849_vm4, %v838_v26  ;;  %v1201_v46 = vmul.f32 %v3182_v39, %v1118_v34  ;;  %v1202_v54 = vmul.f32 %v3182_v39, %v1123_v35  ;;  %vm2869_vm4 = vmmov 0  }
  0xd8   : > { %2569 = vmatprep.mubr.msk.bf16.mxu1 %vm2869_vm4, %v2868_v20 }
  0xd9   : > { %2528 = vmatpush3.bf16.msra.mxu0 %v2664_v29 }
  0xda   : > { %2529 = vmatprep.subr.bf16.mxu0 %v2665_v30  ;;  %v1128_v37 = vpop.permute.xlu0 %1127  ;;  %v1133_v41 = vpop.permute.xlu1 %1132 }
  0xdb   : > { %v1203_v42 = vmul.f32 %v3182_v39, %v1128_v37  ;;  %v1204_v50 = vmul.f32 %v3182_v39, %v1133_v41 }
  0xdd   : > { %2530 = vmatpush3.bf16.msra.mxu0 %v2665_v30 }
  0xde   : > { %2531 = vmatprep.subr.bf16.mxu0 %v2666_v31  ;;  %v1138_v60 = vpop.permute.xlu0 %1137  ;;  %v1143_v63 = vpop.permute.xlu1 %1142 }
  0xdf   : > { %v1205_v11 = vmul.f32 %v3182_v39, %v1138_v60  ;;  %v1206_v29 = vmul.f32 %v3182_v39, %v1143_v63 }
  0xe1   : > { %2532 = vmatpush3.bf16.msra.mxu0 %v2666_v31 }
  0xe2   : > { %2533 = vmatprep.subr.bf16.mxu0 %v2667_v32  ;;  %v1148_v2 = vpop.permute.xlu0 %1147  ;;  %v1153_v7 = vpop.permute.xlu1 %1152 }
  0xe3   : > { %v1207_v8 = vmul.f32 %v3182_v39, %v1148_v2  ;;  %v1208_v16 = vmul.f32 %v3182_v39, %v1153_v7 }
  0xe5   : > { %2534 = vmatpush3.bf16.msra.mxu0 %v2667_v32 }
  0xe6   : > { %2535 = vmatprep.subr.bf16.mxu0 %v2668_v33  ;;  %v1158_v30 = vpop.permute.xlu0 %1157  ;;  %v1163_v37 = vpop.permute.xlu1 %1162 }
  0xe9   : > { %2536 = vmatpush3.bf16.msra.mxu0 %v2668_v33 }
  0xea   : > { %v1168_v41 = vpop.permute.xlu0 %1167 }
 0x163   : > { %v2507_v36 = vpop.f32.mrf.mxu1 }
 0x165   : > { %v1035_v38 = vpop.f32.mrf.mxu1 }
 0x167   : > { %v2489_v40 = vpop.f32.mrf.mxu0  ;;  %v2508_v44 = vpop.f32.mrf.mxu1 }
 0x168   : > { %v1044_v43 = vadd.f32 %v2507_v36, %v2489_v40 }
 0x169   : > { %v908_v45 = vpop.f32.mrf.mxu0  ;;  %v1038_v55 = vpop.f32.mrf.mxu1 }
 0x16a   : > { %v3186_v47 = vadd.f32 %v1203_v42, %v1044_v43  ;;  %v1036_v48 = vadd.f32 %v1035_v38, %v908_v45 }
 0x16b   : > { %v2490_v49 = vpop.f32.mrf.mxu0 }
 0x16c   : > { %v2337_v51 = vmul.f32 -1.442695, %v3186_v47  ;;  %v3190_v52 = vadd.f32 %v1201_v46, %v1036_v48  ;;  %v1047_v53 = vadd.f32 %v2508_v44, %v2490_v49  ;;  %v1211_v44 = vmul.f32 %v3182_v39, %v1168_v41  ;;  %v1173_v46 = vpop.permute.xlu1 %1172 }
 0x16d   : > { %v911_v56 = vpop.f32.mrf.mxu0  ;;  %v1209_v49 = vmul.f32 %v3182_v39, %v1158_v30 }
 0x16e   : > { %2669 = vpow2.f32 %v2337_v51  ;;  %v2335_v57 = vmul.f32 -1.442695, %v3190_v52  ;;  %v3194_v58 = vadd.f32 %v1204_v50, %v1047_v53  ;;  %v1039_v59 = vadd.f32 %v1038_v55, %v911_v56 }
 0x170   : > { %2671 = vpow2.f32 %v2335_v57  ;;  %v2338_v61 = vmul.f32 -1.442695, %v3194_v58  ;;  %v3197_v62 = vadd.f32 %v1202_v54, %v1039_v59  ;;  %v1212_v57 = vmul.f32 %v3182_v39, %v1173_v46 }
 0x172   : > { %2673 = vpow2.f32 %v2338_v61  ;;  %v2336_v0 = vmul.f32 -1.442695, %v3197_v62 }
 0x173   : > { %v2511_v1 = vpop.f32.mrf.mxu1 }
 0x174   : > { %2675 = vpow2.f32 %v2336_v0 }
 0x175   : > { %v1051_v4 = vpop.f32.mrf.mxu1 }
 0x177   : > { %v2493_v5 = vpop.f32.mrf.mxu0  ;;  %v2512_v13 = vpop.f32.mrf.mxu1 }
 0x178   : > { %v1060_v9 = vadd.f32 %v2511_v1, %v2493_v5 }
 0x179   : > { %v924_v10 = vpop.f32.mrf.mxu0  ;;  %v1054_v27 = vpop.f32.mrf.mxu1 }
 0x17a   : > { %v3202_v12 = vadd.f32 %v1207_v8, %v1060_v9  ;;  %v1052_v14 = vadd.f32 %v1051_v4, %v924_v10  ;;  %v1210_v8 = vmul.f32 %v3182_v39, %v1163_v37  ;;  %v1178_v9 = vpop.permute.xlu0 %1177 }
 0x17b   : > { %v2670_v15 = vpop.eup %2669  ;;  %v2494_v17 = vpop.f32.mrf.mxu0 }
 0x17c   : > { %v1283_v18 = vadd.f32 1.0, %v2670_v15  ;;  %v2341_v19 = vmul.f32 -1.442695, %v3202_v12  ;;  %v3206_v21 = vadd.f32 %v1205_v11, %v1052_v14  ;;  %v1063_v22 = vadd.f32 %v2512_v13, %v2494_v17 }
 0x17d   : > { %v2672_v23 = vpop.eup %2671  ;;  %v927_v24 = vpop.f32.mrf.mxu0 }
 0x17e   : > { %2677 = vrcp.f32 %v1283_v18  ;;  %v1281_v25 = vadd.f32 1.0, %v2672_v23  ;;  %v2339_v26 = vmul.f32 -1.442695, %v3206_v21  ;;  %v3209_v28 = vadd.f32 %v1208_v16, %v1063_v22  ;;  %v1183_v23 = vpop.permute.xlu1 %1182  ;;  %v1188_v30 = vpop.permute.xlu0 %1187 }
 0x17f   : > { %v2674_v6 = vpop.eup %2673  ;;  %2679 = vpow2.f32 %v2341_v19  ;;  %v1055_v31 = vadd.f32 %v1054_v27, %v927_v24 }
 0x180   : > { %2681 = vrcp.f32 %v1281_v25  ;;  %v1284_v32 = vadd.f32 1.0, %v2674_v6  ;;  %v2342_v33 = vmul.f32 -1.442695, %v3209_v28 }
 0x181   : > { %v2676_v34 = vpop.eup %2675  ;;  %2683 = vpow2.f32 %v2339_v26  ;;  %v3213_v35 = vadd.f32 %v1206_v29, %v1055_v31 }
 0x182   : > { %2685 = vrcp.f32 %v1284_v32  ;;  %v1282_v36 = vadd.f32 1.0, %v2676_v34 }
 0x183   : > { %2687 = vpow2.f32 %v2342_v33  ;;  %v2340_v38 = vmul.f32 -1.442695, %v3213_v35  ;;  %v2515_v40 = vpop.f32.mrf.mxu1 }
 0x184   : > { %2689 = vrcp.f32 %v1282_v36  ;;  %v1213_v36 = vmul.f32 %v3182_v39, %v1178_v9 }
 0x185   : > { %2691 = vpow2.f32 %v2340_v38  ;;  %v1067_v42 = vpop.f32.mrf.mxu1 }
 0x187   : > { %v2497_v43 = vpop.f32.mrf.mxu0  ;;  %v2516_v51 = vpop.f32.mrf.mxu1 }
 0x188   : > { %v1076_v45 = vadd.f32 %v2515_v40, %v2497_v43 }
 0x189   : > { %v940_v48 = vpop.f32.mrf.mxu0  ;;  %v1070_v4 = vpop.f32.mrf.mxu1 }
 0x18a   : > { %v3218_v50 = vadd.f32 %v1211_v44, %v1076_v45  ;;  %v1068_v53 = vadd.f32 %v1067_v42, %v940_v48 }
 0x18b   : > { %v2678_v54 = vpop.eup %2677  ;;  %v2498_v55 = vpop.f32.mrf.mxu0 }
 0x18c   : > { %v2680_v56 = vpop.eup %2679  ;;  %v2345_v59 = vmul.f32 -1.442695, %v3218_v50  ;;  %v3222_v60 = vadd.f32 %v1209_v49, %v1068_v53  ;;  %v1079_v61 = vadd.f32 %v2516_v51, %v2498_v55  ;;  %v1331_v26 = vmul.f32 %v2678_v54, %v3186_v47 }
 0x18d   : > { %v2682_v63 = vpop.eup %2681  ;;  %v943_v0 = vpop.f32.mrf.mxu0  ;;  %v1287_v14 = vadd.f32 1.0, %v2680_v56 }
 0x18e   : > { %v2684_v1 = vpop.eup %2683  ;;  %2693 = vpow2.f32 %v2345_v59  ;;  %v2343_v2 = vmul.f32 -1.442695, %v3222_v60  ;;  %v3225_v5 = vadd.f32 %v1212_v57, %v1079_v61  ;;  %v1071_v11 = vadd.f32 %v1070_v4, %v943_v0 }
 0x18f   : > { %v2686_v7 = vpop.eup %2685  ;;  %v1285_v10 = vadd.f32 1.0, %v2684_v1  ;;  %v1329_v24 = vmul.f32 %v2682_v63, %v3190_v52  ;;  %v1193_v52 = vpop.permute.xlu1 %1192  ;;  %v1214_v59 = vmul.f32 %v3182_v39, %v1183_v23 }
 0x190   : > { %v2688_v13 = vpop.eup %2687  ;;  %2695 = vpow2.f32 %v2343_v2  ;;  %v2346_v15 = vmul.f32 -1.442695, %v3225_v5  ;;  %v1332_v17 = vmul.f32 %v2686_v7, %v3194_v58  ;;  %v3230_v19 = vadd.f32 %v1210_v8, %v1071_v11 }
 0x191   : > { %v2690_v16 = vpop.eup %2689  ;;  %2697 = vrcp.f32 %v1285_v10  ;;  %v1288_v18 = vadd.f32 1.0, %v2688_v13  ;;  %v1216_v42 = vmul.f32 %v3182_v39, %v1193_v52 }
 0x192   : > { %v2692_v22 = vpop.eup %2691  ;;  %v1330_v25 = vmul.f32 %v2690_v16, %v3197_v62  ;;  %2699 = vpow2.f32 %v2346_v15  ;;  %v2344_v6 = vmul.f32 -1.442695, %v3230_v19  ;;  %v1346_v31 = vpack.c.bf16 %v1332_v17, %v1331_v26 }
 0x193   : > { %2701 = vrcp.f32 %v1288_v18  ;;  %v1286_v27 = vadd.f32 1.0, %v2692_v22  ;;  %v2519_v29 = vpop.f32.mrf.mxu1  ;;  %v1215_v62 = vmul.f32 %v3182_v39, %v1188_v30 }
 0x194   : > { %2703 = vrcp.f32 %v1287_v14  ;;  %v1345_v58 = vpack.c.bf16 %v1330_v25, %v1329_v24 }
 0x195   : > { %2705 = vrcp.f32 %v1286_v27  ;;  %v1083_v32 = vpop.f32.mrf.mxu1 }
 0x196   : > { %2707 = vpow2.f32 %v2344_v6  ;;  %2537 = vmatprep.mubr.bf16.mxu0 %v1345_v58 }
 0x197   : > { %v2501_v33 = vpop.f32.mrf.mxu0  ;;  %2538 = vmatmul.mubr.bf16.vlgmr.msra.gmra.mxu0 %v1346_v31  ;;  %v2520_v38 = vpop.f32.mrf.mxu1 }
 0x198   : > { %v1092_v34 = vadd.f32 %v2519_v29, %v2501_v33 }
 0x199   : > { %v956_v47 = vpop.f32.mrf.mxu0  ;;  %v1086_v55 = vpop.f32.mrf.mxu1 }
 0x19a   : > { %v3238_v37 = vadd.f32 %v1215_v62, %v1092_v34  ;;  %v1084_v40 = vadd.f32 %v1083_v32, %v956_v47 }
 0x19b   : > { %v2694_v41 = vpop.eup %2693  ;;  %v2502_v43 = vpop.f32.mrf.mxu0 }
 0x19c   : > { %v1291_v44 = vadd.f32 1.0, %v2694_v41  ;;  %v2349_v45 = vmul.f32 -1.442695, %v3238_v37  ;;  %v3242_v46 = vadd.f32 %v1213_v36, %v1084_v40  ;;  %v1095_v48 = vadd.f32 %v2520_v38, %v2502_v43 }
 0x19d   : > { %v2696_v49 = vpop.eup %2695  ;;  %v959_v51 = vpop.f32.mrf.mxu0 }
 0x19e   : > { %v2698_v53 = vpop.eup %2697  ;;  %v2347_v54 = vmul.f32 -1.442695, %v3242_v46  ;;  %v1232_v56 = vadd.f32 %v1216_v42, %v1095_v48  ;;  %2709 = vrcp.f32 %v1291_v44  ;;  %v1087_v61 = vadd.f32 %v1086_v55, %v959_v51 }
 0x19f   : > { %v2700_v57 = vpop.eup %2699  ;;  %v1289_v0 = vadd.f32 1.0, %v2696_v49  ;;  %2711 = vpow2.f32 %v2349_v45  ;;  %v1333_v11 = vmul.f32 %v2698_v53, %v3206_v21 }
 0x1a0   : > { %v2702_v63 = vpop.eup %2701  ;;  %v1292_v1 = vadd.f32 1.0, %v2700_v57  ;;  %v2350_v2 = vmul.f32 -1.442695, %v1232_v56  ;;  %2713 = vpow2.f32 %v2347_v54  ;;  %v1230_v7 = vadd.f32 %v1214_v59, %v1087_v61 }
 0x1a1   : > { %v2704_v4 = vpop.eup %2703  ;;  %v1336_v9 = vmul.f32 %v2702_v63, %v3209_v28 }
 0x1a2   : > { %v2706_v8 = vpop.eup %2705  ;;  %2715 = vrcp.f32 %v1292_v1  ;;  %v2348_v39 = vmul.f32 -1.442695, %v1230_v7  ;;  %v1335_v14 = vmul.f32 %v2704_v4, %v3202_v12 }
 0x1a3   : > { %v2708_v10 = vpop.eup %2707  ;;  %v1334_v13 = vmul.f32 %v2706_v8, %v3213_v35  ;;  %2717 = vpow2.f32 %v2350_v2 }
 0x1a4   : > { %2719 = vrcp.f32 %v1289_v0  ;;  %v1290_v15 = vadd.f32 1.0, %v2708_v10  ;;  %v1348_v17 = vpack.c.bf16 %v1336_v9, %v1335_v14 }
 0x1a5   : > { %2721 = vpow2.f32 %v2348_v39  ;;  %v1347_v16 = vpack.c.bf16 %v1334_v13, %v1333_v11 }
 0x1a6   : > { %2723 = vrcp.f32 %v1290_v15 }
 0x1a7   : > { %2541 = vmatprep.mubr.bf16.mxu0 %v1347_v16 }
 0x1a8   : > { %2542 = vmatmul.mubr.bf16.gmra.mxu0 %v1348_v17 }
 0x1ab   : > { %v2710_v18 = vpop.eup %2709 }
 0x1ac   : > { %v2712_v28 = vpop.eup %2711  ;;  %v1339_v31 = vmul.f32 %v2710_v18, %v3218_v50 }
 0x1ad   : > { %v2714_v22 = vpop.eup %2713  ;;  %v1295_v25 = vadd.f32 1.0, %v2712_v28 }
 0x1ae   : > { %v1293_v24 = vadd.f32 1.0, %v2714_v22 }
 0x1af   : > { %v2716_v23 = vpop.eup %2715 }
 0x1b0   : > { %v2718_v21 = vpop.eup %2717  ;;  %2725 = vrcp.f32 %v1293_v24  ;;  %v1340_v6 = vmul.f32 %v2716_v23, %v3225_v5 }
 0x1b1   : > { %v2720_v35 = vpop.eup %2719  ;;  %v1296_v26 = vadd.f32 1.0, %v2718_v21 }
 0x1b2   : > { %v2722_v27 = vpop.eup %2721  ;;  %v1337_v58 = vmul.f32 %v2720_v35, %v3222_v60  ;;  %v1350_v33 = vpack.c.bf16 %v1340_v6, %v1339_v31 }
 0x1b3   : > { %v2724_v12 = vpop.eup %2723  ;;  %2727 = vrcp.f32 %v1296_v26  ;;  %v1294_v29 = vadd.f32 1.0, %v2722_v27 }
 0x1b4   : > { %v1338_v30 = vmul.f32 %v2724_v12, %v3230_v19  ;;  %2729 = vrcp.f32 %v1295_v25 }
 0x1b5   : > { %2731 = vrcp.f32 %v1294_v29 }
 0x1b6   : > { %v1349_v32 = vpack.c.bf16 %v1338_v30, %v1337_v58 }
 0x1b8   : > { %2545 = vmatprep.mubr.bf16.mxu0 %v1349_v32 }
 0x1b9   : > { %2546 = vmatmul.mubr.bf16.gmra.mxu0 %v1350_v33 }
 0x1bd   : > { %v2726_v52 = vpop.eup %2725 }
 0x1be   : > { %v1341_v5 = vmul.f32 %v2726_v52, %v3242_v46 }
 0x1c0   : > { %v2728_v62 = vpop.eup %2727 }
 0x1c1   : > { %v2730_v34 = vpop.eup %2729  ;;  %v1344_v36 = vmul.f32 %v2728_v62, %v1232_v56 }
 0x1c2   : > { %v2732_v47 = vpop.eup %2731  ;;  %v1343_v60 = vmul.f32 %v2730_v34, %v3238_v37  ;;  %v2351_v37 = vld [vmem:[%s3473_s9] ss:$0 sm:$0xff] }
 0x1c3   : > { %v1342_v38 = vmul.f32 %v2732_v47, %v1230_v7 }
 0x1c4   : > { %v1352_v19 = vpack.c.bf16 %v1344_v36, %v1343_v60  ;;  %v1727_v60 = vpop.permute.xlu1 %1726 }
 0x1c5   : > { %v1351_v40 = vpack.c.bf16 %v1342_v38, %v1341_v5 }
 0x1c7   : > { %2549 = vmatprep.mubr.bf16.mxu0 %v1351_v40 }
 0x1c8   : > { %2550 = vmatmul.mubr.bf16.gmra.mxu0 %v1352_v19 }
 0x257   : > { %v2539_v50 = vpop.f32.mrf.mxu0 }
 0x258   : > { %v3288_v28 = vadd.f32 %v2539_v50, %v2351_v37 }
 0x259   : > { %v1458_v41 = vpop.f32.mrf.mxu0 }
 0x25a   : > { %v2362_v25 = vmul.f32 -1.442695, %v3288_v28  ;;  %v3305_v33 = vadd.f32 %v2351_v37, %v1458_v41 }
 0x25b   : > { %v2540_v42 = vpop.f32.mrf.mxu0 }
 0x25c   : > { %v3297_v35 = vadd.f32 %v2540_v42, %v2351_v37  ;;  %v2360_v40 = vmul.f32 -1.442695, %v3305_v33  ;;  %v1722_v42 = vpop.permute.xlu0 %1721 }
 0x25d   : > { %v1461_v43 = vpop.f32.mrf.mxu0 }
 0x25e   : > { %v3299_v26 = vadd.f32 %v2351_v37, %v1461_v43  ;;  %v2363_v29 = vmul.f32 -1.442695, %v3297_v35 }
 0x260   : > { %v2361_v31 = vmul.f32 -1.442695, %v3299_v26 }
 0x268   : > { %v2543_v44 = vpop.f32.mrf.mxu0 }
 0x269   : > { %v3285_v17 = vadd.f32 %v2543_v44, %v2351_v37 }
 0x26a   : > { %v1474_v45 = vpop.f32.mrf.mxu0 }
 0x26b   : > { %v3293_v24 = vadd.f32 %v2351_v37, %v1474_v45  ;;  %v2366_v21 = vmul.f32 -1.442695, %v3285_v17 }
 0x26c   : > { %v2544_v48 = vpop.f32.mrf.mxu0 }
 0x26d   : > { %v3280_v39 = vadd.f32 %v2544_v48, %v2351_v37  ;;  %v2364_v12 = vmul.f32 -1.442695, %v3293_v24 }
 0x26e   : > { %v1477_v49 = vpop.f32.mrf.mxu0 }
 0x26f   : > { %v2367_v22 = vmul.f32 -1.442695, %v3280_v39  ;;  %v3291_v23 = vadd.f32 %v2351_v37, %v1477_v49  ;;  %v1717_v49 = vpop.permute.xlu1 %1716 }
 0x271   : > { %v2365_v27 = vmul.f32 -1.442695, %v3291_v23 }
 0x279   : > { %v2547_v51 = vpop.f32.mrf.mxu0 }
 0x27a   : > { %v3262_v57 = vadd.f32 %v2547_v51, %v2351_v37 }
 0x27b   : > { %v1490_v46 = vpop.f32.mrf.mxu0 }
 0x27c   : > { %v2370_v7 = vmul.f32 -1.442695, %v3262_v57  ;;  %v3274_v9 = vadd.f32 %v2351_v37, %v1490_v46 }
 0x27d   : > { %v2548_v53 = vpop.f32.mrf.mxu0 }
 0x27e   : > { %v3260_v55 = vadd.f32 %v2548_v53, %v2351_v37  ;;  %v2368_v18 = vmul.f32 -1.442695, %v3274_v9 }
 0x27f   : > { %v1493_v54 = vpop.f32.mrf.mxu0 }
 0x280   : > { %v2371_v1 = vmul.f32 -1.442695, %v3260_v55  ;;  %v3270_v2 = vadd.f32 %v2351_v37, %v1493_v54  ;;  %v1712_v54 = vpop.permute.xlu0 %1711 }
 0x282   : > { %v2369_v14 = vmul.f32 -1.442695, %v3270_v2 }
 0x288   : > { %v2551_v56 = vpop.f32.mrf.mxu0 }
 0x289   : > { %v3264_v59 = vadd.f32 %v2551_v56, %v2351_v37 }
 0x28a   : > { %v1506_v61 = vpop.f32.mrf.mxu0 }
 0x28b   : > { %v2374_v63 = vmul.f32 -1.442695, %v3264_v59  ;;  %v3267_v0 = vadd.f32 %v2351_v37, %v1506_v61 }
 0x28c   : > { %v2552_v4 = vpop.f32.mrf.mxu0 }
 0x28d   : > { %2733 = vpow2.f32 %v2374_v63  ;;  %v2372_v8 = vmul.f32 -1.442695, %v3267_v0  ;;  %v3276_v10 = vadd.f32 %v2552_v4, %v2351_v37 }
 0x28e   : > { %v1509_v11 = vpop.f32.mrf.mxu0 }
 0x28f   : > { %2735 = vpow2.f32 %v2372_v8  ;;  %v3278_v13 = vadd.f32 %v2351_v37, %v1509_v11  ;;  %v2375_v15 = vmul.f32 -1.442695, %v3276_v10 }
 0x290   : > { %2737 = vpow2.f32 %v2371_v1 }
 0x291   : > { %2739 = vpow2.f32 %v2370_v7  ;;  %v2373_v16 = vmul.f32 -1.442695, %v3278_v13  ;;  %v1707_v7 = vpop.permute.xlu1 %1706 }
 0x292   : > { %2741 = vpow2.f32 %v2375_v15 }
 0x293   : > { %2743 = vpow2.f32 %v2373_v16  ;;  %v1702_v16 = vpop.permute.xlu0 %1701 }
 0x294   : > { %2745 = vpow2.f32 %v2369_v14 }
 0x295   : > { %2747 = vpow2.f32 %v2368_v18 }
 0x296   : > { %2749 = vpow2.f32 %v2367_v22 }
 0x297   : > { %2751 = vpow2.f32 %v2366_v21 }
 0x298   : > { %2753 = vpow2.f32 %v2362_v25 }
 0x299   : > { %2755 = vpow2.f32 %v2365_v27 }
 0x29a   : > { %v2734_v6 = vpop.eup %2733  ;;  %2757 = vpow2.f32 %v2364_v12 }
 0x29b   : > { %v1583_v58 = vadd.f32 1.0, %v2734_v6 }
 0x29c   : > { %v2736_v30 = vpop.eup %2735 }
 0x29d   : > { %v2738_v32 = vpop.eup %2737  ;;  %v1581_v52 = vadd.f32 1.0, %v2736_v30  ;;  %2759 = vrcp.f32 %v1583_v58 }
 0x29e   : > { %v2740_v62 = vpop.eup %2739  ;;  %2761 = vpow2.f32 %v2363_v29  ;;  %v1580_v36 = vadd.f32 1.0, %v2738_v32  ;;  %v1697_v32 = vpop.permute.xlu1 %1696 }
 0x29f   : > { %v2742_v34 = vpop.eup %2741  ;;  %2763 = vpow2.f32 %v2361_v31  ;;  %v1579_v50 = vadd.f32 1.0, %v2740_v62 }
 0x2a0   : > { %v2744_v47 = vpop.eup %2743  ;;  %v1584_v5 = vadd.f32 1.0, %v2742_v34  ;;  %2765 = vrcp.f32 %v1581_v52 }
 0x2a1   : > { %v2746_v38 = vpop.eup %2745  ;;  %v1582_v19 = vadd.f32 1.0, %v2744_v47 }
 0x2a2   : > { %2767 = vrcp.f32 %v1584_v5  ;;  %v2748_v41 = vpop.eup %2747  ;;  %v1578_v43 = vadd.f32 1.0, %v2746_v38 }
 0x2a3   : > { %2769 = vrcp.f32 %v1582_v19  ;;  %v2750_v44 = vpop.eup %2749  ;;  %v1577_v45 = vadd.f32 1.0, %v2748_v41 }
 0x2a4   : > { %2771 = vrcp.f32 %v1580_v36  ;;  %v2752_v48 = vpop.eup %2751  ;;  %v1576_v46 = vadd.f32 1.0, %v2750_v44 }
 0x2a5   : > { %2773 = vpow2.f32 %v2360_v40  ;;  %v2754_v51 = vpop.eup %2753  ;;  %v1575_v56 = vadd.f32 1.0, %v2752_v48 }
 0x2a6   : > { %2775 = vrcp.f32 %v1579_v50  ;;  %v2756_v53 = vpop.eup %2755  ;;  %v1571_v27 = vadd.f32 1.0, %v2754_v51 }
 0x2a7   : > { %2777 = vrcp.f32 %v1578_v43  ;;  %v2758_v37 = vpop.eup %2757  ;;  %v1574_v1 = vadd.f32 1.0, %v2756_v53 }
 0x2a8   : > { %2779 = vrcp.f32 %v1577_v45  ;;  %v1573_v11 = vadd.f32 1.0, %v2758_v37 }
 0x2a9   : > { %2781 = vrcp.f32 %v1576_v46 }
 0x2aa   : > { %v2760_v61 = vpop.eup %2759  ;;  %2783 = vrcp.f32 %v1575_v56 }
 0x2ab   : > { %v2762_v63 = vpop.eup %2761  ;;  %v1631_v14 = vmul.f32 %v2760_v61, %v3264_v59  ;;  %2785 = vrcp.f32 %v1574_v1 }
 0x2ac   : > { %v2764_v4 = vpop.eup %2763  ;;  %v1572_v18 = vadd.f32 1.0, %v2762_v63  ;;  %2787 = vrcp.f32 %v1573_v11 }
 0x2ad   : > { %v2766_v8 = vpop.eup %2765  ;;  %v1743_v29 = vmul.f32 %v1722_v42, %v1631_v14  ;;  %v1570_v59 = vadd.f32 1.0, %v2764_v4 }
 0x2ae   : > { %v1629_v58 = vmul.f32 %v2766_v8, %v3267_v0  ;;  %2789 = vrcp.f32 %v1572_v18 }
 0x2af   : > { %v2768_v15 = vpop.eup %2767  ;;  %2791 = vrcp.f32 %v1571_v27 }
 0x2b0   : > { %v2770_v22 = vpop.eup %2769  ;;  %v1632_v21 = vmul.f32 %v2768_v15, %v3276_v10  ;;  %v1692_v10 = vpop.permute.xlu0 %1691  ;;  %v1741_v5 = vmul.f32 %v1712_v54, %v1629_v58  ;;  %2793 = vrcp.f32 %v1570_v59  ;;  %v1760_v58 = vld [vmem:[#allocation2] sm:$0xff]  ;;  %v1761_v59 = vld [vmem:[#allocation2 + $0x8] sm:$0xff] }
 0x2b1   : > { %v2772_v25 = vpop.eup %2771  ;;  %v1630_v12 = vmul.f32 %v2770_v22, %v3278_v13 }
 0x2b2   : > { %v2774_v6 = vpop.eup %2773  ;;  %v1744_v30 = vmul.f32 %v1727_v60, %v1632_v21  ;;  %v1628_v52 = vmul.f32 %v2772_v25, %v3260_v55  ;;  %v1687_v55 = vpop.permute.xlu1 %1686 }
 0x2b3   : > { %v2776_v31 = vpop.eup %2775  ;;  %v1742_v34 = vmul.f32 %v1717_v49, %v1630_v12  ;;  %v1569_v36 = vadd.f32 1.0, %v2774_v6  ;;  %v2376_v6 = vld [vmem:[%s589_s27] ss:$0 sm:$0xff] }
 0x2b4   : > { %v1769_v62 = vpack.c.bf16 %v1744_v30, %v1743_v29  ;;  %v2778_v47 = vpop.eup %2777  ;;  %v1627_v13 = vmul.f32 %v2776_v31, %v3262_v57  ;;  %v1740_v0 = vmul.f32 %v1707_v7, %v1628_v52  ;;  %v1682_v43 = vpop.permute.xlu0 %1681 }
 0x2b5   : > { %v2780_v38 = vpop.eup %2779  ;;  %v1626_v60 = vmul.f32 %v2778_v47, %v3270_v2  ;;  %v1768_v40 = vpack.c.bf16 %v1742_v34, %v1741_v5  ;;  %2795 = vrcp.f32 %v1569_v36 }
 0x2b6   : > { %2554 = vmatpush3.bf16.msra.mxu1 %v1769_v62  ;;  %v2782_v19 = vpop.eup %2781  ;;  %v1739_v50 = vmul.f32 %v1702_v16, %v1627_v13  ;;  %v1625_v41 = vmul.f32 %v2780_v38, %v3274_v9  ;;  %v1677_v46 = vpop.permute.xlu1 %1676 }
 0x2b7   : > { %2555 = vmatprep.subr.bf16.mxu1 %v2868_v20  ;;  %v2784_v42 = vpop.eup %2783  ;;  %v1624_v57 = vmul.f32 %v2782_v19, %v3280_v39  ;;  %v1738_v45 = vmul.f32 %v1697_v32, %v1626_v60 }
 0x2b8   : > { %v1767_v44 = vpack.c.bf16 %v1740_v0, %v1739_v50  ;;  %v2786_v48 = vpop.eup %2785  ;;  %v1623_v49 = vmul.f32 %v2784_v42, %v3285_v17  ;;  %v1737_v2 = vmul.f32 %v1692_v10, %v1625_v41  ;;  %v1672_v56 = vpop.permute.xlu0 %1671 }
 0x2b9   : > { %v2788_v51 = vpop.eup %2787  ;;  %v1736_v9 = vmul.f32 %v1687_v55, %v1624_v57  ;;  %v1622_v54 = vmul.f32 %v2786_v48, %v3291_v23 }
 0x2ba   : > { %2556 = vmatpush3.bf16.msra.mxu1 %v1768_v40  ;;  %v1766_v37 = vpack.c.bf16 %v1738_v45, %v1737_v2  ;;  %v1735_v61 = vmul.f32 %v1682_v43, %v1623_v49  ;;  %v1621_v39 = vmul.f32 %v2788_v51, %v3293_v24  ;;  %v1667_v8 = vpop.permute.xlu1 %1666  ;;  %v1746_v24 = vshrl.u32 %v597_v3, 7 }
 0x2bb   : > { %2557 = vmatprep.subr.bf16.mxu1 %v2868_v20  ;;  %v2790_v53 = vpop.eup %2789  ;;  %v1734_v4 = vmul.f32 %v1677_v46, %v1622_v54 }
 0x2bc   : > { %v2792_v63 = vpop.eup %2791  ;;  %v1620_v17 = vmul.f32 %v2790_v53, %v3297_v35  ;;  %v1765_v1 = vpack.c.bf16 %v1736_v9, %v1735_v61  ;;  %v1733_v14 = vmul.f32 %v1672_v56, %v1621_v39  ;;  %v1662_v15 = vpop.permute.xlu0 %1661  ;;  %vm1753_vm2 = vcmp.eq.s32.totalorder %v1746_v24, %v2376_v6 }
 0x2bd   : > { %v2794_v7 = vpop.eup %2793  ;;  %v1619_v11 = vmul.f32 %v2792_v63, %v3288_v28  ;;  %v1747_v28 = vadd.s32 8, %v1746_v24 }
 0x2be   : > { %2558 = vmatpush3.bf16.msra.mxu1 %v1767_v44  ;;  %v1732_v16 = vmul.f32 %v1667_v8, %v1620_v17  ;;  %v1618_v18 = vmul.f32 %v2794_v7, %v3299_v26  ;;  %v1764_v22 = vpack.c.bf16 %v1734_v4, %v1733_v14  ;;  %v1657_v25 = vpop.permute.xlu1 %1656 }
 0x2bf   : > { %2559 = vmatprep.subr.bf16.mxu1 %v2868_v20  ;;  %v1731_v35 = vmul.f32 %v1662_v15, %v1619_v11  ;;  %vm1754_vm3 = vcmp.eq.s32.totalorder %v1747_v28, %v2376_v6 }
 0x2c0   : > { %v1730_v12 = vmul.f32 %v1657_v25, %v1618_v18  ;;  %v1652_v3 = vpop.permute.xlu0 %1651  ;;  %vm2379_vm5 = vmpackc.low %vm1754_vm3, %vm1753_vm2 }
 0x2c1   : > { %v1763_v27 = vpack.c.bf16 %v1732_v16, %v1731_v35 }
 0x2c2   : > { %2560 = vmatpush3.bf16.msra.mxu1 %v1766_v37  ;;  %v2796_v23 = vpop.eup %2795 }
 0x2c3   : > { %2561 = vmatprep.subr.bf16.mxu1 %v2868_v20  ;;  %v1617_v21 = vmul.f32 %v2796_v23, %v3305_v33  ;;  %v2870_v33 = vmov 1.0|1.0  }
 0x2c5   : > { %v1729_v29 = vmul.f32 %v1652_v3, %v1617_v21 }
 0x2c6   : > { %2562 = vmatpush3.bf16.msra.mxu1 %v1765_v1 }
 0x2c7   : > { %2563 = vmatprep.subr.bf16.mxu1 %v2868_v20  ;;  %v1762_v26 = vpack.c.bf16 %v1730_v12, %v1729_v29 }
 0x2ca   : > { %2564 = vmatpush3.bf16.msra.mxu1 %v1764_v22 }
 0x2cb   : > { %2565 = vmatprep.subr.bf16.mxu1 %v2868_v20 }
 0x2ce   : > { %2566 = vmatpush3.bf16.msra.mxu1 %v1763_v27 }
 0x2cf   : > { %2567 = vmatprep.subr.bf16.mxu1 %v2868_v20 }
 0x2d2   : > { %2568 = vmatpush3.bf16.msra.mxu1 %v1762_v26 }
 0x2d5   : > { %2570 = vmatmul.mubr.msk.bf16.vlgmr.msra.gmra.mxu1 %vm2379_vm5, %v2870_v33 }
 0x395   : > { %v1804_v30 = vpop.f32.mrf.mxu1 }
 0x396   : > { %v1811_v31 = vadd.f32 %v1804_v30, %v1760_v58 }
 0x397   : > { %v2571_v32 = vpop.f32.mrf.mxu1 }
 0x398   : > { %1813 = vst [vmem:[#allocation2] sm:$0xff] %v1811_v31  ;;  %1818 = sbr.rel (%p2381_p6) target bundleno = 1396 (0x574), region = 92 }
 0x399   : > { %v1807_v52 = vpop.f32.mrf.mxu1 }
 0x39a   : > { %v1812_v62 = vadd.f32 %v1807_v52, %v1761_v59 }
 0x39b   : > { %v2572_v34 = vpop.f32.mrf.mxu1 }
 0x39c   : > { %1814 = vst [vmem:[#allocation2 + $0x8] sm:$0xff] %v1812_v62 }
 0x39d   : > { %v2797_v20 = vld [vmem:[%s3476_s12 + $0x38] sm:$0xff]   ;;  %v2871_v47 = vmov 0.0   ;;  %v2799_v36 = vld [vmem:[%s3476_s12 + $0x30] sm:$0xff]   ;;  %vm2872_vm6 = vmmov 0   ;;  %v2801_v5 = vld [vmem:[%s3476_s12 + $0x28] sm:$0xff]  }
 0x39e   : > { %2573 = vmatprep.subr.bf16.mxu0 %v2871_v47  ;;  %2593 = vmatprep.subr.bf16.mxu1 %v2871_v47  ;;  %v2798_v10 = vld [vmem:[%s3475_s11 + $0x38] sm:$0xff]   ;;  %v2800_v13 = vld [vmem:[%s3475_s11 + $0x30] sm:$0xff]   ;;  %v2802_v38 = vld [vmem:[%s3475_s11 + $0x28] sm:$0xff]  }
 0x39f   : > { %2574 = vmatpush3.bf16.msra.mxu0 %v2797_v20  ;;  %2589 = vmatprep.mubr.msk.bf16.mxu0 %vm2872_vm6, %v2871_v47  ;;  %v2803_v0 = vld [vmem:[%s3476_s12 + $0x20] sm:$0xff]   ;;  %v2805_v40 = vld [vmem:[%s3476_s12 + $0x18] sm:$0xff]   ;;  %v2807_v55 = vld [vmem:[%s3476_s12 + $0x10] sm:$0xff]  }
 0x3a0   : > { %2594 = vmatpush3.bf16.msra.mxu1 %v2798_v10  ;;  %2575 = vmatprep.subr.bf16.mxu0 %v2871_v47  ;;  %v2804_v60 = vld [vmem:[%s3475_s11 + $0x20] sm:$0xff]   ;;  %v2806_v19 = vld [vmem:[%s3475_s11 + $0x18] sm:$0xff]   ;;  %v2808_v50 = vld [vmem:[%s3475_s11 + $0x10] sm:$0xff]  }
 0x3a1   : > { %2595 = vmatprep.subr.bf16.mxu1 %v2871_v47  ;;  %2609 = vmatprep.mubr.msk.bf16.mxu1 %vm2872_vm6, %v2871_v47  ;;  %v2809_v41 = vld [vmem:[%s3476_s12 + $0x8] sm:$0xff]   ;;  %v2811_v43 = vld [vmem:[%s3476_s12] sm:$0xff]   ;;  %v2814_v2 = vld [vmem:[%s3490_s24 + $0x38] sm:$0xff]  }
 0x3a2   : > { %v2810_v42 = vld [vmem:[%s3475_s11 + $0x8] sm:$0xff]   ;;  %v1819_v57 = vld [vmem:[#allocation2] sm:$0xff]  ;;  %v2815_v51 = vld [vmem:[%s3490_s24 + $0x30] sm:$0xff]  }
 0x3a3   : > { %2576 = vmatpush3.bf16.msra.mxu0 %v2799_v36  ;;  %v1820_v44 = vld [vmem:[#allocation2 + $0x8] sm:$0xff]  ;;  %v2812_v45 = vld [vmem:[%s3475_s11] sm:$0xff]   ;;  %v2818_v9 = vld [vmem:[%s3490_s24 + $0x18] sm:$0xff]  }
 0x3a4   : > { %2596 = vmatpush3.bf16.msra.mxu1 %v2800_v13  ;;  %2577 = vmatprep.subr.bf16.mxu0 %v2871_v47  ;;  %v1821_v48 = vpack.c.bf16 %v1820_v44, %v1819_v57  ;;  %v2813_v49 = vld [vmem:[%s3474_s10] sm:$0xff]   ;;  %v2816_v46 = vld [vmem:[%s3490_s24 + $0x28] sm:$0xff]   ;;  %v2819_v54 = vld [vmem:[%s3490_s24 + $0x10] sm:$0xff]  }
 0x3a5   : > { %2597 = vmatprep.subr.bf16.mxu1 %v2871_v47  ;;  %v2817_v53 = vld [vmem:[%s3490_s24 + $0x20] sm:$0xff]   ;;  %v2820_v37 = vld [vmem:[%s3490_s24 + $0x8] sm:$0xff]  }
 0x3a6   : > { %v2821_v56 = vld [vmem:[%s3490_s24] sm:$0xff]  }
 0x3a7   : > { %2578 = vmatpush3.bf16.msra.mxu0 %v2801_v5  ;;  %v2399_v63 = vld [vmem:[%s3491_s30] ss:$0 sm:$0xff] }
 0x3a8   : > { %2598 = vmatpush3.bf16.msra.mxu1 %v2802_v38  ;;  %2579 = vmatprep.subr.bf16.mxu0 %v2871_v47  ;;  %v2402_v29 = vld [vmem:[%s3492_s17] ss:$0 sm:$0xff] }
 0x3a9   : > { %2599 = vmatprep.subr.bf16.mxu1 %v2871_v47 }
 0x3ab   : > { %2580 = vmatpush3.bf16.msra.mxu0 %v2803_v0 }
 0x3ac   : > { %2600 = vmatpush3.bf16.msra.mxu1 %v2804_v60  ;;  %2581 = vmatprep.subr.bf16.mxu0 %v2871_v47 }
 0x3ad   : > { %2601 = vmatprep.subr.bf16.mxu1 %v2871_v47 }
 0x3af   : > { %2582 = vmatpush3.bf16.msra.mxu0 %v2805_v40 }
 0x3b0   : > { %2602 = vmatpush3.bf16.msra.mxu1 %v2806_v19  ;;  %2583 = vmatprep.subr.bf16.mxu0 %v2871_v47 }
 0x3b1   : > { %2603 = vmatprep.subr.bf16.mxu1 %v2871_v47 }
 0x3b3   : > { %2584 = vmatpush3.bf16.msra.mxu0 %v2807_v55 }
 0x3b4   : > { %2604 = vmatpush3.bf16.msra.mxu1 %v2808_v50  ;;  %2585 = vmatprep.subr.bf16.mxu0 %v2871_v47 }
 0x3b5   : > { %2605 = vmatprep.subr.bf16.mxu1 %v2871_v47 }
 0x3b7   : > { %2586 = vmatpush3.bf16.msra.mxu0 %v2809_v41 }
 0x3b8   : > { %2606 = vmatpush3.bf16.msra.mxu1 %v2810_v42  ;;  %2587 = vmatprep.subr.bf16.mxu0 %v2871_v47 }
 0x3b9   : > { %2607 = vmatprep.subr.bf16.mxu1 %v2871_v47 }
 0x3bb   : > { %2588 = vmatpush3.bf16.msra.mxu0 %v2811_v43 }
 0x3bc   : > { %2608 = vmatpush3.bf16.msra.mxu1 %v2812_v45  ;;  %2613 = vmatprep.subr.bf16.mxu0 %v2871_v47 }
 0x3be   : > { %2590 = vmatmul.mubr.bf16.vlgmr.msra.gmra.mxu0 %v1821_v48 }
 0x3bf   : > { %2610 = vmatmul.mubr.bf16.vlgmr.msra.gmra.mxu1 %v2813_v49  ;;  %2629 = vmatprep.mubr.msk.bf16.mxu0 %vm2872_vm6, %v2871_v47 }
 0x3c0   : > { %2614 = vmatpush3.bf16.msra.mxu0 %v2814_v2 }
 0x3c1   : > { %2615 = vmatprep.subr.bf16.mxu0 %v2871_v47 }
 0x3c4   : > { %2616 = vmatpush3.bf16.msra.mxu0 %v2815_v51 }
 0x3c5   : > { %2617 = vmatprep.subr.bf16.mxu0 %v2871_v47 }
 0x3c8   : > { %2618 = vmatpush3.bf16.msra.mxu0 %v2816_v46 }
 0x3c9   : > { %2619 = vmatprep.subr.bf16.mxu0 %v2871_v47 }
 0x3cc   : > { %2620 = vmatpush3.bf16.msra.mxu0 %v2817_v53 }
 0x3cd   : > { %2621 = vmatprep.subr.bf16.mxu0 %v2871_v47 }
 0x3d0   : > { %2622 = vmatpush3.bf16.msra.mxu0 %v2818_v9 }
 0x3d1   : > { %2623 = vmatprep.subr.bf16.mxu0 %v2871_v47 }
 0x3d4   : > { %2624 = vmatpush3.bf16.msra.mxu0 %v2819_v54 }
 0x3d5   : > { %2625 = vmatprep.subr.bf16.mxu0 %v2871_v47 }
 0x3d8   : > { %2626 = vmatpush3.bf16.msra.mxu0 %v2820_v37 }
 0x3d9   : > { %2627 = vmatprep.subr.bf16.mxu0 %v2871_v47 }
 0x3dc   : > { %2628 = vmatpush3.bf16.msra.mxu0 %v2821_v56 }
 0x47e   : > { %v1938_v61 = vpop.f32.mrf.mxu0 }
 0x47f   : > { %v2033_v39 = vpop.f32.mrf.mxu1 }
 0x480   : > { %v2034_v17 = vadd.f32 %v2033_v39, %v1938_v61  ;;  %v2591_v1 = vpop.f32.mrf.mxu0 }
 0x481   : > { %v2611_v4 = vpop.f32.mrf.mxu1 }
 0x482   : > { %v2047_v7 = vadd.f32 %v2399_v63, %v2034_v17  ;;  %v1941_v8 = vpop.f32.mrf.mxu0 }
 0x483   : > { %v2036_v11 = vpop.f32.mrf.mxu1 }
 0x484   : > { %v2400_v14 = vmul.f32 -1.442695, %v2047_v7  ;;  %v2037_v23 = vadd.f32 %v2036_v11, %v1941_v8  ;;  %v2592_v15 = vpop.f32.mrf.mxu0 }
 0x485   : > { %v2612_v24 = vpop.f32.mrf.mxu1 }
 0x486   : > { %2822 = vpow2.f32 %v2400_v14  ;;  %v2048_v16 = vadd.f32 %v2399_v63, %v2037_v23 }
 0x488   : > { %v2401_v18 = vmul.f32 -1.442695, %v2048_v16 }
 0x48a   : > { %2824 = vpow2.f32 %v2401_v18 }
 0x493   : > { %v2823_v22 = vpop.eup %2822 }
 0x494   : > { %v2055_v35 = vadd.f32 1.0, %v2823_v22 }
 0x496   : > { %2826 = vrcp.f32 %v2055_v35 }
 0x497   : > { %v2825_v21 = vpop.eup %2824 }
 0x498   : > { %v2056_v25 = vadd.f32 1.0, %v2825_v21 }
 0x49a   : > { %2828 = vrcp.f32 %v2056_v25 }
 0x4a3   : > { %v2827_v28 = vpop.eup %2826 }
 0x4a4   : > { %v2061_v12 = vmul.f32 %v2827_v28, %v2047_v7 }
 0x4a7   : > { %v2829_v27 = vpop.eup %2828 }
 0x4a8   : > { %v2062_v6 = vmul.f32 %v2829_v27, %v2048_v16 }
 0x4aa   : > { %v2063_v3 = vpack.c.bf16 %v2062_v6, %v2061_v12 }
 0x4ac   : > { %2630 = vmatmul.mubr.bf16.vlgmr.msra.gmra.mxu0 %v2063_v3 }
 0x56c   : > { %v2169_v26 = vpop.f32.mrf.mxu0 }
 0x56d   : > { %v2170_v33 = vadd.f32 %v2402_v29, %v2169_v26 }
 0x56e   : > { %v2631_v58 = vpop.f32.mrf.mxu0 }
 0x56f   : > { %2176 = vst [vmem:[#allocation3] sm:$0xff] %v2170_v33 }
 0x570   : > { %v2172_v30 = vpop.f32.mrf.mxu0 }
 0x571   : > { %v2173_v31 = vadd.f32 %v2402_v29, %v2172_v30 }
 0x572   : > { %v2632_v32 = vpop.f32.mrf.mxu0 }
 0x573   : > { %2177 = vst [vmem:[#allocation3 + $0x8] sm:$0xff] %v2173_v31 }
 0x574 PF: > { %p2637_p7 = scmp.eq.s32.totalorder %s2967_s22, 1  ;;  %s2873_s18 = smov [#allocation3]  }
 0x575   : > { %s2184_s19 = sshll.u32 %s2873_s18, 4  ;;  %s2185_s19 = int_to_ptr.vmem [resolvable:$true] %s2184_s19 }
 0x576   : > { %s2830_s20 = scalar_lea.vmem %s2185_s19, 256  ;;  %p2837_p11 = scmp.lt.s32.totalorder %s2185_s19, %s2185_s19 }
 0x577   : > { %p2831_p8 = scmp.ne.s32.totalorder %s2185_s19, %s2830_s20  ;;  %p2838_p12 = scmp.lt.s32.totalorder %s2830_s20, %s2830_s20 }
 0x579   : > { %p2832_p9 = pnand %p2831_p8, %p2637_p7  ;;  %p2839_p13 = por %p2838_p12, %p2837_p11 }
 0x57b   : > { %p2833_p10 = pneg %p2832_p9 }
 0x57d   : > { %p2840_p0 = pnand %p2839_p13, %p2833_p10 }
 0x57f   : > { %2843 = shalt.err (!%p2840_p0)
}
 0x580   : > { %s2874_s25 = smov 128   ;;  %s2875_s13 = smov 8  }
 0x581   : > { %s3493_s21 = sld [smem:[#allocation11_spill]] }
 0x587   : > { %2634 = dma.vmem_to_hbm [thread:$0]  (%p2637_p7), %s2185_s19, 256, %s3493_s21, [#allocation4], %s2874_s25, %s2874_s25, %s2875_s13  }
 0x588   : > { %2859 = dma.done.wait (%p2637_p7), [#allocation4], 256  }
 0x589   : > { %2861 = vsyncadd (%p2637_p7), [#allocation4], 4294967040 }
 0x58a PF: > { %s3494_s15 = sld [smem:[#allocation6_spill]] }
 0x590   : > { %s27_s21 = sadd.s32 1, %s3494_s15  }
 0x591   : > { %p24_p1 = scmp.ge.s32.totalorder %s27_s21, 4  }
 0x593   :  { %26 = sbr.rel (!%p24_p1) target bundleno = 7 (0x7), region = 131 }
 0x598   :  { %2200 = vsyncpa [#allocation4], 1 }
 0x599   :  { %2202 = vsyncpa [#allocation4 + $0x1], 1 }

// kernel: tpu_custom_call.1
= control target key start
LH: loop header
LB: loop body
LE: loop exit
PB: predicated region body
PF: predicated region fallthrough
CT: control target
= control target key end

     0   :  { %s3464_s0 = inlined_call_operand.vmem [shape: s32[256,1], index: 0, kind: input, shape index: {}]   ;;  %s3465_s1 = inlined_call_operand.vmem [shape: s32[256,1], index: 1, kind: input, shape index: {}]   ;;  %s3466_s2 = inlined_call_operand.vmem [shape: f32[256,1], index: 2, kind: input, shape index: {}]   ;;  %s3467_s3 = inlined_call_operand.vmem [shape: f32[256,1], index: 3, kind: input, shape index: {}]   ;;  %s3468_s4 = inlined_call_operand.vmem [shape: s32[1,256], index: 4, kind: input, shape index: {}]   ;;  %s3469_s5 = inlined_call_operand.vmem [shape: bf16[16,128], index: 5, kind: input, shape index: {}]   ;;  %s3470_s6 = inlined_call_operand.vmem [shape: bf16[16,128], index: 6, kind: input, shape index: {}]   ;;  %s3471_s7 = inlined_call_operand.vmem [shape: f32[1,128], index: 7, kind: input, shape index: {}]   ;;  %s3472_s8 = inlined_call_operand.vmem [shape: bf16[128,128], index: 8, kind: input, shape index: {}]   ;;  %s3473_s9 = inlined_call_operand.vmem [shape: f32[1,128], index: 9, kind: input, shape index: {}]   ;;  %s3474_s10 = inlined_call_operand.vmem [shape: bf16[16,128], index: 10, kind: input, shape index: {}]   ;;  %s3475_s11 = inlined_call_operand.vmem [shape: bf16[128,128], index: 11, kind: input, shape index: {}]   ;;  %s3476_s12 = inlined_call_operand.vmem [shape: bf16[128,128], index: 12, kind: input, shape index: {}]   ;;  %s3477_s13 = inlined_call_operand.vmem [shape: f32[1,128], index: 13, kind: input, shape index: {}]   ;;  %s3478_s14 = inlined_call_operand.vmem [shape: bf16[128,128], index: 14, kind: input, shape index: {}]   ;;  %s3479_s15 = inlined_call_operand.vmem [shape: f32[1,128], index: 15, kind: input, shape index: {}]   ;;  %s3480_s16 = inlined_call_operand.hbm [shape: f32[16,128], index: 16, kind: output, shape index: {}]  }
   0x1   :  { %3483 = sst [smem:[#allocation7_spill]] %s3464_s0 }
   0x2   :  { %3484 = sst [smem:[#allocation8_spill]] %s3477_s13 }
   0x3   :  { %3485 = sst [smem:[#allocation9_spill]] %s3478_s14 }
   0x4   :  { %3486 = sst [smem:[#allocation10_spill]] %s3479_s15 }
   0x5   :  { %3487 = sst [smem:[#allocation11_spill]] %s3480_s16 }
   0x6   :  { %21 = vsyncpa [#allocation4], 0  ;;  %s2961_s21 = smov 0  }
   0x7 LB: > { %3488 = sst [smem:[#allocation6_spill]] %s2864_s21  ;;  %s2967_s22 = sadd.s32 4294967295, %s2864_s21   ;;  %s2864_s21 = sphi %s2961_s21, %s27_s21  }
   0x8   : > { %p2274_p0 = scmp.ge.s32.totalorder %s2864_s21, 1  ;;  %p500_p1 = scmp.lt.s32.totalorder %s2864_s21, 3 }
   0xa   : > { %p501_p2 = pnand %p2274_p0, %p500_p1 }
   0xb   : > { %s2275_s23 = sshll.u32 (!%p501_p2), %s2967_s22, 4  ;;  %p587_p3 = scmp.lt.s32.totalorder (!%p501_p2), %s2967_s22, 1 }
   0xc   : > { %504 = sbr.rel (%p501_p2) target bundleno = 1418 (0x58a), region = 84  ;;  %p564_p4 = scmp.lt.s32.totalorder (!%p501_p2), %s2275_s23, 31 }
   0xd   : > { %s3489_s0 = sld [smem:[#allocation7_spill]] (!%p501_p2)  ;;  %p2283_p5 = scmp.ne.s32.totalorder (!%p501_p2), %s2967_s22, 0 }
  0x11   : > { %s2974_s24 = scalar_select %p587_p3, %s2967_s22, 1 }
  0x12   : > { %s3496_s23 = smov (!%p564_p4, %s2275_s23), 31  ;;  %594 = sbr.rel (%p2283_p5) target bundleno = 25 (0x19), region = 88 }
  0x13   : > { %s589_s27 = scalar_lea.vmem %s3468_s4, %s2974_s24  ;;  %s2276_s28 = sshll.u32 %s3496_s23, 3 }
  0x14   : > { %s2983_s17 = scalar_lea.vmem %s3489_s0, %s2276_s28  ;;  %s2988_s20 = scalar_lea.vmem %s3465_s1, %s2276_s28 }
  0x15   : > { %s2993_s15 = scalar_lea.vmem %s3466_s2, %s2276_s28  ;;  %s2998_s25 = scalar_lea.vmem %s3467_s3, %s2276_s28 }
  0x17   : > { %v2866_v0 = vmov 0.0  }
  0x18   : > { %595 = vst [vmem:[#allocation2] sm:$0xff] %v2866_v0  ;;  %596 = vst [vmem:[#allocation2 + $0x8] sm:$0xff] %v2866_v0 }
  0x19 PF: > { %v719_v1 = vld [vmem:[%s2988_s20] sm:$0xff]  ;;  %v2867_v3 = vmov 0   ;;  %v720_v4 = vld [vmem:[%s2988_s20 + $0x8] sm:$0xff]  ;;  %v602_v6 = vld [vmem:[%s2983_s17 + $0x18] sm:$0xff]  ;;  %v2868_v20 = vmov 0.0   ;;  %vm849_vm4 = vcmask 130048  }
  0x1a   : > { %v599_v2 = vld [vmem:[%s2983_s17] sm:$0xff]  ;;  %2658 = vset.pattern.permute.xlu1 %v2867_v3  ;;  %2657 = vset.pattern.permute.xlu0 %v2867_v3  ;;  %v600_v5 = vld [vmem:[%s2983_s17 + $0x8] sm:$0xff]  ;;  %v601_v7 = vld [vmem:[%s2983_s17 + $0x10] sm:$0xff]  ;;  %v597_v3 = vlaneseq  ;;  %p2381_p6 = scmp.ne.s32.totalorder %s2967_s22, 1 }
  0x1b   : > { %736 = vperm.xlu1 %2658, %v719_v1   ;;  %616 = vperm.xlu0 %2657, %v599_v2   ;;  %v722_v8 = vld [vmem:[%s2988_s20 + $0x18] sm:$0xff]  ;;  %v721_v9 = vld [vmem:[%s2988_s20 + $0x10] sm:$0xff]  ;;  %v604_v10 = vld [vmem:[%s2983_s17 + $0x28] sm:$0xff]  ;;  %s3490_s24 = sld [smem:[#allocation9_spill]] (!%p2381_p6) }
  0x1c   : > { %v603_v11 = vld [vmem:[%s2983_s17 + $0x20] sm:$0xff]  ;;  %v724_v12 = vld [vmem:[%s2988_s20 + $0x28] sm:$0xff]  ;;  %v606_v14 = vld [vmem:[%s2983_s17 + $0x38] sm:$0xff]  ;;  %s3491_s30 = sld [smem:[#allocation8_spill]] (!%p2381_p6) }
  0x1d   : > { %v723_v13 = vld [vmem:[%s2988_s20 + $0x20] sm:$0xff]  ;;  %v605_v15 = vld [vmem:[%s2983_s17 + $0x30] sm:$0xff]  ;;  %v726_v18 = vld [vmem:[%s2988_s20 + $0x38] sm:$0xff] }
  0x1e   : > { %v2659_v16 = vld [vmem:[%s3469_s5] sm:$0xff]   ;;  %v725_v19 = vld [vmem:[%s2988_s20 + $0x30] sm:$0xff]  ;;  %v608_v21 = vld [vmem:[%s2983_s17 + $0x48] sm:$0xff] }
  0x1f   : > { %739 = vperm.xlu1 %2658, %v720_v4   ;;  %619 = vperm.xlu0 %2657, %v600_v5   ;;  %v2660_v17 = vld [vmem:[%s3470_s6] sm:$0xff]   ;;  %v728_v23 = vld [vmem:[%s2988_s20 + $0x48] sm:$0xff]  ;;  %v610_v25 = vld [vmem:[%s2983_s17 + $0x58] sm:$0xff] }
  0x20   : > { %2503 = vmatprep.subr.bf16.mxu1 %v2659_v16  ;;  %2485 = vmatprep.subr.bf16.mxu0 %v2660_v17  ;;  %v607_v22 = vld [vmem:[%s2983_s17 + $0x40] sm:$0xff]  ;;  %v609_v26 = vld [vmem:[%s2983_s17 + $0x50] sm:$0xff]  ;;  %v730_v27 = vld [vmem:[%s2988_s20 + $0x58] sm:$0xff] }
  0x21   : > { %2504 = vmatpush3.bf16.msra.mxu1 %v2659_v16  ;;  %2486 = vmatpush3.bf16.msra.mxu0 %v2660_v17  ;;  %v727_v24 = vld [vmem:[%s2988_s20 + $0x40] sm:$0xff]  ;;  %v729_v28 = vld [vmem:[%s2988_s20 + $0x50] sm:$0xff]  ;;  %v612_v29 = vld [vmem:[%s2983_s17 + $0x68] sm:$0xff] }
  0x22   : > { %2553 = vmatprep.subr.bf16.mxu1 %v2868_v20  ;;  %v611_v30 = vld [vmem:[%s2983_s17 + $0x60] sm:$0xff]  ;;  %v732_v31 = vld [vmem:[%s2988_s20 + $0x68] sm:$0xff]  ;;  %v614_v33 = vld [vmem:[%s2983_s17 + $0x78] sm:$0xff] }
  0x23   : > { %625 = vperm.xlu1 %2658, %v602_v6   ;;  %622 = vperm.xlu0 %2657, %v601_v7   ;;  %v731_v32 = vld [vmem:[%s2988_s20 + $0x60] sm:$0xff]  ;;  %v613_v34 = vld [vmem:[%s2983_s17 + $0x70] sm:$0xff]  ;;  %v734_v35 = vld [vmem:[%s2988_s20 + $0x78] sm:$0xff]  ;;  %v3073_v6 = vand.u32 127, %v597_v3  ;;  %s3492_s17 = sld [smem:[#allocation10_spill]] (!%p2381_p6) }
  0x24   : > { %v733_v36 = vld [vmem:[%s2988_s20 + $0x70] sm:$0xff]  ;;  %v1099_v37 = vld [vmem:[%s2993_s15 + $0x8] sm:$0xff]  ;;  %v1098_v38 = vld [vmem:[%s2993_s15] sm:$0xff] }
  0x25   : > { %v1101_v39 = vld [vmem:[%s2993_s15 + $0x18] sm:$0xff]  ;;  %v1100_v40 = vld [vmem:[%s2993_s15 + $0x10] sm:$0xff]  ;;  %v1103_v41 = vld [vmem:[%s2993_s15 + $0x28] sm:$0xff] }
  0x26   : > { %v1102_v42 = vld [vmem:[%s2993_s15 + $0x20] sm:$0xff]  ;;  %v1105_v43 = vld [vmem:[%s2993_s15 + $0x38] sm:$0xff]  ;;  %v1104_v44 = vld [vmem:[%s2993_s15 + $0x30] sm:$0xff] }
  0x27   : > { %745 = vperm.xlu1 %2658, %v722_v8   ;;  %742 = vperm.xlu0 %2657, %v721_v9   ;;  %v1107_v45 = vld [vmem:[%s2993_s15 + $0x48] sm:$0xff]  ;;  %v1106_v46 = vld [vmem:[%s2993_s15 + $0x40] sm:$0xff]  ;;  %v1109_v47 = vld [vmem:[%s2993_s15 + $0x58] sm:$0xff] }
  0x28   : > { %v1108_v48 = vld [vmem:[%s2993_s15 + $0x50] sm:$0xff]  ;;  %v1111_v49 = vld [vmem:[%s2993_s15 + $0x68] sm:$0xff]  ;;  %v1110_v50 = vld [vmem:[%s2993_s15 + $0x60] sm:$0xff] }
  0x29   : > { %v1113_v51 = vld [vmem:[%s2993_s15 + $0x78] sm:$0xff]  ;;  %v1112_v52 = vld [vmem:[%s2993_s15 + $0x70] sm:$0xff]  ;;  %v1646_v55 = vld [vmem:[%s2998_s25 + $0x68] sm:$0xff] }
  0x2a   : > { %v1648_v53 = vld [vmem:[%s2998_s25 + $0x78] sm:$0xff]  ;;  %v1647_v54 = vld [vmem:[%s2998_s25 + $0x70] sm:$0xff]  ;;  %v1645_v56 = vld [vmem:[%s2998_s25 + $0x60] sm:$0xff] }
  0x2b   : > { %631 = vperm.xlu1 %2658, %v604_v10   ;;  %628 = vperm.xlu0 %2657, %v603_v11   ;;  %v1644_v57 = vld [vmem:[%s2998_s25 + $0x58] sm:$0xff]  ;;  %v1643_v58 = vld [vmem:[%s2998_s25 + $0x50] sm:$0xff]  ;;  %v1642_v59 = vld [vmem:[%s2998_s25 + $0x48] sm:$0xff] }
  0x2c   : > { %v1641_v60 = vld [vmem:[%s2998_s25 + $0x40] sm:$0xff]  ;;  %v1640_v61 = vld [vmem:[%s2998_s25 + $0x38] sm:$0xff]  ;;  %v1639_v62 = vld [vmem:[%s2998_s25 + $0x30] sm:$0xff] }
  0x2d   : > { %v1638_v63 = vld [vmem:[%s2998_s25 + $0x28] sm:$0xff]  ;;  %v1637_v0 = vld [vmem:[%s2998_s25 + $0x20] sm:$0xff]  ;;  %v1636_v1 = vld [vmem:[%s2998_s25 + $0x18] sm:$0xff] }
  0x2e   : > { %v1635_v2 = vld [vmem:[%s2998_s25 + $0x10] sm:$0xff]  ;;  %v1634_v4 = vld [vmem:[%s2998_s25 + $0x8] sm:$0xff]  ;;  %v1633_v5 = vld [vmem:[%s2998_s25] sm:$0xff] }
  0x2f   : > { %751 = vperm.xlu1 %2658, %v724_v12   ;;  %748 = vperm.xlu0 %2657, %v723_v13  }
  0x33   : > { %637 = vperm.xlu1 %2658, %v606_v14   ;;  %634 = vperm.xlu0 %2657, %v605_v15  }
  0x37   : > { %757 = vperm.xlu1 %2658, %v726_v18   ;;  %754 = vperm.xlu0 %2657, %v725_v19  }
  0x3b   : > { %643 = vperm.xlu1 %2658, %v608_v21   ;;  %640 = vperm.xlu0 %2657, %v607_v22  }
  0x3f   : > { %763 = vperm.xlu1 %2658, %v728_v23   ;;  %760 = vperm.xlu0 %2657, %v727_v24  }
  0x43   : > { %649 = vperm.xlu1 %2658, %v610_v25   ;;  %646 = vperm.xlu0 %2657, %v609_v26  }
  0x47   : > { %769 = vperm.xlu1 %2658, %v730_v27   ;;  %766 = vperm.xlu0 %2657, %v729_v28  }
  0x4b   : > { %655 = vperm.xlu1 %2658, %v612_v29   ;;  %652 = vperm.xlu0 %2657, %v611_v30  }
  0x4f   : > { %775 = vperm.xlu1 %2658, %v732_v31   ;;  %772 = vperm.xlu0 %2657, %v731_v32  }
  0x53   : > { %661 = vperm.xlu1 %2658, %v614_v33   ;;  %658 = vperm.xlu0 %2657, %v613_v34  }
  0x57   : > { %781 = vperm.xlu1 %2658, %v734_v35   ;;  %778 = vperm.xlu0 %2657, %v733_v36  }
  0x5b   : > { %1122 = vperm.xlu1 %2658, %v1099_v37   ;;  %1117 = vperm.xlu0 %2657, %v1098_v38  }
  0x5f   : > { %1132 = vperm.xlu1 %2658, %v1101_v39   ;;  %1127 = vperm.xlu0 %2657, %v1100_v40  }
  0x63   : > { %1142 = vperm.xlu1 %2658, %v1103_v41   ;;  %1137 = vperm.xlu0 %2657, %v1102_v42  }
  0x67   : > { %1152 = vperm.xlu1 %2658, %v1105_v43   ;;  %1147 = vperm.xlu0 %2657, %v1104_v44  }
  0x6b   : > { %1162 = vperm.xlu1 %2658, %v1107_v45   ;;  %1157 = vperm.xlu0 %2657, %v1106_v46  }
  0x6f   : > { %1172 = vperm.xlu1 %2658, %v1109_v47   ;;  %1167 = vperm.xlu0 %2657, %v1108_v48  }
  0x73   : > { %1182 = vperm.xlu1 %2658, %v1111_v49   ;;  %1177 = vperm.xlu0 %2657, %v1110_v50  }
  0x77   : > { %1192 = vperm.xlu1 %2658, %v1113_v51   ;;  %1187 = vperm.xlu0 %2657, %v1112_v52  }
  0x7b   : > { %1726 = vperm.xlu1 %2658, %v1648_v53   ;;  %1721 = vperm.xlu0 %2657, %v1647_v54  }
  0x7f   : > { %1716 = vperm.xlu1 %2658, %v1646_v55   ;;  %1711 = vperm.xlu0 %2657, %v1645_v56  }
  0x83   : > { %1706 = vperm.xlu1 %2658, %v1644_v57   ;;  %1701 = vperm.xlu0 %2657, %v1643_v58  }
  0x87   : > { %1696 = vperm.xlu1 %2658, %v1642_v59   ;;  %1691 = vperm.xlu0 %2657, %v1641_v60  }
  0x8b   : > { %1686 = vperm.xlu1 %2658, %v1640_v61   ;;  %1681 = vperm.xlu0 %2657, %v1639_v62  }
  0x8f   : > { %1676 = vperm.xlu1 %2658, %v1638_v63   ;;  %1671 = vperm.xlu0 %2657, %v1637_v0  }
  0x93   : > { %1666 = vperm.xlu1 %2658, %v1636_v1   ;;  %1661 = vperm.xlu0 %2657, %v1635_v2  }
  0x96   : > { %v737_v7 = vpop.permute.xlu1 %736  ;;  %v617_v8 = vpop.permute.xlu0 %616 }
  0x97   : > { %1656 = vperm.xlu1 %2658, %v1634_v4   ;;  %1651 = vperm.xlu0 %2657, %v1633_v5   ;;  %vm783_vm0 = vcmp.eq.s32.totalorder %v3073_v6, %v737_v7  ;;  %vm663_vm1 = vcmp.eq.s32.totalorder %v3073_v6, %v617_v8 }
  0x98   : > { %v2300_v11 = vsel %vm783_vm0, 1.0, %v2868_v20  ;;  %v2284_v12 = vsel %vm663_vm1, 1.0, %v2868_v20 }
  0x9a   : > { %v740_v9 = vpop.permute.xlu1 %739  ;;  %v620_v10 = vpop.permute.xlu0 %619 }
  0x9b   : > { %vm784_vm2 = vcmp.eq.s32.totalorder %v3073_v6, %v740_v9  ;;  %vm664_vm3 = vcmp.eq.s32.totalorder %v3073_v6, %v620_v10 }
  0x9c   : > { %v2301_v13 = vsel %vm784_vm2, 1.0, %v2868_v20  ;;  %v2285_v14 = vsel %vm664_vm3, 1.0, %v2868_v20 }
  0x9d   : > { %v831_v15 = vpack.c.bf16 %v2301_v13, %v2300_v11  ;;  %v711_v16 = vpack.c.bf16 %v2285_v14, %v2284_v12 }
  0x9e   : > { %v626_v17 = vpop.permute.xlu1 %625  ;;  %v623_v18 = vpop.permute.xlu0 %622 }
  0x9f   : > { %vm666_vm5 = vcmp.eq.s32.totalorder %v3073_v6, %v626_v17  ;;  %vm665_vm6 = vcmp.eq.s32.totalorder %v3073_v6, %v623_v18  ;;  %2487 = vmatprep.mubr.msk.bf16.mxu0 %vm849_vm4, %v831_v15  ;;  %2505 = vmatprep.mubr.msk.bf16.mxu1 %vm849_vm4, %v711_v16 }
  0xa0   : > { %v2287_v19 = vsel %vm666_vm5, 1.0, %v2868_v20  ;;  %v2286_v21 = vsel %vm665_vm6, 1.0, %v2868_v20 }
  0xa1   : > { %v712_v22 = vpack.c.bf16 %v2287_v19, %v2286_v21 }
  0xa2   : > { %v746_v23 = vpop.permute.xlu1 %745  ;;  %v743_v24 = vpop.permute.xlu0 %742 }
  0xa3   : > { %vm786_vm7 = vcmp.eq.s32.totalorder %v3073_v6, %v746_v23  ;;  %vm785_vm8 = vcmp.eq.s32.totalorder %v3073_v6, %v743_v24  ;;  %2506 = vmatmul.mubr.msk.bf16.vlgmr.msra.gmra.mxu1 %vm849_vm4, %v712_v22 }
  0xa4   : > { %v2303_v25 = vsel %vm786_vm7, 1.0, %v2868_v20  ;;  %v2302_v26 = vsel %vm785_vm8, 1.0, %v2868_v20 }
  0xa5   : > { %v832_v27 = vpack.c.bf16 %v2303_v25, %v2302_v26 }
  0xa6   : > { %v632_v28 = vpop.permute.xlu1 %631  ;;  %v629_v29 = vpop.permute.xlu0 %628 }
  0xa7   : > { %vm668_vm9 = vcmp.eq.s32.totalorder %v3073_v6, %v632_v28  ;;  %vm667_vm10 = vcmp.eq.s32.totalorder %v3073_v6, %v629_v29  ;;  %2488 = vmatmul.mubr.msk.bf16.vlgmr.msra.gmra.mxu0 %vm849_vm4, %v832_v27  ;;  %v2661_v27 = vld [vmem:[%s3472_s8 + $0x38] sm:$0xff]   ;;  %v2662_v28 = vld [vmem:[%s3472_s8 + $0x30] sm:$0xff]   ;;  %v2664_v29 = vld [vmem:[%s3472_s8 + $0x20] sm:$0xff]  }
  0xa8   : > { %v2289_v30 = vsel %vm668_vm9, 1.0, %v2868_v20  ;;  %v2288_v31 = vsel %vm667_vm10, 1.0, %v2868_v20  ;;  %2521 = vmatprep.subr.bf16.mxu0 %v2661_v27 }
  0xa9   : > { %v713_v32 = vpack.c.bf16 %v2289_v30, %v2288_v31  ;;  %2522 = vmatpush3.bf16.msra.mxu0 %v2661_v27  ;;  %v2665_v30 = vld [vmem:[%s3472_s8 + $0x18] sm:$0xff]   ;;  %v2666_v31 = vld [vmem:[%s3472_s8 + $0x10] sm:$0xff]  }
  0xaa   : > { %v752_v33 = vpop.permute.xlu1 %751  ;;  %v749_v34 = vpop.permute.xlu0 %748  ;;  %2523 = vmatprep.subr.bf16.mxu0 %v2662_v28 }
  0xab   : > { %vm788_vm11 = vcmp.eq.s32.totalorder %v3073_v6, %v752_v33  ;;  %vm787_vm12 = vcmp.eq.s32.totalorder %v3073_v6, %v749_v34  ;;  %2509 = vmatprep.mubr.msk.bf16.mxu1 %vm849_vm4, %v713_v32  ;;  %v2667_v32 = vld [vmem:[%s3472_s8 + $0x8] sm:$0xff]   ;;  %v2668_v33 = vld [vmem:[%s3472_s8] sm:$0xff]  }
  0xac   : > { %v2305_v35 = vsel %vm788_vm11, 1.0, %v2868_v20  ;;  %v2304_v36 = vsel %vm787_vm12, 1.0, %v2868_v20 }
  0xad   : > { %v833_v37 = vpack.c.bf16 %v2305_v35, %v2304_v36  ;;  %2524 = vmatpush3.bf16.msra.mxu0 %v2662_v28 }
  0xae   : > { %v638_v38 = vpop.permute.xlu1 %637  ;;  %v635_v39 = vpop.permute.xlu0 %634 }
  0xaf   : > { %vm670_vm13 = vcmp.eq.s32.totalorder %v3073_v6, %v638_v38  ;;  %vm669_vm14 = vcmp.eq.s32.totalorder %v3073_v6, %v635_v39  ;;  %2491 = vmatprep.mubr.msk.bf16.mxu0 %vm849_vm4, %v833_v37  ;;  %v3182_v39 = vld [vmem:[%s3471_s7] ss:$0 sm:$0xff] }
  0xb0   : > { %v2291_v40 = vsel %vm670_vm13, 1.0, %v2868_v20  ;;  %v2290_v41 = vsel %vm669_vm14, 1.0, %v2868_v20 }
  0xb1   : > { %v714_v42 = vpack.c.bf16 %v2291_v40, %v2290_v41 }
  0xb2   : > { %v758_v43 = vpop.permute.xlu1 %757  ;;  %v755_v44 = vpop.permute.xlu0 %754 }
  0xb3   : > { %vm790_vm15 = vcmp.eq.s32.totalorder %v3073_v6, %v758_v43  ;;  %vm789_vm0 = vcmp.eq.s32.totalorder %v3073_v6, %v755_v44  ;;  %2510 = vmatmul.mubr.msk.bf16.gmra.mxu1 %vm849_vm4, %v714_v42 }
  0xb4   : > { %v2307_v45 = vsel %vm790_vm15, 1.0, %v2868_v20  ;;  %v2306_v46 = vsel %vm789_vm0, 1.0, %v2868_v20 }
  0xb5   : > { %v834_v47 = vpack.c.bf16 %v2307_v45, %v2306_v46 }
  0xb6   : > { %v644_v48 = vpop.permute.xlu1 %643  ;;  %v641_v49 = vpop.permute.xlu0 %640 }
  0xb7   : > { %vm672_vm1 = vcmp.eq.s32.totalorder %v3073_v6, %v644_v48  ;;  %vm671_vm2 = vcmp.eq.s32.totalorder %v3073_v6, %v641_v49  ;;  %2492 = vmatmul.mubr.msk.bf16.gmra.mxu0 %vm849_vm4, %v834_v47 }
  0xb8   : > { %v2293_v50 = vsel %vm672_vm1, 1.0, %v2868_v20  ;;  %v2292_v51 = vsel %vm671_vm2, 1.0, %v2868_v20 }
  0xb9   : > { %v715_v52 = vpack.c.bf16 %v2293_v50, %v2292_v51 }
  0xba   : > { %v764_v53 = vpop.permute.xlu1 %763  ;;  %v761_v54 = vpop.permute.xlu0 %760 }
  0xbb   : > { %vm792_vm3 = vcmp.eq.s32.totalorder %v3073_v6, %v764_v53  ;;  %vm791_vm5 = vcmp.eq.s32.totalorder %v3073_v6, %v761_v54  ;;  %2513 = vmatprep.mubr.msk.bf16.mxu1 %vm849_vm4, %v715_v52 }
  0xbc   : > { %v2309_v55 = vsel %vm792_vm3, 1.0, %v2868_v20  ;;  %v2308_v56 = vsel %vm791_vm5, 1.0, %v2868_v20 }
  0xbd   : > { %v835_v57 = vpack.c.bf16 %v2309_v55, %v2308_v56 }
  0xbe   : > { %v650_v58 = vpop.permute.xlu1 %649  ;;  %v647_v59 = vpop.permute.xlu0 %646 }
  0xbf   : > { %vm674_vm6 = vcmp.eq.s32.totalorder %v3073_v6, %v650_v58  ;;  %vm673_vm7 = vcmp.eq.s32.totalorder %v3073_v6, %v647_v59  ;;  %2495 = vmatprep.mubr.msk.bf16.mxu0 %vm849_vm4, %v835_v57 }
  0xc0   : > { %v2295_v60 = vsel %vm674_vm6, 1.0, %v2868_v20  ;;  %v2294_v61 = vsel %vm673_vm7, 1.0, %v2868_v20 }
  0xc1   : > { %v716_v62 = vpack.c.bf16 %v2295_v60, %v2294_v61 }
  0xc2   : > { %v770_v63 = vpop.permute.xlu1 %769  ;;  %v767_v0 = vpop.permute.xlu0 %766 }
  0xc3   : > { %vm794_vm8 = vcmp.eq.s32.totalorder %v3073_v6, %v770_v63  ;;  %vm793_vm9 = vcmp.eq.s32.totalorder %v3073_v6, %v767_v0  ;;  %2514 = vmatmul.mubr.msk.bf16.gmra.mxu1 %vm849_vm4, %v716_v62 }
  0xc4   : > { %v2311_v1 = vsel %vm794_vm8, 1.0, %v2868_v20  ;;  %v2310_v2 = vsel %vm793_vm9, 1.0, %v2868_v20 }
  0xc5   : > { %v836_v4 = vpack.c.bf16 %v2311_v1, %v2310_v2 }
  0xc6   : > { %v656_v5 = vpop.permute.xlu1 %655  ;;  %v653_v7 = vpop.permute.xlu0 %652 }
  0xc7   : > { %vm676_vm10 = vcmp.eq.s32.totalorder %v3073_v6, %v656_v5  ;;  %vm675_vm11 = vcmp.eq.s32.totalorder %v3073_v6, %v653_v7  ;;  %2496 = vmatmul.mubr.msk.bf16.gmra.mxu0 %vm849_vm4, %v836_v4 }
  0xc8   : > { %v2297_v8 = vsel %vm676_vm10, 1.0, %v2868_v20  ;;  %v2296_v9 = vsel %vm675_vm11, 1.0, %v2868_v20 }
  0xc9   : > { %v717_v10 = vpack.c.bf16 %v2297_v8, %v2296_v9 }
  0xca   : > { %v776_v11 = vpop.permute.xlu1 %775  ;;  %v773_v12 = vpop.permute.xlu0 %772 }
  0xcb   : > { %vm796_vm12 = vcmp.eq.s32.totalorder %v3073_v6, %v776_v11  ;;  %vm795_vm13 = vcmp.eq.s32.totalorder %v3073_v6, %v773_v12  ;;  %2517 = vmatprep.mubr.msk.bf16.mxu1 %vm849_vm4, %v717_v10 }
  0xcc   : > { %v2313_v13 = vsel %vm796_vm12, 1.0, %v2868_v20  ;;  %v2312_v14 = vsel %vm795_vm13, 1.0, %v2868_v20 }
  0xcd   : > { %v837_v15 = vpack.c.bf16 %v2313_v13, %v2312_v14 }
  0xce   : > { %v662_v16 = vpop.permute.xlu1 %661  ;;  %v659_v17 = vpop.permute.xlu0 %658 }
  0xcf   : > { %vm678_vm14 = vcmp.eq.s32.totalorder %v3073_v6, %v662_v16  ;;  %vm677_vm15 = vcmp.eq.s32.totalorder %v3073_v6, %v659_v17  ;;  %2499 = vmatprep.mubr.msk.bf16.mxu0 %vm849_vm4, %v837_v15 }
  0xd0   : > { %v2299_v18 = vsel %vm678_vm14, 1.0, %v2868_v20  ;;  %v2298_v19 = vsel %vm677_vm15, 1.0, %v2868_v20 }
  0xd1   : > { %v718_v21 = vpack.c.bf16 %v2299_v18, %v2298_v19 }
  0xd2   : > { %v782_v22 = vpop.permute.xlu1 %781  ;;  %v779_v23 = vpop.permute.xlu0 %778 }
  0xd3   : > { %vm798_vm0 = vcmp.eq.s32.totalorder %v3073_v6, %v782_v22  ;;  %vm797_vm1 = vcmp.eq.s32.totalorder %v3073_v6, %v779_v23  ;;  %2518 = vmatmul.mubr.msk.bf16.gmra.mxu1 %vm849_vm4, %v718_v21  ;;  %v2663_v6 = vld [vmem:[%s3472_s8 + $0x28] sm:$0xff]  }
  0xd4   : > { %v2315_v24 = vsel %vm798_vm0, 1.0, %v2868_v20  ;;  %v2314_v25 = vsel %vm797_vm1, 1.0, %v2868_v20  ;;  %2525 = vmatprep.subr.bf16.mxu0 %v2663_v6 }
  0xd5   : > { %v838_v26 = vpack.c.bf16 %v2315_v24, %v2314_v25  ;;  %2526 = vmatpush3.bf16.msra.mxu0 %v2663_v6 }
  0xd6   : > { %2527 = vmatprep.subr.bf16.mxu0 %v2664_v29  ;;  %v1118_v34 = vpop.permute.xlu0 %1117  ;;  %v1123_v35 = vpop.permute.xlu1 %1122 }
  0xd7   : > { %2500 = vmatmul.mubr.msk.bf16.gmra.mxu0 %vm849_vm4, %v838_v26  ;;  %v1201_v46 = vmul.f32 %v3182_v39, %v1118_v34  ;;  %v1202_v54 = vmul.f32 %v3182_v39, %v1123_v35  ;;  %vm2869_vm4 = vmmov 0  }
  0xd8   : > { %2569 = vmatprep.mubr.msk.bf16.mxu1 %vm2869_vm4, %v2868_v20 }
  0xd9   : > { %2528 = vmatpush3.bf16.msra.mxu0 %v2664_v29 }
  0xda   : > { %2529 = vmatprep.subr.bf16.mxu0 %v2665_v30  ;;  %v1128_v37 = vpop.permute.xlu0 %1127  ;;  %v1133_v41 = vpop.permute.xlu1 %1132 }
  0xdb   : > { %v1203_v42 = vmul.f32 %v3182_v39, %v1128_v37  ;;  %v1204_v50 = vmul.f32 %v3182_v39, %v1133_v41 }
  0xdd   : > { %2530 = vmatpush3.bf16.msra.mxu0 %v2665_v30 }
  0xde   : > { %2531 = vmatprep.subr.bf16.mxu0 %v2666_v31  ;;  %v1138_v60 = vpop.permute.xlu0 %1137  ;;  %v1143_v63 = vpop.permute.xlu1 %1142 }
  0xdf   : > { %v1205_v11 = vmul.f32 %v3182_v39, %v1138_v60  ;;  %v1206_v29 = vmul.f32 %v3182_v39, %v1143_v63 }
  0xe1   : > { %2532 = vmatpush3.bf16.msra.mxu0 %v2666_v31 }
  0xe2   : > { %2533 = vmatprep.subr.bf16.mxu0 %v2667_v32  ;;  %v1148_v2 = vpop.permute.xlu0 %1147  ;;  %v1153_v7 = vpop.permute.xlu1 %1152 }
  0xe3   : > { %v1207_v8 = vmul.f32 %v3182_v39, %v1148_v2  ;;  %v1208_v16 = vmul.f32 %v3182_v39, %v1153_v7 }
  0xe5   : > { %2534 = vmatpush3.bf16.msra.mxu0 %v2667_v32 }
  0xe6   : > { %2535 = vmatprep.subr.bf16.mxu0 %v2668_v33  ;;  %v1158_v30 = vpop.permute.xlu0 %1157  ;;  %v1163_v37 = vpop.permute.xlu1 %1162 }
  0xe9   : > { %2536 = vmatpush3.bf16.msra.mxu0 %v2668_v33 }
  0xea   : > { %v1168_v41 = vpop.permute.xlu0 %1167 }
 0x163   : > { %v2507_v36 = vpop.f32.mrf.mxu1 }
 0x165   : > { %v1035_v38 = vpop.f32.mrf.mxu1 }
 0x167   : > { %v2489_v40 = vpop.f32.mrf.mxu0  ;;  %v2508_v44 = vpop.f32.mrf.mxu1 }
 0x168   : > { %v1044_v43 = vadd.f32 %v2507_v36, %v2489_v40 }
 0x169   : > { %v908_v45 = vpop.f32.mrf.mxu0  ;;  %v1038_v55 = vpop.f32.mrf.mxu1 }
 0x16a   : > { %v3186_v47 = vadd.f32 %v1203_v42, %v1044_v43  ;;  %v1036_v48 = vadd.f32 %v1035_v38, %v908_v45 }
 0x16b   : > { %v2490_v49 = vpop.f32.mrf.mxu0 }
 0x16c   : > { %v2337_v51 = vmul.f32 -1.442695, %v3186_v47  ;;  %v3190_v52 = vadd.f32 %v1201_v46, %v1036_v48  ;;  %v1047_v53 = vadd.f32 %v2508_v44, %v2490_v49  ;;  %v1211_v44 = vmul.f32 %v3182_v39, %v1168_v41  ;;  %v1173_v46 = vpop.permute.xlu1 %1172 }
 0x16d   : > { %v911_v56 = vpop.f32.mrf.mxu0  ;;  %v1209_v49 = vmul.f32 %v3182_v39, %v1158_v30 }
 0x16e   : > { %2669 = vpow2.f32 %v2337_v51  ;;  %v2335_v57 = vmul.f32 -1.442695, %v3190_v52  ;;  %v3194_v58 = vadd.f32 %v1204_v50, %v1047_v53  ;;  %v1039_v59 = vadd.f32 %v1038_v55, %v911_v56 }
 0x170   : > { %2671 = vpow2.f32 %v2335_v57  ;;  %v2338_v61 = vmul.f32 -1.442695, %v3194_v58  ;;  %v3197_v62 = vadd.f32 %v1202_v54, %v1039_v59  ;;  %v1212_v57 = vmul.f32 %v3182_v39, %v1173_v46 }
 0x172   : > { %2673 = vpow2.f32 %v2338_v61  ;;  %v2336_v0 = vmul.f32 -1.442695, %v3197_v62 }
 0x173   : > { %v2511_v1 = vpop.f32.mrf.mxu1 }
 0x174   : > { %2675 = vpow2.f32 %v2336_v0 }
 0x175   : > { %v1051_v4 = vpop.f32.mrf.mxu1 }
 0x177   : > { %v2493_v5 = vpop.f32.mrf.mxu0  ;;  %v2512_v13 = vpop.f32.mrf.mxu1 }
 0x178   : > { %v1060_v9 = vadd.f32 %v2511_v1, %v2493_v5 }
 0x179   : > { %v924_v10 = vpop.f32.mrf.mxu0  ;;  %v1054_v27 = vpop.f32.mrf.mxu1 }
 0x17a   : > { %v3202_v12 = vadd.f32 %v1207_v8, %v1060_v9  ;;  %v1052_v14 = vadd.f32 %v1051_v4, %v924_v10  ;;  %v1210_v8 = vmul.f32 %v3182_v39, %v1163_v37  ;;  %v1178_v9 = vpop.permute.xlu0 %1177 }
 0x17b   : > { %v2670_v15 = vpop.eup %2669  ;;  %v2494_v17 = vpop.f32.mrf.mxu0 }
 0x17c   : > { %v1283_v18 = vadd.f32 1.0, %v2670_v15  ;;  %v2341_v19 = vmul.f32 -1.442695, %v3202_v12  ;;  %v3206_v21 = vadd.f32 %v1205_v11, %v1052_v14  ;;  %v1063_v22 = vadd.f32 %v2512_v13, %v2494_v17 }
 0x17d   : > { %v2672_v23 = vpop.eup %2671  ;;  %v927_v24 = vpop.f32.mrf.mxu0 }
 0x17e   : > { %2677 = vrcp.f32 %v1283_v18  ;;  %v1281_v25 = vadd.f32 1.0, %v2672_v23  ;;  %v2339_v26 = vmul.f32 -1.442695, %v3206_v21  ;;  %v3209_v28 = vadd.f32 %v1208_v16, %v1063_v22  ;;  %v1183_v23 = vpop.permute.xlu1 %1182  ;;  %v1188_v30 = vpop.permute.xlu0 %1187 }
 0x17f   : > { %v2674_v6 = vpop.eup %2673  ;;  %2679 = vpow2.f32 %v2341_v19  ;;  %v1055_v31 = vadd.f32 %v1054_v27, %v927_v24 }
 0x180   : > { %2681 = vrcp.f32 %v1281_v25  ;;  %v1284_v32 = vadd.f32 1.0, %v2674_v6  ;;  %v2342_v33 = vmul.f32 -1.442695, %v3209_v28 }
 0x181   : > { %v2676_v34 = vpop.eup %2675  ;;  %2683 = vpow2.f32 %v2339_v26  ;;  %v3213_v35 = vadd.f32 %v1206_v29, %v1055_v31 }
 0x182   : > { %2685 = vrcp.f32 %v1284_v32  ;;  %v1282_v36 = vadd.f32 1.0, %v2676_v34 }
 0x183   : > { %2687 = vpow2.f32 %v2342_v33  ;;  %v2340_v38 = vmul.f32 -1.442695, %v3213_v35  ;;  %v2515_v40 = vpop.f32.mrf.mxu1 }
 0x184   : > { %2689 = vrcp.f32 %v1282_v36  ;;  %v1213_v36 = vmul.f32 %v3182_v39, %v1178_v9 }
 0x185   : > { %2691 = vpow2.f32 %v2340_v38  ;;  %v1067_v42 = vpop.f32.mrf.mxu1 }
 0x187   : > { %v2497_v43 = vpop.f32.mrf.mxu0  ;;  %v2516_v51 = vpop.f32.mrf.mxu1 }
 0x188   : > { %v1076_v45 = vadd.f32 %v2515_v40, %v2497_v43 }
 0x189   : > { %v940_v48 = vpop.f32.mrf.mxu0  ;;  %v1070_v4 = vpop.f32.mrf.mxu1 }
 0x18a   : > { %v3218_v50 = vadd.f32 %v1211_v44, %v1076_v45  ;;  %v1068_v53 = vadd.f32 %v1067_v42, %v940_v48 }
 0x18b   : > { %v2678_v54 = vpop.eup %2677  ;;  %v2498_v55 = vpop.f32.mrf.mxu0 }
 0x18c   : > { %v2680_v56 = vpop.eup %2679  ;;  %v2345_v59 = vmul.f32 -1.442695, %v3218_v50  ;;  %v3222_v60 = vadd.f32 %v1209_v49, %v1068_v53  ;;  %v1079_v61 = vadd.f32 %v2516_v51, %v2498_v55  ;;  %v1331_v26 = vmul.f32 %v2678_v54, %v3186_v47 }
 0x18d   : > { %v2682_v63 = vpop.eup %2681  ;;  %v943_v0 = vpop.f32.mrf.mxu0  ;;  %v1287_v14 = vadd.f32 1.0, %v2680_v56 }
 0x18e   : > { %v2684_v1 = vpop.eup %2683  ;;  %2693 = vpow2.f32 %v2345_v59  ;;  %v2343_v2 = vmul.f32 -1.442695, %v3222_v60  ;;  %v3225_v5 = vadd.f32 %v1212_v57, %v1079_v61  ;;  %v1071_v11 = vadd.f32 %v1070_v4, %v943_v0 }
 0x18f   : > { %v2686_v7 = vpop.eup %2685  ;;  %v1285_v10 = vadd.f32 1.0, %v2684_v1  ;;  %v1329_v24 = vmul.f32 %v2682_v63, %v3190_v52  ;;  %v1193_v52 = vpop.permute.xlu1 %1192  ;;  %v1214_v59 = vmul.f32 %v3182_v39, %v1183_v23 }
 0x190   : > { %v2688_v13 = vpop.eup %2687  ;;  %2695 = vpow2.f32 %v2343_v2  ;;  %v2346_v15 = vmul.f32 -1.442695, %v3225_v5  ;;  %v1332_v17 = vmul.f32 %v2686_v7, %v3194_v58  ;;  %v3230_v19 = vadd.f32 %v1210_v8, %v1071_v11 }
 0x191   : > { %v2690_v16 = vpop.eup %2689  ;;  %2697 = vrcp.f32 %v1285_v10  ;;  %v1288_v18 = vadd.f32 1.0, %v2688_v13  ;;  %v1216_v42 = vmul.f32 %v3182_v39, %v1193_v52 }
 0x192   : > { %v2692_v22 = vpop.eup %2691  ;;  %v1330_v25 = vmul.f32 %v2690_v16, %v3197_v62  ;;  %2699 = vpow2.f32 %v2346_v15  ;;  %v2344_v6 = vmul.f32 -1.442695, %v3230_v19  ;;  %v1346_v31 = vpack.c.bf16 %v1332_v17, %v1331_v26 }
 0x193   : > { %2701 = vrcp.f32 %v1288_v18  ;;  %v1286_v27 = vadd.f32 1.0, %v2692_v22  ;;  %v2519_v29 = vpop.f32.mrf.mxu1  ;;  %v1215_v62 = vmul.f32 %v3182_v39, %v1188_v30 }
 0x194   : > { %2703 = vrcp.f32 %v1287_v14  ;;  %v1345_v58 = vpack.c.bf16 %v1330_v25, %v1329_v24 }
 0x195   : > { %2705 = vrcp.f32 %v1286_v27  ;;  %v1083_v32 = vpop.f32.mrf.mxu1 }
 0x196   : > { %2707 = vpow2.f32 %v2344_v6  ;;  %2537 = vmatprep.mubr.bf16.mxu0 %v1345_v58 }
 0x197   : > { %v2501_v33 = vpop.f32.mrf.mxu0  ;;  %2538 = vmatmul.mubr.bf16.vlgmr.msra.gmra.mxu0 %v1346_v31  ;;  %v2520_v38 = vpop.f32.mrf.mxu1 }
 0x198   : > { %v1092_v34 = vadd.f32 %v2519_v29, %v2501_v33 }
 0x199   : > { %v956_v47 = vpop.f32.mrf.mxu0  ;;  %v1086_v55 = vpop.f32.mrf.mxu1 }
 0x19a   : > { %v3238_v37 = vadd.f32 %v1215_v62, %v1092_v34  ;;  %v1084_v40 = vadd.f32 %v1083_v32, %v956_v47 }
 0x19b   : > { %v2694_v41 = vpop.eup %2693  ;;  %v2502_v43 = vpop.f32.mrf.mxu0 }
 0x19c   : > { %v1291_v44 = vadd.f32 1.0, %v2694_v41  ;;  %v2349_v45 = vmul.f32 -1.442695, %v3238_v37  ;;  %v3242_v46 = vadd.f32 %v1213_v36, %v1084_v40  ;;  %v1095_v48 = vadd.f32 %v2520_v38, %v2502_v43 }
 0x19d   : > { %v2696_v49 = vpop.eup %2695  ;;  %v959_v51 = vpop.f32.mrf.mxu0 }
 0x19e   : > { %v2698_v53 = vpop.eup %2697  ;;  %v2347_v54 = vmul.f32 -1.442695, %v3242_v46  ;;  %v1232_v56 = vadd.f32 %v1216_v42, %v1095_v48  ;;  %2709 = vrcp.f32 %v1291_v44  ;;  %v1087_v61 = vadd.f32 %v1086_v55, %v959_v51 }
 0x19f   : > { %v2700_v57 = vpop.eup %2699  ;;  %v1289_v0 = vadd.f32 1.0, %v2696_v49  ;;  %2711 = vpow2.f32 %v2349_v45  ;;  %v1333_v11 = vmul.f32 %v2698_v53, %v3206_v21 }
 0x1a0   : > { %v2702_v63 = vpop.eup %2701  ;;  %v1292_v1 = vadd.f32 1.0, %v2700_v57  ;;  %v2350_v2 = vmul.f32 -1.442695, %v1232_v56  ;;  %2713 = vpow2.f32 %v2347_v54  ;;  %v1230_v7 = vadd.f32 %v1214_v59, %v1087_v61 }
 0x1a1   : > { %v2704_v4 = vpop.eup %2703  ;;  %v1336_v9 = vmul.f32 %v2702_v63, %v3209_v28 }
 0x1a2   : > { %v2706_v8 = vpop.eup %2705  ;;  %2715 = vrcp.f32 %v1292_v1  ;;  %v2348_v39 = vmul.f32 -1.442695, %v1230_v7  ;;  %v1335_v14 = vmul.f32 %v2704_v4, %v3202_v12 }
 0x1a3   : > { %v2708_v10 = vpop.eup %2707  ;;  %v1334_v13 = vmul.f32 %v2706_v8, %v3213_v35  ;;  %2717 = vpow2.f32 %v2350_v2 }
 0x1a4   : > { %2719 = vrcp.f32 %v1289_v0  ;;  %v1290_v15 = vadd.f32 1.0, %v2708_v10  ;;  %v1348_v17 = vpack.c.bf16 %v1336_v9, %v1335_v14 }
 0x1a5   : > { %2721 = vpow2.f32 %v2348_v39  ;;  %v1347_v16 = vpack.c.bf16 %v1334_v13, %v1333_v11 }
 0x1a6   : > { %2723 = vrcp.f32 %v1290_v15 }
 0x1a7   : > { %2541 = vmatprep.mubr.bf16.mxu0 %v1347_v16 }
 0x1a8   : > { %2542 = vmatmul.mubr.bf16.gmra.mxu0 %v1348_v17 }
 0x1ab   : > { %v2710_v18 = vpop.eup %2709 }
 0x1ac   : > { %v2712_v28 = vpop.eup %2711  ;;  %v1339_v31 = vmul.f32 %v2710_v18, %v3218_v50 }
 0x1ad   : > { %v2714_v22 = vpop.eup %2713  ;;  %v1295_v25 = vadd.f32 1.0, %v2712_v28 }
 0x1ae   : > { %v1293_v24 = vadd.f32 1.0, %v2714_v22 }
 0x1af   : > { %v2716_v23 = vpop.eup %2715 }
 0x1b0   : > { %v2718_v21 = vpop.eup %2717  ;;  %2725 = vrcp.f32 %v1293_v24  ;;  %v1340_v6 = vmul.f32 %v2716_v23, %v3225_v5 }
 0x1b1   : > { %v2720_v35 = vpop.eup %2719  ;;  %v1296_v26 = vadd.f32 1.0, %v2718_v21 }
 0x1b2   : > { %v2722_v27 = vpop.eup %2721  ;;  %v1337_v58 = vmul.f32 %v2720_v35, %v3222_v60  ;;  %v1350_v33 = vpack.c.bf16 %v1340_v6, %v1339_v31 }
 0x1b3   : > { %v2724_v12 = vpop.eup %2723  ;;  %2727 = vrcp.f32 %v1296_v26  ;;  %v1294_v29 = vadd.f32 1.0, %v2722_v27 }
 0x1b4   : > { %v1338_v30 = vmul.f32 %v2724_v12, %v3230_v19  ;;  %2729 = vrcp.f32 %v1295_v25 }
 0x1b5   : > { %2731 = vrcp.f32 %v1294_v29 }
 0x1b6   : > { %v1349_v32 = vpack.c.bf16 %v1338_v30, %v1337_v58 }
 0x1b8   : > { %2545 = vmatprep.mubr.bf16.mxu0 %v1349_v32 }
 0x1b9   : > { %2546 = vmatmul.mubr.bf16.gmra.mxu0 %v1350_v33 }
 0x1bd   : > { %v2726_v52 = vpop.eup %2725 }
 0x1be   : > { %v1341_v5 = vmul.f32 %v2726_v52, %v3242_v46 }
 0x1c0   : > { %v2728_v62 = vpop.eup %2727 }
 0x1c1   : > { %v2730_v34 = vpop.eup %2729  ;;  %v1344_v36 = vmul.f32 %v2728_v62, %v1232_v56 }
 0x1c2   : > { %v2732_v47 = vpop.eup %2731  ;;  %v1343_v60 = vmul.f32 %v2730_v34, %v3238_v37  ;;  %v2351_v37 = vld [vmem:[%s3473_s9] ss:$0 sm:$0xff] }
 0x1c3   : > { %v1342_v38 = vmul.f32 %v2732_v47, %v1230_v7 }
 0x1c4   : > { %v1352_v19 = vpack.c.bf16 %v1344_v36, %v1343_v60  ;;  %v1727_v60 = vpop.permute.xlu1 %1726 }
 0x1c5   : > { %v1351_v40 = vpack.c.bf16 %v1342_v38, %v1341_v5 }
 0x1c7   : > { %2549 = vmatprep.mubr.bf16.mxu0 %v1351_v40 }
 0x1c8   : > { %2550 = vmatmul.mubr.bf16.gmra.mxu0 %v1352_v19 }
 0x257   : > { %v2539_v50 = vpop.f32.mrf.mxu0 }
 0x258   : > { %v3288_v28 = vadd.f32 %v2539_v50, %v2351_v37 }
 0x259   : > { %v1458_v41 = vpop.f32.mrf.mxu0 }
 0x25a   : > { %v2362_v25 = vmul.f32 -1.442695, %v3288_v28  ;;  %v3305_v33 = vadd.f32 %v2351_v37, %v1458_v41 }
 0x25b   : > { %v2540_v42 = vpop.f32.mrf.mxu0 }
 0x25c   : > { %v3297_v35 = vadd.f32 %v2540_v42, %v2351_v37  ;;  %v2360_v40 = vmul.f32 -1.442695, %v3305_v33  ;;  %v1722_v42 = vpop.permute.xlu0 %1721 }
 0x25d   : > { %v1461_v43 = vpop.f32.mrf.mxu0 }
 0x25e   : > { %v3299_v26 = vadd.f32 %v2351_v37, %v1461_v43  ;;  %v2363_v29 = vmul.f32 -1.442695, %v3297_v35 }
 0x260   : > { %v2361_v31 = vmul.f32 -1.442695, %v3299_v26 }
 0x268   : > { %v2543_v44 = vpop.f32.mrf.mxu0 }
 0x269   : > { %v3285_v17 = vadd.f32 %v2543_v44, %v2351_v37 }
 0x26a   : > { %v1474_v45 = vpop.f32.mrf.mxu0 }
 0x26b   : > { %v3293_v24 = vadd.f32 %v2351_v37, %v1474_v45  ;;  %v2366_v21 = vmul.f32 -1.442695, %v3285_v17 }
 0x26c   : > { %v2544_v48 = vpop.f32.mrf.mxu0 }
 0x26d   : > { %v3280_v39 = vadd.f32 %v2544_v48, %v2351_v37  ;;  %v2364_v12 = vmul.f32 -1.442695, %v3293_v24 }
 0x26e   : > { %v1477_v49 = vpop.f32.mrf.mxu0 }
 0x26f   : > { %v2367_v22 = vmul.f32 -1.442695, %v3280_v39  ;;  %v3291_v23 = vadd.f32 %v2351_v37, %v1477_v49  ;;  %v1717_v49 = vpop.permute.xlu1 %1716 }
 0x271   : > { %v2365_v27 = vmul.f32 -1.442695, %v3291_v23 }
 0x279   : > { %v2547_v51 = vpop.f32.mrf.mxu0 }
 0x27a   : > { %v3262_v57 = vadd.f32 %v2547_v51, %v2351_v37 }
 0x27b   : > { %v1490_v46 = vpop.f32.mrf.mxu0 }
 0x27c   : > { %v2370_v7 = vmul.f32 -1.442695, %v3262_v57  ;;  %v3274_v9 = vadd.f32 %v2351_v37, %v1490_v46 }
 0x27d   : > { %v2548_v53 = vpop.f32.mrf.mxu0 }
 0x27e   : > { %v3260_v55 = vadd.f32 %v2548_v53, %v2351_v37  ;;  %v2368_v18 = vmul.f32 -1.442695, %v3274_v9 }
 0x27f   : > { %v1493_v54 = vpop.f32.mrf.mxu0 }
 0x280   : > { %v2371_v1 = vmul.f32 -1.442695, %v3260_v55  ;;  %v3270_v2 = vadd.f32 %v2351_v37, %v1493_v54  ;;  %v1712_v54 = vpop.permute.xlu0 %1711 }
 0x282   : > { %v2369_v14 = vmul.f32 -1.442695, %v3270_v2 }
 0x288   : > { %v2551_v56 = vpop.f32.mrf.mxu0 }
 0x289   : > { %v3264_v59 = vadd.f32 %v2551_v56, %v2351_v37 }
 0x28a   : > { %v1506_v61 = vpop.f32.mrf.mxu0 }
 0x28b   : > { %v2374_v63 = vmul.f32 -1.442695, %v3264_v59  ;;  %v3267_v0 = vadd.f32 %v2351_v37, %v1506_v61 }
 0x28c   : > { %v2552_v4 = vpop.f32.mrf.mxu0 }
 0x28d   : > { %2733 = vpow2.f32 %v2374_v63  ;;  %v2372_v8 = vmul.f32 -1.442695, %v3267_v0  ;;  %v3276_v10 = vadd.f32 %v2552_v4, %v2351_v37 }
 0x28e   : > { %v1509_v11 = vpop.f32.mrf.mxu0 }
 0x28f   : > { %2735 = vpow2.f32 %v2372_v8  ;;  %v3278_v13 = vadd.f32 %v2351_v37, %v1509_v11  ;;  %v2375_v15 = vmul.f32 -1.442695, %v3276_v10 }
 0x290   : > { %2737 = vpow2.f32 %v2371_v1 }
 0x291   : > { %2739 = vpow2.f32 %v2370_v7  ;;  %v2373_v16 = vmul.f32 -1.442695, %v3278_v13  ;;  %v1707_v7 = vpop.permute.xlu1 %1706 }
 0x292   : > { %2741 = vpow2.f32 %v2375_v15 }
 0x293   : > { %2743 = vpow2.f32 %v2373_v16  ;;  %v1702_v16 = vpop.permute.xlu0 %1701 }
 0x294   : > { %2745 = vpow2.f32 %v2369_v14 }
 0x295   : > { %2747 = vpow2.f32 %v2368_v18 }
 0x296   : > { %2749 = vpow2.f32 %v2367_v22 }
 0x297   : > { %2751 = vpow2.f32 %v2366_v21 }
 0x298   : > { %2753 = vpow2.f32 %v2362_v25 }
 0x299   : > { %2755 = vpow2.f32 %v2365_v27 }
 0x29a   : > { %v2734_v6 = vpop.eup %2733  ;;  %2757 = vpow2.f32 %v2364_v12 }
 0x29b   : > { %v1583_v58 = vadd.f32 1.0, %v2734_v6 }
 0x29c   : > { %v2736_v30 = vpop.eup %2735 }
 0x29d   : > { %v2738_v32 = vpop.eup %2737  ;;  %v1581_v52 = vadd.f32 1.0, %v2736_v30  ;;  %2759 = vrcp.f32 %v1583_v58 }
 0x29e   : > { %v2740_v62 = vpop.eup %2739  ;;  %2761 = vpow2.f32 %v2363_v29  ;;  %v1580_v36 = vadd.f32 1.0, %v2738_v32  ;;  %v1697_v32 = vpop.permute.xlu1 %1696 }
 0x29f   : > { %v2742_v34 = vpop.eup %2741  ;;  %2763 = vpow2.f32 %v2361_v31  ;;  %v1579_v50 = vadd.f32 1.0, %v2740_v62 }
 0x2a0   : > { %v2744_v47 = vpop.eup %2743  ;;  %v1584_v5 = vadd.f32 1.0, %v2742_v34  ;;  %2765 = vrcp.f32 %v1581_v52 }
 0x2a1   : > { %v2746_v38 = vpop.eup %2745  ;;  %v1582_v19 = vadd.f32 1.0, %v2744_v47 }
 0x2a2   : > { %2767 = vrcp.f32 %v1584_v5  ;;  %v2748_v41 = vpop.eup %2747  ;;  %v1578_v43 = vadd.f32 1.0, %v2746_v38 }
 0x2a3   : > { %2769 = vrcp.f32 %v1582_v19  ;;  %v2750_v44 = vpop.eup %2749  ;;  %v1577_v45 = vadd.f32 1.0, %v2748_v41 }
 0x2a4   : > { %2771 = vrcp.f32 %v1580_v36  ;;  %v2752_v48 = vpop.eup %2751  ;;  %v1576_v46 = vadd.f32 1.0, %v2750_v44 }
 0x2a5   : > { %2773 = vpow2.f32 %v2360_v40  ;;  %v2754_v51 = vpop.eup %2753  ;;  %v1575_v56 = vadd.f32 1.0, %v2752_v48 }
 0x2a6   : > { %2775 = vrcp.f32 %v1579_v50  ;;  %v2756_v53 = vpop.eup %2755  ;;  %v1571_v27 = vadd.f32 1.0, %v2754_v51 }
 0x2a7   : > { %2777 = vrcp.f32 %v1578_v43  ;;  %v2758_v37 = vpop.eup %2757  ;;  %v1574_v1 = vadd.f32 1.0, %v2756_v53 }
 0x2a8   : > { %2779 = vrcp.f32 %v1577_v45  ;;  %v1573_v11 = vadd.f32 1.0, %v2758_v37 }
 0x2a9   : > { %2781 = vrcp.f32 %v1576_v46 }
 0x2aa   : > { %v2760_v61 = vpop.eup %2759  ;;  %2783 = vrcp.f32 %v1575_v56 }
 0x2ab   : > { %v2762_v63 = vpop.eup %2761  ;;  %v1631_v14 = vmul.f32 %v2760_v61, %v3264_v59  ;;  %2785 = vrcp.f32 %v1574_v1 }
 0x2ac   : > { %v2764_v4 = vpop.eup %2763  ;;  %v1572_v18 = vadd.f32 1.0, %v2762_v63  ;;  %2787 = vrcp.f32 %v1573_v11 }
 0x2ad   : > { %v2766_v8 = vpop.eup %2765  ;;  %v1743_v29 = vmul.f32 %v1722_v42, %v1631_v14  ;;  %v1570_v59 = vadd.f32 1.0, %v2764_v4 }
 0x2ae   : > { %v1629_v58 = vmul.f32 %v2766_v8, %v3267_v0  ;;  %2789 = vrcp.f32 %v1572_v18 }
 0x2af   : > { %v2768_v15 = vpop.eup %2767  ;;  %2791 = vrcp.f32 %v1571_v27 }
 0x2b0   : > { %v2770_v22 = vpop.eup %2769  ;;  %v1632_v21 = vmul.f32 %v2768_v15, %v3276_v10  ;;  %v1692_v10 = vpop.permute.xlu0 %1691  ;;  %v1741_v5 = vmul.f32 %v1712_v54, %v1629_v58  ;;  %2793 = vrcp.f32 %v1570_v59  ;;  %v1760_v58 = vld [vmem:[#allocation2] sm:$0xff]  ;;  %v1761_v59 = vld [vmem:[#allocation2 + $0x8] sm:$0xff] }
 0x2b1   : > { %v2772_v25 = vpop.eup %2771  ;;  %v1630_v12 = vmul.f32 %v2770_v22, %v3278_v13 }
 0x2b2   : > { %v2774_v6 = vpop.eup %2773  ;;  %v1744_v30 = vmul.f32 %v1727_v60, %v1632_v21  ;;  %v1628_v52 = vmul.f32 %v2772_v25, %v3260_v55  ;;  %v1687_v55 = vpop.permute.xlu1 %1686 }
 0x2b3   : > { %v2776_v31 = vpop.eup %2775  ;;  %v1742_v34 = vmul.f32 %v1717_v49, %v1630_v12  ;;  %v1569_v36 = vadd.f32 1.0, %v2774_v6  ;;  %v2376_v6 = vld [vmem:[%s589_s27] ss:$0 sm:$0xff] }
 0x2b4   : > { %v1769_v62 = vpack.c.bf16 %v1744_v30, %v1743_v29  ;;  %v2778_v47 = vpop.eup %2777  ;;  %v1627_v13 = vmul.f32 %v2776_v31, %v3262_v57  ;;  %v1740_v0 = vmul.f32 %v1707_v7, %v1628_v52  ;;  %v1682_v43 = vpop.permute.xlu0 %1681 }
 0x2b5   : > { %v2780_v38 = vpop.eup %2779  ;;  %v1626_v60 = vmul.f32 %v2778_v47, %v3270_v2  ;;  %v1768_v40 = vpack.c.bf16 %v1742_v34, %v1741_v5  ;;  %2795 = vrcp.f32 %v1569_v36 }
 0x2b6   : > { %2554 = vmatpush3.bf16.msra.mxu1 %v1769_v62  ;;  %v2782_v19 = vpop.eup %2781  ;;  %v1739_v50 = vmul.f32 %v1702_v16, %v1627_v13  ;;  %v1625_v41 = vmul.f32 %v2780_v38, %v3274_v9  ;;  %v1677_v46 = vpop.permute.xlu1 %1676 }
 0x2b7   : > { %2555 = vmatprep.subr.bf16.mxu1 %v2868_v20  ;;  %v2784_v42 = vpop.eup %2783  ;;  %v1624_v57 = vmul.f32 %v2782_v19, %v3280_v39  ;;  %v1738_v45 = vmul.f32 %v1697_v32, %v1626_v60 }
 0x2b8   : > { %v1767_v44 = vpack.c.bf16 %v1740_v0, %v1739_v50  ;;  %v2786_v48 = vpop.eup %2785  ;;  %v1623_v49 = vmul.f32 %v2784_v42, %v3285_v17  ;;  %v1737_v2 = vmul.f32 %v1692_v10, %v1625_v41  ;;  %v1672_v56 = vpop.permute.xlu0 %1671 }
 0x2b9   : > { %v2788_v51 = vpop.eup %2787  ;;  %v1736_v9 = vmul.f32 %v1687_v55, %v1624_v57  ;;  %v1622_v54 = vmul.f32 %v2786_v48, %v3291_v23 }
 0x2ba   : > { %2556 = vmatpush3.bf16.msra.mxu1 %v1768_v40  ;;  %v1766_v37 = vpack.c.bf16 %v1738_v45, %v1737_v2  ;;  %v1735_v61 = vmul.f32 %v1682_v43, %v1623_v49  ;;  %v1621_v39 = vmul.f32 %v2788_v51, %v3293_v24  ;;  %v1667_v8 = vpop.permute.xlu1 %1666  ;;  %v1746_v24 = vshrl.u32 %v597_v3, 7 }
 0x2bb   : > { %2557 = vmatprep.subr.bf16.mxu1 %v2868_v20  ;;  %v2790_v53 = vpop.eup %2789  ;;  %v1734_v4 = vmul.f32 %v1677_v46, %v1622_v54 }
 0x2bc   : > { %v2792_v63 = vpop.eup %2791  ;;  %v1620_v17 = vmul.f32 %v2790_v53, %v3297_v35  ;;  %v1765_v1 = vpack.c.bf16 %v1736_v9, %v1735_v61  ;;  %v1733_v14 = vmul.f32 %v1672_v56, %v1621_v39  ;;  %v1662_v15 = vpop.permute.xlu0 %1661  ;;  %vm1753_vm2 = vcmp.eq.s32.totalorder %v1746_v24, %v2376_v6 }
 0x2bd   : > { %v2794_v7 = vpop.eup %2793  ;;  %v1619_v11 = vmul.f32 %v2792_v63, %v3288_v28  ;;  %v1747_v28 = vadd.s32 8, %v1746_v24 }
 0x2be   : > { %2558 = vmatpush3.bf16.msra.mxu1 %v1767_v44  ;;  %v1732_v16 = vmul.f32 %v1667_v8, %v1620_v17  ;;  %v1618_v18 = vmul.f32 %v2794_v7, %v3299_v26  ;;  %v1764_v22 = vpack.c.bf16 %v1734_v4, %v1733_v14  ;;  %v1657_v25 = vpop.permute.xlu1 %1656 }
 0x2bf   : > { %2559 = vmatprep.subr.bf16.mxu1 %v2868_v20  ;;  %v1731_v35 = vmul.f32 %v1662_v15, %v1619_v11  ;;  %vm1754_vm3 = vcmp.eq.s32.totalorder %v1747_v28, %v2376_v6 }
 0x2c0   : > { %v1730_v12 = vmul.f32 %v1657_v25, %v1618_v18  ;;  %v1652_v3 = vpop.permute.xlu0 %1651  ;;  %vm2379_vm5 = vmpackc.low %vm1754_vm3, %vm1753_vm2 }
 0x2c1   : > { %v1763_v27 = vpack.c.bf16 %v1732_v16, %v1731_v35 }
 0x2c2   : > { %2560 = vmatpush3.bf16.msra.mxu1 %v1766_v37  ;;  %v2796_v23 = vpop.eup %2795 }
 0x2c3   : > { %2561 = vmatprep.subr.bf16.mxu1 %v2868_v20  ;;  %v1617_v21 = vmul.f32 %v2796_v23, %v3305_v33  ;;  %v2870_v33 = vmov 1.0|1.0  }
 0x2c5   : > { %v1729_v29 = vmul.f32 %v1652_v3, %v1617_v21 }
 0x2c6   : > { %2562 = vmatpush3.bf16.msra.mxu1 %v1765_v1 }
 0x2c7   : > { %2563 = vmatprep.subr.bf16.mxu1 %v2868_v20  ;;  %v1762_v26 = vpack.c.bf16 %v1730_v12, %v1729_v29 }
 0x2ca   : > { %2564 = vmatpush3.bf16.msra.mxu1 %v1764_v22 }
 0x2cb   : > { %2565 = vmatprep.subr.bf16.mxu1 %v2868_v20 }
 0x2ce   : > { %2566 = vmatpush3.bf16.msra.mxu1 %v1763_v27 }
 0x2cf   : > { %2567 = vmatprep.subr.bf16.mxu1 %v2868_v20 }
 0x2d2   : > { %2568 = vmatpush3.bf16.msra.mxu1 %v1762_v26 }
 0x2d5   : > { %2570 = vmatmul.mubr.msk.bf16.vlgmr.msra.gmra.mxu1 %vm2379_vm5, %v2870_v33 }
 0x395   : > { %v1804_v30 = vpop.f32.mrf.mxu1 }
 0x396   : > { %v1811_v31 = vadd.f32 %v1804_v30, %v1760_v58 }
 0x397   : > { %v2571_v32 = vpop.f32.mrf.mxu1 }
 0x398   : > { %1813 = vst [vmem:[#allocation2] sm:$0xff] %v1811_v31  ;;  %1818 = sbr.rel (%p2381_p6) target bundleno = 1396 (0x574), region = 92 }
 0x399   : > { %v1807_v52 = vpop.f32.mrf.mxu1 }
 0x39a   : > { %v1812_v62 = vadd.f32 %v1807_v52, %v1761_v59 }
 0x39b   : > { %v2572_v34 = vpop.f32.mrf.mxu1 }
 0x39c   : > { %1814 = vst [vmem:[#allocation2 + $0x8] sm:$0xff] %v1812_v62 }
 0x39d   : > { %v2797_v20 = vld [vmem:[%s3476_s12 + $0x38] sm:$0xff]   ;;  %v2871_v47 = vmov 0.0   ;;  %v2799_v36 = vld [vmem:[%s3476_s12 + $0x30] sm:$0xff]   ;;  %vm2872_vm6 = vmmov 0   ;;  %v2801_v5 = vld [vmem:[%s3476_s12 + $0x28] sm:$0xff]  }
 0x39e   : > { %2573 = vmatprep.subr.bf16.mxu0 %v2871_v47  ;;  %2593 = vmatprep.subr.bf16.mxu1 %v2871_v47  ;;  %v2798_v10 = vld [vmem:[%s3475_s11 + $0x38] sm:$0xff]   ;;  %v2800_v13 = vld [vmem:[%s3475_s11 + $0x30] sm:$0xff]   ;;  %v2802_v38 = vld [vmem:[%s3475_s11 + $0x28] sm:$0xff]  }
 0x39f   : > { %2574 = vmatpush3.bf16.msra.mxu0 %v2797_v20  ;;  %2589 = vmatprep.mubr.msk.bf16.mxu0 %vm2872_vm6, %v2871_v47  ;;  %v2803_v0 = vld [vmem:[%s3476_s12 + $0x20] sm:$0xff]   ;;  %v2805_v40 = vld [vmem:[%s3476_s12 + $0x18] sm:$0xff]   ;;  %v2807_v55 = vld [vmem:[%s3476_s12 + $0x10] sm:$0xff]  }
 0x3a0   : > { %2594 = vmatpush3.bf16.msra.mxu1 %v2798_v10  ;;  %2575 = vmatprep.subr.bf16.mxu0 %v2871_v47  ;;  %v2804_v60 = vld [vmem:[%s3475_s11 + $0x20] sm:$0xff]   ;;  %v2806_v19 = vld [vmem:[%s3475_s11 + $0x18] sm:$0xff]   ;;  %v2808_v50 = vld [vmem:[%s3475_s11 + $0x10] sm:$0xff]  }
 0x3a1   : > { %2595 = vmatprep.subr.bf16.mxu1 %v2871_v47  ;;  %2609 = vmatprep.mubr.msk.bf16.mxu1 %vm2872_vm6, %v2871_v47  ;;  %v2809_v41 = vld [vmem:[%s3476_s12 + $0x8] sm:$0xff]   ;;  %v2811_v43 = vld [vmem:[%s3476_s12] sm:$0xff]   ;;  %v2814_v2 = vld [vmem:[%s3490_s24 + $0x38] sm:$0xff]  }
 0x3a2   : > { %v2810_v42 = vld [vmem:[%s3475_s11 + $0x8] sm:$0xff]   ;;  %v1819_v57 = vld [vmem:[#allocation2] sm:$0xff]  ;;  %v2815_v51 = vld [vmem:[%s3490_s24 + $0x30] sm:$0xff]  }
 0x3a3   : > { %2576 = vmatpush3.bf16.msra.mxu0 %v2799_v36  ;;  %v1820_v44 = vld [vmem:[#allocation2 + $0x8] sm:$0xff]  ;;  %v2812_v45 = vld [vmem:[%s3475_s11] sm:$0xff]   ;;  %v2818_v9 = vld [vmem:[%s3490_s24 + $0x18] sm:$0xff]  }
 0x3a4   : > { %2596 = vmatpush3.bf16.msra.mxu1 %v2800_v13  ;;  %2577 = vmatprep.subr.bf16.mxu0 %v2871_v47  ;;  %v1821_v48 = vpack.c.bf16 %v1820_v44, %v1819_v57  ;;  %v2813_v49 = vld [vmem:[%s3474_s10] sm:$0xff]   ;;  %v2816_v46 = vld [vmem:[%s3490_s24 + $0x28] sm:$0xff]   ;;  %v2819_v54 = vld [vmem:[%s3490_s24 + $0x10] sm:$0xff]  }
 0x3a5   : > { %2597 = vmatprep.subr.bf16.mxu1 %v2871_v47  ;;  %v2817_v53 = vld [vmem:[%s3490_s24 + $0x20] sm:$0xff]   ;;  %v2820_v37 = vld [vmem:[%s3490_s24 + $0x8] sm:$0xff]  }
 0x3a6   : > { %v2821_v56 = vld [vmem:[%s3490_s24] sm:$0xff]  }
 0x3a7   : > { %2578 = vmatpush3.bf16.msra.mxu0 %v2801_v5  ;;  %v2399_v63 = vld [vmem:[%s3491_s30] ss:$0 sm:$0xff] }
 0x3a8   : > { %2598 = vmatpush3.bf16.msra.mxu1 %v2802_v38  ;;  %2579 = vmatprep.subr.bf16.mxu0 %v2871_v47  ;;  %v2402_v29 = vld [vmem:[%s3492_s17] ss:$0 sm:$0xff] }
 0x3a9   : > { %2599 = vmatprep.subr.bf16.mxu1 %v2871_v47 }
 0x3ab   : > { %2580 = vmatpush3.bf16.msra.mxu0 %v2803_v0 }
 0x3ac   : > { %2600 = vmatpush3.bf16.msra.mxu1 %v2804_v60  ;;  %2581 = vmatprep.subr.bf16.mxu0 %v2871_v47 }
 0x3ad   : > { %2601 = vmatprep.subr.bf16.mxu1 %v2871_v47 }
 0x3af   : > { %2582 = vmatpush3.bf16.msra.mxu0 %v2805_v40 }
 0x3b0   : > { %2602 = vmatpush3.bf16.msra.mxu1 %v2806_v19  ;;  %2583 = vmatprep.subr.bf16.mxu0 %v2871_v47 }
 0x3b1   : > { %2603 = vmatprep.subr.bf16.mxu1 %v2871_v47 }
 0x3b3   : > { %2584 = vmatpush3.bf16.msra.mxu0 %v2807_v55 }
 0x3b4   : > { %2604 = vmatpush3.bf16.msra.mxu1 %v2808_v50  ;;  %2585 = vmatprep.subr.bf16.mxu0 %v2871_v47 }
 0x3b5   : > { %2605 = vmatprep.subr.bf16.mxu1 %v2871_v47 }
 0x3b7   : > { %2586 = vmatpush3.bf16.msra.mxu0 %v2809_v41 }
 0x3b8   : > { %2606 = vmatpush3.bf16.msra.mxu1 %v2810_v42  ;;  %2587 = vmatprep.subr.bf16.mxu0 %v2871_v47 }
 0x3b9   : > { %2607 = vmatprep.subr.bf16.mxu1 %v2871_v47 }
 0x3bb   : > { %2588 = vmatpush3.bf16.msra.mxu0 %v2811_v43 }
 0x3bc   : > { %2608 = vmatpush3.bf16.msra.mxu1 %v2812_v45  ;;  %2613 = vmatprep.subr.bf16.mxu0 %v2871_v47 }
 0x3be   : > { %2590 = vmatmul.mubr.bf16.vlgmr.msra.gmra.mxu0 %v1821_v48 }
 0x3bf   : > { %2610 = vmatmul.mubr.bf16.vlgmr.msra.gmra.mxu1 %v2813_v49  ;;  %2629 = vmatprep.mubr.msk.bf16.mxu0 %vm2872_vm6, %v2871_v47 }
 0x3c0   : > { %2614 = vmatpush3.bf16.msra.mxu0 %v2814_v2 }
 0x3c1   : > { %2615 = vmatprep.subr.bf16.mxu0 %v2871_v47 }
 0x3c4   : > { %2616 = vmatpush3.bf16.msra.mxu0 %v2815_v51 }
 0x3c5   : > { %2617 = vmatprep.subr.bf16.mxu0 %v2871_v47 }
 0x3c8   : > { %2618 = vmatpush3.bf16.msra.mxu0 %v2816_v46 }
 0x3c9   : > { %2619 = vmatprep.subr.bf16.mxu0 %v2871_v47 }
 0x3cc   : > { %2620 = vmatpush3.bf16.msra.mxu0 %v2817_v53 }
 0x3cd   : > { %2621 = vmatprep.subr.bf16.mxu0 %v2871_v47 }
 0x3d0   : > { %2622 = vmatpush3.bf16.msra.mxu0 %v2818_v9 }
 0x3d1   : > { %2623 = vmatprep.subr.bf16.mxu0 %v2871_v47 }
 0x3d4   : > { %2624 = vmatpush3.bf16.msra.mxu0 %v2819_v54 }
 0x3d5   : > { %2625 = vmatprep.subr.bf16.mxu0 %v2871_v47 }
 0x3d8   : > { %2626 = vmatpush3.bf16.msra.mxu0 %v2820_v37 }
 0x3d9   : > { %2627 = vmatprep.subr.bf16.mxu0 %v2871_v47 }
 0x3dc   : > { %2628 = vmatpush3.bf16.msra.mxu0 %v2821_v56 }
 0x47e   : > { %v1938_v61 = vpop.f32.mrf.mxu0 }
 0x47f   : > { %v2033_v39 = vpop.f32.mrf.mxu1 }
 0x480   : > { %v2034_v17 = vadd.f32 %v2033_v39, %v1938_v61  ;;  %v2591_v1 = vpop.f32.mrf.mxu0 }
 0x481   : > { %v2611_v4 = vpop.f32.mrf.mxu1 }
 0x482   : > { %v2047_v7 = vadd.f32 %v2399_v63, %v2034_v17  ;;  %v1941_v8 = vpop.f32.mrf.mxu0 }
 0x483   : > { %v2036_v11 = vpop.f32.mrf.mxu1 }
 0x484   : > { %v2400_v14 = vmul.f32 -1.442695, %v2047_v7  ;;  %v2037_v23 = vadd.f32 %v2036_v11, %v1941_v8  ;;  %v2592_v15 = vpop.f32.mrf.mxu0 }
 0x485   : > { %v2612_v24 = vpop.f32.mrf.mxu1 }
 0x486   : > { %2822 = vpow2.f32 %v2400_v14  ;;  %v2048_v16 = vadd.f32 %v2399_v63, %v2037_v23 }
 0x488   : > { %v2401_v18 = vmul.f32 -1.442695, %v2048_v16 }
 0x48a   : > { %2824 = vpow2.f32 %v2401_v18 }
 0x493   : > { %v2823_v22 = vpop.eup %2822 }
 0x494   : > { %v2055_v35 = vadd.f32 1.0, %v2823_v22 }
 0x496   : > { %2826 = vrcp.f32 %v2055_v35 }
 0x497   : > { %v2825_v21 = vpop.eup %2824 }
 0x498   : > { %v2056_v25 = vadd.f32 1.0, %v2825_v21 }
 0x49a   : > { %2828 = vrcp.f32 %v2056_v25 }
 0x4a3   : > { %v2827_v28 = vpop.eup %2826 }
 0x4a4   : > { %v2061_v12 = vmul.f32 %v2827_v28, %v2047_v7 }
 0x4a7   : > { %v2829_v27 = vpop.eup %2828 }
 0x4a8   : > { %v2062_v6 = vmul.f32 %v2829_v27, %v2048_v16 }
 0x4aa   : > { %v2063_v3 = vpack.c.bf16 %v2062_v6, %v2061_v12 }
 0x4ac   : > { %2630 = vmatmul.mubr.bf16.vlgmr.msra.gmra.mxu0 %v2063_v3 }
 0x56c   : > { %v2169_v26 = vpop.f32.mrf.mxu0 }
 0x56d   : > { %v2170_v33 = vadd.f32 %v2402_v29, %v2169_v26 }
 0x56e   : > { %v2631_v58 = vpop.f32.mrf.mxu0 }
 0x56f   : > { %2176 = vst [vmem:[#allocation3] sm:$0xff] %v2170_v33 }
 0x570   : > { %v2172_v30 = vpop.f32.mrf.mxu0 }
 0x571   : > { %v2173_v31 = vadd.f32 %v2402_v29, %v2172_v30 }
 0x572   : > { %v2632_v32 = vpop.f32.mrf.mxu0 }
 0x573   : > { %2177 = vst [vmem:[#allocation3 + $0x8] sm:$0xff] %v2173_v31 }
 0x574 PF: > { %p2637_p7 = scmp.eq.s32.totalorder %s2967_s22, 1  ;;  %s2873_s18 = smov [#allocation3]  }
 0x575   : > { %s2184_s19 = sshll.u32 %s2873_s18, 4  ;;  %s2185_s19 = int_to_ptr.vmem [resolvable:$true] %s2184_s19 }
 0x576   : > { %s2830_s20 = scalar_lea.vmem %s2185_s19, 256  ;;  %p2837_p11 = scmp.lt.s32.totalorder %s2185_s19, %s2185_s19 }
 0x577   : > { %p2831_p8 = scmp.ne.s32.totalorder %s2185_s19, %s2830_s20  ;;  %p2838_p12 = scmp.lt.s32.totalorder %s2830_s20, %s2830_s20 }
 0x579   : > { %p2832_p9 = pnand %p2831_p8, %p2637_p7  ;;  %p2839_p13 = por %p2838_p12, %p2837_p11 }
 0x57b   : > { %p2833_p10 = pneg %p2832_p9 }
 0x57d   : > { %p2840_p0 = pnand %p2839_p13, %p2833_p10 }
 0x57f   : > { %2843 = shalt.err (!%p2840_p0)
}
 0x580   : > { %s2874_s25 = smov 128   ;;  %s2875_s13 = smov 8  }
 0x581   : > { %s3493_s21 = sld [smem:[#allocation11_spill]] }
 0x587   : > { %2634 = dma.vmem_to_hbm [thread:$0]  (%p2637_p7), %s2185_s19, 256, %s3493_s21, [#allocation4], %s2874_s25, %s2874_s25, %s2875_s13  }
 0x588   : > { %2859 = dma.done.wait (%p2637_p7), [#allocation4], 256  }
 0x589   : > { %2861 = vsyncadd (%p2637_p7), [#allocation4], 4294967040 }
 0x58a PF: > { %s3494_s15 = sld [smem:[#allocation6_spill]] }
 0x590   : > { %s27_s21 = sadd.s32 1, %s3494_s15  }
 0x591   : > { %p24_p1 = scmp.ge.s32.totalorder %s27_s21, 4  }
 0x593   :  { %26 = sbr.rel (!%p24_p1) target bundleno = 7 (0x7), region = 131 }
 0x598   :  { %2200 = vsyncpa [#allocation4], 1 }
 0x599   :  { %2202 = vsyncpa [#allocation4 + $0x1], 1 }

</bundles_post_ra>
